<compile_context>
chip_gen: v7x
topology: tpu7x:2x2x1
jax: 0.10.0
libtpu: 0.0.40
codegen_flags: <defaults>
</compile_context>

<pallas_src>
import jax
import jax.numpy as jnp
import numpy as np
from jax import lax
from jax.experimental import pallas as pl
from jax.experimental.pallas import tpu as pltpu


def bilstm_kernel(x_ref, wih_ref, whh_ref, b_ref,
                  w1_ref, b1_ref, w2_ref, b2_ref,
                  out_ref, xg_ref):
    f32 = jnp.float32
    BB = out_ref.shape[0]          # batch rows in this block (multiple of 8)
    TB = x_ref.shape[0]            # T * BB (time-major rows within the block)
    T = TB // BB
    H2 = w1_ref.shape[0]           # 2H  (fwd|bwd hidden along lanes)

    # ---- Hoisted input projection: all timesteps, both directions, one matmul ----
    # x rows are [x(t) | x(T-1-t)] features; wih is block-diagonal per direction, so
    # xg row-block t already holds fwd gates at time t and bwd gates at time T-1-t.
    xg_ref[...] = (jnp.dot(x_ref[...], wih_ref[...], preferred_element_type=f32)
                   + b_ref[...])

    whh = whh_ref[...]             # (2H, 8H) bf16, block-structured, stays resident
    # NOTE: RHS is identical every step; weight-stationary MXU driving
    # (pltpu.matmul_push_rhs / matmul_acc_lhs) would avoid re-streaming it — left to
    # the compiler here to keep the lowering simple/portable.

    def sigm(z):
        # sigmoid(z) == 0.5*tanh(0.5*z) + 0.5 : single EUP op (tanh) + free VPU ops.
        return 0.5 * jnp.tanh(0.5 * z) + 0.5

    h = jnp.zeros((BB, H2), f32)   # [h_fwd | h_bwd] along lanes
    c = jnp.zeros((BB, H2), f32)
    acc = jnp.zeros((BB, H2), f32)

    # ---- Fused fwd+bwd recurrence; T is small & static -> fully unrolled ----
    for t in range(T):
        gx = xg_ref[pl.ds(t * BB, BB), :]                        # one contiguous load
        gates = jnp.dot(h.astype(whh.dtype), whh,
                        preferred_element_type=f32) + gx         # (BB, 8H) f32
        # Gate-pair slices are whole 2H = 256-lane blocks (lane-aligned).
        i = sigm(gates[:, 0 * H2:1 * H2])
        f = sigm(gates[:, 1 * H2:2 * H2])
        g = jnp.tanh(gates[:, 2 * H2:3 * H2])
        o = sigm(gates[:, 3 * H2:4 * H2])
        c = f * c + i * g
        h = o * jnp.tanh(c)
        acc = acc + h

    # Mean pool over time (order-invariant, so reversed bwd accumulation is fine).
    pooled = acc * (1.0 / T)                                     # (BB, 2H) f32

    # ---- Classifier head: Linear(2H,H) -> ReLU -> Linear(H, O_pad) ----
    hidden = jnp.dot(pooled.astype(w1_ref.dtype), w1_ref[...],
                     preferred_element_type=f32) + b1_ref[...]
    hidden = jnp.maximum(hidden, 0.0)
    out = jnp.dot(hidden.astype(w2_ref.dtype), w2_ref[...],
                  preferred_element_type=f32) + b2_ref[...]
    out_ref[...] = out.astype(out_ref.dtype)                     # (BB, 128) lane-dense


def bilstm_forward(x_btd, kp, block_b=8):
    """x_btd: (B, T, D) batch-first like PyTorch; returns padded (Bp, O_pad) f32.

    block_b: rows per grid block (multiple of 8). Use 128-256 at production batch
    sizes to fill the MXU; 8 keeps padding minimal at toy sizes.
    """
    B, T, D = x_btd.shape
    H = kp["w1"].shape[1]
    O_pad = kp["w2"].shape[1]
    BB = block_b
    nblk = max(1, (B + BB - 1) // BB)
    Bp = nblk * BB

    x_pad = jnp.zeros((Bp, T, D), jnp.float32).at[:B].set(x_btd)
    x_t = jnp.transpose(x_pad, (1, 0, 2))                        # (T, Bp, D) time-major
    # fwd features | time-reversed features along the last axis -> (T, Bp, 2D)
    x_cat = jnp.concatenate([x_t, x_t[::-1]], axis=-1)
    # per-batch-block, time-major rows: (nblk, T*BB, 2D), bf16 matmul operand
    x_blk = (x_cat.reshape(T, nblk, BB, 2 * D)
                  .transpose(1, 0, 2, 3)
                  .reshape(nblk, T * BB, 2 * D)
                  .astype(jnp.bfloat16))

    args = (x_blk, kp["wih_big"], kp["whh_big"], kp["b_big"],
            kp["w1"], kp["b1"], kp["w2"], kp["b2"])
    vmem_full = pl.BlockSpec(memory_space=pltpu.MemorySpace.VMEM)  # whole array, resident

    out = pl.pallas_call(
        bilstm_kernel,
        out_shape=jax.ShapeDtypeStruct((nblk, BB, O_pad), jnp.float32),
        grid=(nblk,),
        in_specs=[pl.BlockSpec((None, T * BB, 2 * D), lambda i: (i, 0, 0))]
                 + [vmem_full] * 7,
        out_specs=pl.BlockSpec((None, BB, O_pad), lambda i: (i, 0, 0)),
        scratch_shapes=[pltpu.VMEM((T * BB, 8 * H), jnp.float32)],  # hoisted x-gates
        compiler_params=pltpu.CompilerParams(
            dimension_semantics=("parallel",)),                    # batch blocks -> 2 TCs on v7x
    )(*args)
    return out.reshape(Bp, O_pad)


def init_raw_params(key, D, H, O):
    """Raw PyTorch-layout weights, uniform(-1/sqrt(fan), 1/sqrt(fan))."""
    ks = jax.random.split(key, 16)
    kH = 1.0 / np.sqrt(H)

    def u(k, shape, bound):
        return jax.random.uniform(k, shape, jnp.float32, -bound, bound)

    raw = {
        "wih_f": u(ks[0], (4 * H, D), kH), "whh_f": u(ks[1], (4 * H, H), kH),
        "bih_f": u(ks[2], (4 * H,), kH),   "bhh_f": u(ks[3], (4 * H,), kH),
        "wih_b": u(ks[4], (4 * H, D), kH), "whh_b": u(ks[5], (4 * H, H), kH),
        "bih_b": u(ks[6], (4 * H,), kH),   "bhh_b": u(ks[7], (4 * H,), kH),
    }
    k1 = 1.0 / np.sqrt(2 * H)
    raw["w1"] = u(ks[8], (H, 2 * H), k1)
    raw["b1"] = u(ks[9], (H,), k1)
    k2 = 1.0 / np.sqrt(H)
    raw["w2"] = u(ks[10], (O, H), k2)
    raw["b2"] = u(ks[11], (O,), k2)
    return raw


def prepare_kernel_params(raw):
    """Build the kernel's fused/interleaved layout.

    Column blocks of width H along the 8H gate axis are ordered
    [i_f, i_b, f_f, f_b, g_f, g_b, o_f, o_b].
    wih_big is (2D, 8H) block-diagonal: rows 0:D (x(t) features) drive forward
    columns, rows D:2D (x(T-1-t) features) drive backward columns.
    whh_big is (2H, 8H): rows 0:H (h_fwd) drive forward columns, rows H:2H (h_bwd)
    drive backward columns.  Matmul weights stored in bf16; biases stay f32.
    """
    H = raw["whh_f"].shape[1]
    D = raw["wih_f"].shape[1]
    O = raw["w2"].shape[0]
    G = 8 * H
    bf16 = jnp.bfloat16

    wih_big = jnp.zeros((2 * D, G), jnp.float32)
    whh_big = jnp.zeros((2 * H, G), jnp.float32)
    b_big = jnp.zeros((1, G), jnp.float32)
    dirs = [(raw["wih_f"], raw["whh_f"], raw["bih_f"], raw["bhh_f"]),
            (raw["wih_b"], raw["whh_b"], raw["bih_b"], raw["bhh_b"])]
    for d, (wih, whh, bih, bhh) in enumerate(dirs):
        xrows = slice(d * D, (d + 1) * D)
        hrows = slice(d * H, (d + 1) * H)
        for k in range(4):                       # PyTorch gate order i, f, g, o
            blk = 2 * k + d                      # interleave [i_f,i_b,f_f,f_b,...]
            cols = slice(blk * H, (blk + 1) * H)
            wih_big = wih_big.at[xrows, cols].set(wih[k * H:(k + 1) * H, :].T)
            whh_big = whh_big.at[hrows, cols].set(whh[k * H:(k + 1) * H, :].T)
            b_big = b_big.at[0, cols].set(
                bih[k * H:(k + 1) * H] + bhh[k * H:(k + 1) * H])

    O_pad = ((O + 127) // 128) * 128             # lane-dense output store
    w2_pad = jnp.zeros((H, O_pad), jnp.float32).at[:, :O].set(raw["w2"].T)
    b2_pad = jnp.zeros((1, O_pad), jnp.float32).at[0, :O].set(raw["b2"])

    return {
        "wih_big": wih_big.astype(bf16),         # (2D, 8H) block-diagonal
        "whh_big": whh_big.astype(bf16),         # (2H, 8H) block-structured
        "b_big": b_big,                          # (1, 8H) f32
        "w1": raw["w1"].T.astype(bf16),          # (2H, H)
        "b1": raw["b1"][None, :],                # (1, H) f32
        "w2": w2_pad.astype(bf16),               # (H, O_pad)
        "b2": b2_pad,                            # (1, O_pad) f32
    }


def reference_forward(x_btd, raw):
    """Pure-JAX reference of PyTorch BiLSTM.forward (eval mode), same bf16 operands."""
    B, T, D = x_btd.shape
    H = raw["whh_f"].shape[1]
    bf16 = jnp.bfloat16

    def run_dir(xs_tbd, wih, whh, bih, bhh):
        wih_t = wih.astype(bf16).T               # (D, 4H)
        whh_t = whh.astype(bf16).T               # (H, 4H)
        b = (bih + bhh)[None, :]                 # (1, 4H) f32

        def step(carry, x_t):
            h, c = carry
            gates = (jnp.dot(x_t.astype(bf16), wih_t, preferred_element_type=jnp.float32)
                     + jnp.dot(h.astype(bf16), whh_t, preferred_element_type=jnp.float32)
                     + b)
            i = jax.nn.sigmoid(gates[:, 0 * H:1 * H])
            f = jax.nn.sigmoid(gates[:, 1 * H:2 * H])
            g = jnp.tanh(gates[:, 2 * H:3 * H])
            o = jax.nn.sigmoid(gates[:, 3 * H:4 * H])
            c = f * c + i * g
            h = o * jnp.tanh(c)
            return (h, c), h

        init = (jnp.zeros((B, H), jnp.float32), jnp.zeros((B, H), jnp.float32))
        _, hs = lax.scan(step, init, xs_tbd)
        return hs                                # (T, B, H)

    x_tbd = jnp.transpose(x_btd, (1, 0, 2))
    hs_f = run_dir(x_tbd, raw["wih_f"], raw["whh_f"], raw["bih_f"], raw["bhh_f"])
    hs_b = run_dir(x_tbd[::-1], raw["wih_b"], raw["whh_b"], raw["bih_b"], raw["bhh_b"])
    pooled = jnp.concatenate([hs_f.mean(0), hs_b.mean(0)], axis=-1)      # (B, 2H)
    hidden = jnp.maximum(
        jnp.dot(pooled.astype(bf16), raw["w1"].astype(bf16).T,
                preferred_element_type=jnp.float32) + raw["b1"][None, :], 0.0)
    return (jnp.dot(hidden.astype(bf16), raw["w2"].astype(bf16).T,
                    preferred_element_type=jnp.float32) + raw["b2"][None, :])


if __name__ == "__main__":
    # hidden_dim=128 is the module's default and makes every gate slice lane-aligned.
    B, T, D, H, O = 2, 8, 16, 128, 4

    key = jax.random.PRNGKey(0)
    kx, kp = jax.random.split(key)
    x = jax.random.normal(kx, (B, T, D), jnp.float32)

    raw = init_raw_params(kp, D, H, O)
    kparams = prepare_kernel_params(raw)

    out_full = jax.block_until_ready(bilstm_forward(x, kparams))
    out = np.asarray(out_full)[:B, :O]           # strip batch / output padding

    ref = np.asarray(jax.block_until_ready(reference_forward(x, raw)))
    assert out.shape == (B, O)
    np.testing.assert_allclose(out, ref, atol=1e-3, rtol=1e-3)

    print("KERNEL_OK")
</pallas_src>

<mosaic_0001>
module attributes {stable_mosaic.version = 11 : i64} {
  func.func @bilstm_kernel(%arg0: i32, %arg1: memref<1x64x32xbf16, #tpu.memory_space<vmem>>, %arg2: memref<32x1024xbf16, #tpu.memory_space<vmem>>, %arg3: memref<256x1024xbf16, #tpu.memory_space<vmem>>, %arg4: memref<1x1024xf32, #tpu.memory_space<vmem>>, %arg5: memref<256x128xbf16, #tpu.memory_space<vmem>>, %arg6: memref<1x128xf32, #tpu.memory_space<vmem>>, %arg7: memref<128x128xbf16, #tpu.memory_space<vmem>>, %arg8: memref<1x128xf32, #tpu.memory_space<vmem>>, %arg9: memref<1x8x128xf32, #tpu.memory_space<vmem>>, %arg10: memref<64x1024xf32, #tpu.memory_space<vmem>>) attributes {dimension_semantics = [#tpu.dimension_semantics<parallel>], iteration_bounds = array<i64: 1>, scalar_prefetch = 0 : i64, scratch_operands = 1 : i64, tpu.core_type = #tpu.core_type<tc>, window_params = [{transform_indices = @transform_0, window_bounds = array<i64: 1, 64, 32>}, {pipeline_mode = #tpu.pipeline_mode<synchronous>, transform_indices = @transform_1, window_bounds = array<i64: 32, 1024>}, {pipeline_mode = #tpu.pipeline_mode<synchronous>, transform_indices = @transform_2, window_bounds = array<i64: 256, 1024>}, {pipeline_mode = #tpu.pipeline_mode<synchronous>, transform_indices = @transform_3, window_bounds = array<i64: 1, 1024>}, {pipeline_mode = #tpu.pipeline_mode<synchronous>, transform_indices = @transform_4, window_bounds = array<i64: 256, 128>}, {pipeline_mode = #tpu.pipeline_mode<synchronous>, transform_indices = @transform_5, window_bounds = array<i64: 1, 128>}, {pipeline_mode = #tpu.pipeline_mode<synchronous>, transform_indices = @transform_6, window_bounds = array<i64: 128, 128>}, {pipeline_mode = #tpu.pipeline_mode<synchronous>, transform_indices = @transform_7, window_bounds = array<i64: 1, 128>}, {transform_indices = @transform_8, window_bounds = array<i64: 1, 8, 128>}]} {
    %c0 = arith.constant 0 : index
    %c0_0 = arith.constant 0 : index
    %c0_1 = arith.constant 0 : index
    %0 = vector.load %arg1[%c0, %c0_0, %c0_1] : memref<1x64x32xbf16, #tpu.memory_space<vmem>>, vector<1x64x32xbf16>
    %1 = vector.shape_cast %0 : vector<1x64x32xbf16> to vector<64x32xbf16>
    %c0_2 = arith.constant 0 : index
    %c0_3 = arith.constant 0 : index
    %2 = vector.load %arg2[%c0_2, %c0_3] : memref<32x1024xbf16, #tpu.memory_space<vmem>>, vector<32x1024xbf16>
    %cst = arith.constant dense<0.000000e+00> : vector<64x1024xf32>
    %3 = tpu.matmul %1, %2, %cst {dimension_numbers = #tpu.dot_dimension_numbers<[1], [0], [0], [1], [0, 0, 1, 1], [], []>} : vector<64x32xbf16>, vector<32x1024xbf16>, vector<64x1024xf32> -> vector<64x1024xf32>
    %c0_4 = arith.constant 0 : index
    %c0_5 = arith.constant 0 : index
    %4 = vector.load %arg4[%c0_4, %c0_5] : memref<1x1024xf32, #tpu.memory_space<vmem>>, vector<1x1024xf32>
    %5 = vector.broadcast %4 : vector<1x1024xf32> to vector<64x1024xf32>
    %6 = arith.addf %3, %5 : vector<64x1024xf32>
    %c0_6 = arith.constant 0 : index
    %c0_7 = arith.constant 0 : index
    %7 = vector.load %arg10[%c0_6, %c0_7] : memref<64x1024xf32, #tpu.memory_space<vmem>>, vector<64x1024xf32>
    tpu.vector_store %arg10[%c0_6, %c0_7], %6 {strides = array<i32>} : memref<64x1024xf32, #tpu.memory_space<vmem>>, vector<64x1024xf32>,
    %c0_8 = arith.constant 0 : index
    %c0_9 = arith.constant 0 : index
    %8 = vector.load %arg3[%c0_8, %c0_9] : memref<256x1024xbf16, #tpu.memory_space<vmem>>, vector<256x1024xbf16>
    %cst_10 = arith.constant 0.000000e+00 : f32
    %9 = vector.broadcast %cst_10 : f32 to vector<8x256xf32>
    %cst_11 = arith.constant 0.000000e+00 : f32
    %10 = vector.broadcast %cst_11 : f32 to vector<8x256xf32>
    %cst_12 = arith.constant 0.000000e+00 : f32
    %11 = vector.broadcast %cst_12 : f32 to vector<8x256xf32>
    %c0_13 = arith.constant 0 : index
    %c0_14 = arith.constant 0 : index
    %12 = vector.load %arg10[%c0_13, %c0_14] : memref<64x1024xf32, #tpu.memory_space<vmem>>, vector<8x1024xf32>
    %13 = arith.truncf %9 : vector<8x256xf32> to vector<8x256xbf16>
    %cst_15 = arith.constant dense<0.000000e+00> : vector<8x1024xf32>
    %14 = tpu.matmul %13, %8, %cst_15 {dimension_numbers = #tpu.dot_dimension_numbers<[1], [0], [0], [1], [0, 0, 1, 1], [], []>} : vector<8x256xbf16>, vector<256x1024xbf16>, vector<8x1024xf32> -> vector<8x1024xf32>
    %15 = arith.addf %14, %12 : vector<8x1024xf32>
    %16 = vector.extract_strided_slice %15 {offsets = [0, 0], sizes = [8, 256], strides = [1, 1]} : vector<8x1024xf32> to vector<8x256xf32>
    %cst_16 = arith.constant 5.000000e-01 : f32
    %17 = vector.broadcast %cst_16 : f32 to vector<8x256xf32>
    %18 = arith.mulf %17, %16 : vector<8x256xf32>
    %19 = math.tanh %18 : vector<8x256xf32>
    %cst_17 = arith.constant 5.000000e-01 : f32
    %20 = vector.broadcast %cst_17 : f32 to vector<8x256xf32>
    %21 = arith.mulf %20, %19 : vector<8x256xf32>
    %cst_18 = arith.constant 5.000000e-01 : f32
    %22 = vector.broadcast %cst_18 : f32 to vector<8x256xf32>
    %23 = arith.addf %21, %22 : vector<8x256xf32>
    %24 = vector.extract_strided_slice %15 {offsets = [0, 256], sizes = [8, 256], strides = [1, 1]} : vector<8x1024xf32> to vector<8x256xf32>
    %cst_19 = arith.constant 5.000000e-01 : f32
    %25 = vector.broadcast %cst_19 : f32 to vector<8x256xf32>
    %26 = arith.mulf %25, %24 : vector<8x256xf32>
    %27 = math.tanh %26 : vector<8x256xf32>
    %cst_20 = arith.constant 5.000000e-01 : f32
    %28 = vector.broadcast %cst_20 : f32 to vector<8x256xf32>
    %29 = arith.mulf %28, %27 : vector<8x256xf32>
    %cst_21 = arith.constant 5.000000e-01 : f32
    %30 = vector.broadcast %cst_21 : f32 to vector<8x256xf32>
    %31 = arith.addf %29, %30 : vector<8x256xf32>
    %32 = vector.extract_strided_slice %15 {offsets = [0, 512], sizes = [8, 256], strides = [1, 1]} : vector<8x1024xf32> to vector<8x256xf32>
    %33 = math.tanh %32 : vector<8x256xf32>
    %34 = vector.extract_strided_slice %15 {offsets = [0, 768], sizes = [8, 256], strides = [1, 1]} : vector<8x1024xf32> to vector<8x256xf32>
    %cst_22 = arith.constant 5.000000e-01 : f32
    %35 = vector.broadcast %cst_22 : f32 to vector<8x256xf32>
    %36 = arith.mulf %35, %34 : vector<8x256xf32>
    %37 = math.tanh %36 : vector<8x256xf32>
    %cst_23 = arith.constant 5.000000e-01 : f32
    %38 = vector.broadcast %cst_23 : f32 to vector<8x256xf32>
    %39 = arith.mulf %38, %37 : vector<8x256xf32>
    %cst_24 = arith.constant 5.000000e-01 : f32
    %40 = vector.broadcast %cst_24 : f32 to vector<8x256xf32>
    %41 = arith.addf %39, %40 : vector<8x256xf32>
    %42 = arith.mulf %31, %10 : vector<8x256xf32>
    %43 = arith.mulf %23, %33 : vector<8x256xf32>
    %44 = arith.addf %42, %43 : vector<8x256xf32>
    %45 = math.tanh %44 : vector<8x256xf32>
    %46 = arith.mulf %41, %45 : vector<8x256xf32>
    %47 = arith.addf %11, %46 : vector<8x256xf32>
    %c8 = arith.constant 8 : index
    %c0_25 = arith.constant 0 : index
    %48 = vector.load %arg10[%c8, %c0_25] : memref<64x1024xf32, #tpu.memory_space<vmem>>, vector<8x1024xf32>
    %49 = arith.truncf %46 : vector<8x256xf32> to vector<8x256xbf16>
    %cst_26 = arith.constant dense<0.000000e+00> : vector<8x1024xf32>
    %50 = tpu.matmul %49, %8, %cst_26 {dimension_numbers = #tpu.dot_dimension_numbers<[1], [0], [0], [1], [0, 0, 1, 1], [], []>} : vector<8x256xbf16>, vector<256x1024xbf16>, vector<8x1024xf32> -> vector<8x1024xf32>
    %51 = arith.addf %50, %48 : vector<8x1024xf32>
    %52 = vector.extract_strided_slice %51 {offsets = [0, 0], sizes = [8, 256], strides = [1, 1]} : vector<8x1024xf32> to vector<8x256xf32>
    %cst_27 = arith.constant 5.000000e-01 : f32
    %53 = vector.broadcast %cst_27 : f32 to vector<8x256xf32>
    %54 = arith.mulf %53, %52 : vector<8x256xf32>
    %55 = math.tanh %54 : vector<8x256xf32>
    %cst_28 = arith.constant 5.000000e-01 : f32
    %56 = vector.broadcast %cst_28 : f32 to vector<8x256xf32>
    %57 = arith.mulf %56, %55 : vector<8x256xf32>
    %cst_29 = arith.constant 5.000000e-01 : f32
    %58 = vector.broadcast %cst_29 : f32 to vector<8x256xf32>
    %59 = arith.addf %57, %58 : vector<8x256xf32>
    %60 = vector.extract_strided_slice %51 {offsets = [0, 256], sizes = [8, 256], strides = [1, 1]} : vector<8x1024xf32> to vector<8x256xf32>
    %cst_30 = arith.constant 5.000000e-01 : f32
    %61 = vector.broadcast %cst_30 : f32 to vector<8x256xf32>
    %62 = arith.mulf %61, %60 : vector<8x256xf32>
    %63 = math.tanh %62 : vector<8x256xf32>
    %cst_31 = arith.constant 5.000000e-01 : f32
    %64 = vector.broadcast %cst_31 : f32 to vector<8x256xf32>
    %65 = arith.mulf %64, %63 : vector<8x256xf32>
    %cst_32 = arith.constant 5.000000e-01 : f32
    %66 = vector.broadcast %cst_32 : f32 to vector<8x256xf32>
    %67 = arith.addf %65, %66 : vector<8x256xf32>
    %68 = vector.extract_strided_slice %51 {offsets = [0, 512], sizes = [8, 256], strides = [1, 1]} : vector<8x1024xf32> to vector<8x256xf32>
    %69 = math.tanh %68 : vector<8x256xf32>
    %70 = vector.extract_strided_slice %51 {offsets = [0, 768], sizes = [8, 256], strides = [1, 1]} : vector<8x1024xf32> to vector<8x256xf32>
    %cst_33 = arith.constant 5.000000e-01 : f32
    %71 = vector.broadcast %cst_33 : f32 to vector<8x256xf32>
    %72 = arith.mulf %71, %70 : vector<8x256xf32>
    %73 = math.tanh %72 : vector<8x256xf32>
    %cst_34 = arith.constant 5.000000e-01 : f32
    %74 = vector.broadcast %cst_34 : f32 to vector<8x256xf32>
    %75 = arith.mulf %74, %73 : vector<8x256xf32>
    %cst_35 = arith.constant 5.000000e-01 : f32
    %76 = vector.broadcast %cst_35 : f32 to vector<8x256xf32>
    %77 = arith.addf %75, %76 : vector<8x256xf32>
    %78 = arith.mulf %67, %44 : vector<8x256xf32>
    %79 = arith.mulf %59, %69 : vector<8x256xf32>
    %80 = arith.addf %78, %79 : vector<8x256xf32>
    %81 = math.tanh %80 : vector<8x256xf32>
    %82 = arith.mulf %77, %81 : vector<8x256xf32>
    %83 = arith.addf %47, %82 : vector<8x256xf32>
    %c16 = arith.constant 16 : index
    %c0_36 = arith.constant 0 : index
    %84 = vector.load %arg10[%c16, %c0_36] : memref<64x1024xf32, #tpu.memory_space<vmem>>, vector<8x1024xf32>
    %85 = arith.truncf %82 : vector<8x256xf32> to vector<8x256xbf16>
    %cst_37 = arith.constant dense<0.000000e+00> : vector<8x1024xf32>
    %86 = tpu.matmul %85, %8, %cst_37 {dimension_numbers = #tpu.dot_dimension_numbers<[1], [0], [0], [1], [0, 0, 1, 1], [], []>} : vector<8x256xbf16>, vector<256x1024xbf16>, vector<8x1024xf32> -> vector<8x1024xf32>
    %87 = arith.addf %86, %84 : vector<8x1024xf32>
    %88 = vector.extract_strided_slice %87 {offsets = [0, 0], sizes = [8, 256], strides = [1, 1]} : vector<8x1024xf32> to vector<8x256xf32>
    %cst_38 = arith.constant 5.000000e-01 : f32
    %89 = vector.broadcast %cst_38 : f32 to vector<8x256xf32>
    %90 = arith.mulf %89, %88 : vector<8x256xf32>
    %91 = math.tanh %90 : vector<8x256xf32>
    %cst_39 = arith.constant 5.000000e-01 : f32
    %92 = vector.broadcast %cst_39 : f32 to vector<8x256xf32>
    %93 = arith.mulf %92, %91 : vector<8x256xf32>
    %cst_40 = arith.constant 5.000000e-01 : f32
    %94 = vector.broadcast %cst_40 : f32 to vector<8x256xf32>
    %95 = arith.addf %93, %94 : vector<8x256xf32>
    %96 = vector.extract_strided_slice %87 {offsets = [0, 256], sizes = [8, 256], strides = [1, 1]} : vector<8x1024xf32> to vector<8x256xf32>
    %cst_41 = arith.constant 5.000000e-01 : f32
    %97 = vector.broadcast %cst_41 : f32 to vector<8x256xf32>
    %98 = arith.mulf %97, %96 : vector<8x256xf32>
    %99 = math.tanh %98 : vector<8x256xf32>
    %cst_42 = arith.constant 5.000000e-01 : f32
    %100 = vector.broadcast %cst_42 : f32 to vector<8x256xf32>
    %101 = arith.mulf %100, %99 : vector<8x256xf32>
    %cst_43 = arith.constant 5.000000e-01 : f32
    %102 = vector.broadcast %cst_43 : f32 to vector<8x256xf32>
    %103 = arith.addf %101, %102 : vector<8x256xf32>
    %104 = vector.extract_strided_slice %87 {offsets = [0, 512], sizes = [8, 256], strides = [1, 1]} : vector<8x1024xf32> to vector<8x256xf32>
    %105 = math.tanh %104 : vector<8x256xf32>
    %106 = vector.extract_strided_slice %87 {offsets = [0, 768], sizes = [8, 256], strides = [1, 1]} : vector<8x1024xf32> to vector<8x256xf32>
    %cst_44 = arith.constant 5.000000e-01 : f32
    %107 = vector.broadcast %cst_44 : f32 to vector<8x256xf32>
    %108 = arith.mulf %107, %106 : vector<8x256xf32>
    %109 = math.tanh %108 : vector<8x256xf32>
    %cst_45 = arith.constant 5.000000e-01 : f32
    %110 = vector.broadcast %cst_45 : f32 to vector<8x256xf32>
    %111 = arith.mulf %110, %109 : vector<8x256xf32>
    %cst_46 = arith.constant 5.000000e-01 : f32
    %112 = vector.broadcast %cst_46 : f32 to vector<8x256xf32>
    %113 = arith.addf %111, %112 : vector<8x256xf32>
    %114 = arith.mulf %103, %80 : vector<8x256xf32>
    %115 = arith.mulf %95, %105 : vector<8x256xf32>
    %116 = arith.addf %114, %115 : vector<8x256xf32>
    %117 = math.tanh %116 : vector<8x256xf32>
    %118 = arith.mulf %113, %117 : vector<8x256xf32>
    %119 = arith.addf %83, %118 : vector<8x256xf32>
    %c24 = arith.constant 24 : index
    %c0_47 = arith.constant 0 : index
    %120 = vector.load %arg10[%c24, %c0_47] : memref<64x1024xf32, #tpu.memory_space<vmem>>, vector<8x1024xf32>
    %121 = arith.truncf %118 : vector<8x256xf32> to vector<8x256xbf16>
    %cst_48 = arith.constant dense<0.000000e+00> : vector<8x1024xf32>
    %122 = tpu.matmul %121, %8, %cst_48 {dimension_numbers = #tpu.dot_dimension_numbers<[1], [0], [0], [1], [0, 0, 1, 1], [], []>} : vector<8x256xbf16>, vector<256x1024xbf16>, vector<8x1024xf32> -> vector<8x1024xf32>
    %123 = arith.addf %122, %120 : vector<8x1024xf32>
    %124 = vector.extract_strided_slice %123 {offsets = [0, 0], sizes = [8, 256], strides = [1, 1]} : vector<8x1024xf32> to vector<8x256xf32>
    %cst_49 = arith.constant 5.000000e-01 : f32
    %125 = vector.broadcast %cst_49 : f32 to vector<8x256xf32>
    %126 = arith.mulf %125, %124 : vector<8x256xf32>
    %127 = math.tanh %126 : vector<8x256xf32>
    %cst_50 = arith.constant 5.000000e-01 : f32
    %128 = vector.broadcast %cst_50 : f32 to vector<8x256xf32>
    %129 = arith.mulf %128, %127 : vector<8x256xf32>
    %cst_51 = arith.constant 5.000000e-01 : f32
    %130 = vector.broadcast %cst_51 : f32 to vector<8x256xf32>
    %131 = arith.addf %129, %130 : vector<8x256xf32>
    %132 = vector.extract_strided_slice %123 {offsets = [0, 256], sizes = [8, 256], strides = [1, 1]} : vector<8x1024xf32> to vector<8x256xf32>
    %cst_52 = arith.constant 5.000000e-01 : f32
    %133 = vector.broadcast %cst_52 : f32 to vector<8x256xf32>
    %134 = arith.mulf %133, %132 : vector<8x256xf32>
    %135 = math.tanh %134 : vector<8x256xf32>
    %cst_53 = arith.constant 5.000000e-01 : f32
    %136 = vector.broadcast %cst_53 : f32 to vector<8x256xf32>
    %137 = arith.mulf %136, %135 : vector<8x256xf32>
    %cst_54 = arith.constant 5.000000e-01 : f32
    %138 = vector.broadcast %cst_54 : f32 to vector<8x256xf32>
    %139 = arith.addf %137, %138 : vector<8x256xf32>
    %140 = vector.extract_strided_slice %123 {offsets = [0, 512], sizes = [8, 256], strides = [1, 1]} : vector<8x1024xf32> to vector<8x256xf32>
    %141 = math.tanh %140 : vector<8x256xf32>
    %142 = vector.extract_strided_slice %123 {offsets = [0, 768], sizes = [8, 256], strides = [1, 1]} : vector<8x1024xf32> to vector<8x256xf32>
    %cst_55 = arith.constant 5.000000e-01 : f32
    %143 = vector.broadcast %cst_55 : f32 to vector<8x256xf32>
    %144 = arith.mulf %143, %142 : vector<8x256xf32>
    %145 = math.tanh %144 : vector<8x256xf32>
    %cst_56 = arith.constant 5.000000e-01 : f32
    %146 = vector.broadcast %cst_56 : f32 to vector<8x256xf32>
    %147 = arith.mulf %146, %145 : vector<8x256xf32>
    %cst_57 = arith.constant 5.000000e-01 : f32
    %148 = vector.broadcast %cst_57 : f32 to vector<8x256xf32>
    %149 = arith.addf %147, %148 : vector<8x256xf32>
    %150 = arith.mulf %139, %116 : vector<8x256xf32>
    %151 = arith.mulf %131, %141 : vector<8x256xf32>
    %152 = arith.addf %150, %151 : vector<8x256xf32>
    %153 = math.tanh %152 : vector<8x256xf32>
    %154 = arith.mulf %149, %153 : vector<8x256xf32>
    %155 = arith.addf %119, %154 : vector<8x256xf32>
    %c32 = arith.constant 32 : index
    %c0_58 = arith.constant 0 : index
    %156 = vector.load %arg10[%c32, %c0_58] : memref<64x1024xf32, #tpu.memory_space<vmem>>, vector<8x1024xf32>
    %157 = arith.truncf %154 : vector<8x256xf32> to vector<8x256xbf16>
    %cst_59 = arith.constant dense<0.000000e+00> : vector<8x1024xf32>
    %158 = tpu.matmul %157, %8, %cst_59 {dimension_numbers = #tpu.dot_dimension_numbers<[1], [0], [0], [1], [0, 0, 1, 1], [], []>} : vector<8x256xbf16>, vector<256x1024xbf16>, vector<8x1024xf32> -> vector<8x1024xf32>
    %159 = arith.addf %158, %156 : vector<8x1024xf32>
    %160 = vector.extract_strided_slice %159 {offsets = [0, 0], sizes = [8, 256], strides = [1, 1]} : vector<8x1024xf32> to vector<8x256xf32>
    %cst_60 = arith.constant 5.000000e-01 : f32
    %161 = vector.broadcast %cst_60 : f32 to vector<8x256xf32>
    %162 = arith.mulf %161, %160 : vector<8x256xf32>
    %163 = math.tanh %162 : vector<8x256xf32>
    %cst_61 = arith.constant 5.000000e-01 : f32
    %164 = vector.broadcast %cst_61 : f32 to vector<8x256xf32>
    %165 = arith.mulf %164, %163 : vector<8x256xf32>
    %cst_62 = arith.constant 5.000000e-01 : f32
    %166 = vector.broadcast %cst_62 : f32 to vector<8x256xf32>
    %167 = arith.addf %165, %166 : vector<8x256xf32>
    %168 = vector.extract_strided_slice %159 {offsets = [0, 256], sizes = [8, 256], strides = [1, 1]} : vector<8x1024xf32> to vector<8x256xf32>
    %cst_63 = arith.constant 5.000000e-01 : f32
    %169 = vector.broadcast %cst_63 : f32 to vector<8x256xf32>
    %170 = arith.mulf %169, %168 : vector<8x256xf32>
    %171 = math.tanh %170 : vector<8x256xf32>
    %cst_64 = arith.constant 5.000000e-01 : f32
    %172 = vector.broadcast %cst_64 : f32 to vector<8x256xf32>
    %173 = arith.mulf %172, %171 : vector<8x256xf32>
    %cst_65 = arith.constant 5.000000e-01 : f32
    %174 = vector.broadcast %cst_65 : f32 to vector<8x256xf32>
    %175 = arith.addf %173, %174 : vector<8x256xf32>
    %176 = vector.extract_strided_slice %159 {offsets = [0, 512], sizes = [8, 256], strides = [1, 1]} : vector<8x1024xf32> to vector<8x256xf32>
    %177 = math.tanh %176 : vector<8x256xf32>
    %178 = vector.extract_strided_slice %159 {offsets = [0, 768], sizes = [8, 256], strides = [1, 1]} : vector<8x1024xf32> to vector<8x256xf32>
    %cst_66 = arith.constant 5.000000e-01 : f32
    %179 = vector.broadcast %cst_66 : f32 to vector<8x256xf32>
    %180 = arith.mulf %179, %178 : vector<8x256xf32>
    %181 = math.tanh %180 : vector<8x256xf32>
    %cst_67 = arith.constant 5.000000e-01 : f32
    %182 = vector.broadcast %cst_67 : f32 to vector<8x256xf32>
    %183 = arith.mulf %182, %181 : vector<8x256xf32>
    %cst_68 = arith.constant 5.000000e-01 : f32
    %184 = vector.broadcast %cst_68 : f32 to vector<8x256xf32>
    %185 = arith.addf %183, %184 : vector<8x256xf32>
    %186 = arith.mulf %175, %152 : vector<8x256xf32>
    %187 = arith.mulf %167, %177 : vector<8x256xf32>
    %188 = arith.addf %186, %187 : vector<8x256xf32>
    %189 = math.tanh %188 : vector<8x256xf32>
    %190 = arith.mulf %185, %189 : vector<8x256xf32>
    %191 = arith.addf %155, %190 : vector<8x256xf32>
    %c40 = arith.constant 40 : index
    %c0_69 = arith.constant 0 : index
    %192 = vector.load %arg10[%c40, %c0_69] : memref<64x1024xf32, #tpu.memory_space<vmem>>, vector<8x1024xf32>
    %193 = arith.truncf %190 : vector<8x256xf32> to vector<8x256xbf16>
    %cst_70 = arith.constant dense<0.000000e+00> : vector<8x1024xf32>
    %194 = tpu.matmul %193, %8, %cst_70 {dimension_numbers = #tpu.dot_dimension_numbers<[1], [0], [0], [1], [0, 0, 1, 1], [], []>} : vector<8x256xbf16>, vector<256x1024xbf16>, vector<8x1024xf32> -> vector<8x1024xf32>
    %195 = arith.addf %194, %192 : vector<8x1024xf32>
    %196 = vector.extract_strided_slice %195 {offsets = [0, 0], sizes = [8, 256], strides = [1, 1]} : vector<8x1024xf32> to vector<8x256xf32>
    %cst_71 = arith.constant 5.000000e-01 : f32
    %197 = vector.broadcast %cst_71 : f32 to vector<8x256xf32>
    %198 = arith.mulf %197, %196 : vector<8x256xf32>
    %199 = math.tanh %198 : vector<8x256xf32>
    %cst_72 = arith.constant 5.000000e-01 : f32
    %200 = vector.broadcast %cst_72 : f32 to vector<8x256xf32>
    %201 = arith.mulf %200, %199 : vector<8x256xf32>
    %cst_73 = arith.constant 5.000000e-01 : f32
    %202 = vector.broadcast %cst_73 : f32 to vector<8x256xf32>
    %203 = arith.addf %201, %202 : vector<8x256xf32>
    %204 = vector.extract_strided_slice %195 {offsets = [0, 256], sizes = [8, 256], strides = [1, 1]} : vector<8x1024xf32> to vector<8x256xf32>
    %cst_74 = arith.constant 5.000000e-01 : f32
    %205 = vector.broadcast %cst_74 : f32 to vector<8x256xf32>
    %206 = arith.mulf %205, %204 : vector<8x256xf32>
    %207 = math.tanh %206 : vector<8x256xf32>
    %cst_75 = arith.constant 5.000000e-01 : f32
    %208 = vector.broadcast %cst_75 : f32 to vector<8x256xf32>
    %209 = arith.mulf %208, %207 : vector<8x256xf32>
    %cst_76 = arith.constant 5.000000e-01 : f32
    %210 = vector.broadcast %cst_76 : f32 to vector<8x256xf32>
    %211 = arith.addf %209, %210 : vector<8x256xf32>
    %212 = vector.extract_strided_slice %195 {offsets = [0, 512], sizes = [8, 256], strides = [1, 1]} : vector<8x1024xf32> to vector<8x256xf32>
    %213 = math.tanh %212 : vector<8x256xf32>
    %214 = vector.extract_strided_slice %195 {offsets = [0, 768], sizes = [8, 256], strides = [1, 1]} : vector<8x1024xf32> to vector<8x256xf32>
    %cst_77 = arith.constant 5.000000e-01 : f32
    %215 = vector.broadcast %cst_77 : f32 to vector<8x256xf32>
    %216 = arith.mulf %215, %214 : vector<8x256xf32>
    %217 = math.tanh %216 : vector<8x256xf32>
    %cst_78 = arith.constant 5.000000e-01 : f32
    %218 = vector.broadcast %cst_78 : f32 to vector<8x256xf32>
    %219 = arith.mulf %218, %217 : vector<8x256xf32>
    %cst_79 = arith.constant 5.000000e-01 : f32
    %220 = vector.broadcast %cst_79 : f32 to vector<8x256xf32>
    %221 = arith.addf %219, %220 : vector<8x256xf32>
    %222 = arith.mulf %211, %188 : vector<8x256xf32>
    %223 = arith.mulf %203, %213 : vector<8x256xf32>
    %224 = arith.addf %222, %223 : vector<8x256xf32>
    %225 = math.tanh %224 : vector<8x256xf32>
    %226 = arith.mulf %221, %225 : vector<8x256xf32>
    %227 = arith.addf %191, %226 : vector<8x256xf32>
    %c48 = arith.constant 48 : index
    %c0_80 = arith.constant 0 : index
    %228 = vector.load %arg10[%c48, %c0_80] : memref<64x1024xf32, #tpu.memory_space<vmem>>, vector<8x1024xf32>
    %229 = arith.truncf %226 : vector<8x256xf32> to vector<8x256xbf16>
    %cst_81 = arith.constant dense<0.000000e+00> : vector<8x1024xf32>
    %230 = tpu.matmul %229, %8, %cst_81 {dimension_numbers = #tpu.dot_dimension_numbers<[1], [0], [0], [1], [0, 0, 1, 1], [], []>} : vector<8x256xbf16>, vector<256x1024xbf16>, vector<8x1024xf32> -> vector<8x1024xf32>
    %231 = arith.addf %230, %228 : vector<8x1024xf32>
    %232 = vector.extract_strided_slice %231 {offsets = [0, 0], sizes = [8, 256], strides = [1, 1]} : vector<8x1024xf32> to vector<8x256xf32>
    %cst_82 = arith.constant 5.000000e-01 : f32
    %233 = vector.broadcast %cst_82 : f32 to vector<8x256xf32>
    %234 = arith.mulf %233, %232 : vector<8x256xf32>
    %235 = math.tanh %234 : vector<8x256xf32>
    %cst_83 = arith.constant 5.000000e-01 : f32
    %236 = vector.broadcast %cst_83 : f32 to vector<8x256xf32>
    %237 = arith.mulf %236, %235 : vector<8x256xf32>
    %cst_84 = arith.constant 5.000000e-01 : f32
    %238 = vector.broadcast %cst_84 : f32 to vector<8x256xf32>
    %239 = arith.addf %237, %238 : vector<8x256xf32>
    %240 = vector.extract_strided_slice %231 {offsets = [0, 256], sizes = [8, 256], strides = [1, 1]} : vector<8x1024xf32> to vector<8x256xf32>
    %cst_85 = arith.constant 5.000000e-01 : f32
    %241 = vector.broadcast %cst_85 : f32 to vector<8x256xf32>
    %242 = arith.mulf %241, %240 : vector<8x256xf32>
    %243 = math.tanh %242 : vector<8x256xf32>
    %cst_86 = arith.constant 5.000000e-01 : f32
    %244 = vector.broadcast %cst_86 : f32 to vector<8x256xf32>
    %245 = arith.mulf %244, %243 : vector<8x256xf32>
    %cst_87 = arith.constant 5.000000e-01 : f32
    %246 = vector.broadcast %cst_87 : f32 to vector<8x256xf32>
    %247 = arith.addf %245, %246 : vector<8x256xf32>
    %248 = vector.extract_strided_slice %231 {offsets = [0, 512], sizes = [8, 256], strides = [1, 1]} : vector<8x1024xf32> to vector<8x256xf32>
    %249 = math.tanh %248 : vector<8x256xf32>
    %250 = vector.extract_strided_slice %231 {offsets = [0, 768], sizes = [8, 256], strides = [1, 1]} : vector<8x1024xf32> to vector<8x256xf32>
    %cst_88 = arith.constant 5.000000e-01 : f32
    %251 = vector.broadcast %cst_88 : f32 to vector<8x256xf32>
    %252 = arith.mulf %251, %250 : vector<8x256xf32>
    %253 = math.tanh %252 : vector<8x256xf32>
    %cst_89 = arith.constant 5.000000e-01 : f32
    %254 = vector.broadcast %cst_89 : f32 to vector<8x256xf32>
    %255 = arith.mulf %254, %253 : vector<8x256xf32>
    %cst_90 = arith.constant 5.000000e-01 : f32
    %256 = vector.broadcast %cst_90 : f32 to vector<8x256xf32>
    %257 = arith.addf %255, %256 : vector<8x256xf32>
    %258 = arith.mulf %247, %224 : vector<8x256xf32>
    %259 = arith.mulf %239, %249 : vector<8x256xf32>
    %260 = arith.addf %258, %259 : vector<8x256xf32>
    %261 = math.tanh %260 : vector<8x256xf32>
    %262 = arith.mulf %257, %261 : vector<8x256xf32>
    %263 = arith.addf %227, %262 : vector<8x256xf32>
    %c56 = arith.constant 56 : index
    %c0_91 = arith.constant 0 : index
    %264 = vector.load %arg10[%c56, %c0_91] : memref<64x1024xf32, #tpu.memory_space<vmem>>, vector<8x1024xf32>
    %265 = arith.truncf %262 : vector<8x256xf32> to vector<8x256xbf16>
    %cst_92 = arith.constant dense<0.000000e+00> : vector<8x1024xf32>
    %266 = tpu.matmul %265, %8, %cst_92 {dimension_numbers = #tpu.dot_dimension_numbers<[1], [0], [0], [1], [0, 0, 1, 1], [], []>} : vector<8x256xbf16>, vector<256x1024xbf16>, vector<8x1024xf32> -> vector<8x1024xf32>
    %267 = arith.addf %266, %264 : vector<8x1024xf32>
    %268 = vector.extract_strided_slice %267 {offsets = [0, 0], sizes = [8, 256], strides = [1, 1]} : vector<8x1024xf32> to vector<8x256xf32>
    %cst_93 = arith.constant 5.000000e-01 : f32
    %269 = vector.broadcast %cst_93 : f32 to vector<8x256xf32>
    %270 = arith.mulf %269, %268 : vector<8x256xf32>
    %271 = math.tanh %270 : vector<8x256xf32>
    %cst_94 = arith.constant 5.000000e-01 : f32
    %272 = vector.broadcast %cst_94 : f32 to vector<8x256xf32>
    %273 = arith.mulf %272, %271 : vector<8x256xf32>
    %cst_95 = arith.constant 5.000000e-01 : f32
    %274 = vector.broadcast %cst_95 : f32 to vector<8x256xf32>
    %275 = arith.addf %273, %274 : vector<8x256xf32>
    %276 = vector.extract_strided_slice %267 {offsets = [0, 256], sizes = [8, 256], strides = [1, 1]} : vector<8x1024xf32> to vector<8x256xf32>
    %cst_96 = arith.constant 5.000000e-01 : f32
    %277 = vector.broadcast %cst_96 : f32 to vector<8x256xf32>
    %278 = arith.mulf %277, %276 : vector<8x256xf32>
    %279 = math.tanh %278 : vector<8x256xf32>
    %cst_97 = arith.constant 5.000000e-01 : f32
    %280 = vector.broadcast %cst_97 : f32 to vector<8x256xf32>
    %281 = arith.mulf %280, %279 : vector<8x256xf32>
    %cst_98 = arith.constant 5.000000e-01 : f32
    %282 = vector.broadcast %cst_98 : f32 to vector<8x256xf32>
    %283 = arith.addf %281, %282 : vector<8x256xf32>
    %284 = vector.extract_strided_slice %267 {offsets = [0, 512], sizes = [8, 256], strides = [1, 1]} : vector<8x1024xf32> to vector<8x256xf32>
    %285 = math.tanh %284 : vector<8x256xf32>
    %286 = vector.extract_strided_slice %267 {offsets = [0, 768], sizes = [8, 256], strides = [1, 1]} : vector<8x1024xf32> to vector<8x256xf32>
    %cst_99 = arith.constant 5.000000e-01 : f32
    %287 = vector.broadcast %cst_99 : f32 to vector<8x256xf32>
    %288 = arith.mulf %287, %286 : vector<8x256xf32>
    %289 = math.tanh %288 : vector<8x256xf32>
    %cst_100 = arith.constant 5.000000e-01 : f32
    %290 = vector.broadcast %cst_100 : f32 to vector<8x256xf32>
    %291 = arith.mulf %290, %289 : vector<8x256xf32>
    %cst_101 = arith.constant 5.000000e-01 : f32
    %292 = vector.broadcast %cst_101 : f32 to vector<8x256xf32>
    %293 = arith.addf %291, %292 : vector<8x256xf32>
    %294 = arith.mulf %283, %260 : vector<8x256xf32>
    %295 = arith.mulf %275, %285 : vector<8x256xf32>
    %296 = arith.addf %294, %295 : vector<8x256xf32>
    %297 = math.tanh %296 : vector<8x256xf32>
    %298 = arith.mulf %293, %297 : vector<8x256xf32>
    %299 = arith.addf %263, %298 : vector<8x256xf32>
    %cst_102 = arith.constant 1.250000e-01 : f32
    %300 = vector.broadcast %cst_102 : f32 to vector<8x256xf32>
    %301 = arith.mulf %299, %300 : vector<8x256xf32>
    %302 = arith.truncf %301 : vector<8x256xf32> to vector<8x256xbf16>
    %c0_103 = arith.constant 0 : index
    %c0_104 = arith.constant 0 : index
    %303 = vector.load %arg5[%c0_103, %c0_104] : memref<256x128xbf16, #tpu.memory_space<vmem>>, vector<256x128xbf16>
    %cst_105 = arith.constant dense<0.000000e+00> : vector<8x128xf32>
    %304 = tpu.matmul %302, %303, %cst_105 {dimension_numbers = #tpu.dot_dimension_numbers<[1], [0], [0], [1], [0, 0, 1, 1], [], []>} : vector<8x256xbf16>, vector<256x128xbf16>, vector<8x128xf32> -> vector<8x128xf32>
    %c0_106 = arith.constant 0 : index
    %c0_107 = arith.constant 0 : index
    %305 = vector.load %arg6[%c0_106, %c0_107] : memref<1x128xf32, #tpu.memory_space<vmem>>, vector<1x128xf32>
    %306 = vector.broadcast %305 : vector<1x128xf32> to vector<8x128xf32>
    %307 = arith.addf %304, %306 : vector<8x128xf32>
    %cst_108 = arith.constant 0.000000e+00 : f32
    %308 = vector.broadcast %cst_108 : f32 to vector<8x128xf32>
    %309 = arith.maximumf %307, %308 : vector<8x128xf32>
    %310 = arith.truncf %309 : vector<8x128xf32> to vector<8x128xbf16>
    %c0_109 = arith.constant 0 : index
    %c0_110 = arith.constant 0 : index
    %311 = vector.load %arg7[%c0_109, %c0_110] : memref<128x128xbf16, #tpu.memory_space<vmem>>, vector<128x128xbf16>
    %cst_111 = arith.constant dense<0.000000e+00> : vector<8x128xf32>
    %312 = tpu.matmul %310, %311, %cst_111 {dimension_numbers = #tpu.dot_dimension_numbers<[1], [0], [0], [1], [0, 0, 1, 1], [], []>} : vector<8x128xbf16>, vector<128x128xbf16>, vector<8x128xf32> -> vector<8x128xf32>
    %c0_112 = arith.constant 0 : index
    %c0_113 = arith.constant 0 : index
    %313 = vector.load %arg8[%c0_112, %c0_113] : memref<1x128xf32, #tpu.memory_space<vmem>>, vector<1x128xf32>
    %314 = vector.broadcast %313 : vector<1x128xf32> to vector<8x128xf32>
    %315 = arith.addf %312, %314 : vector<8x128xf32>
    %c0_114 = arith.constant 0 : index
    %c0_115 = arith.constant 0 : index
    %c0_116 = arith.constant 0 : index
    %316 = vector.load %arg9[%c0_114, %c0_115, %c0_116] : memref<1x8x128xf32, #tpu.memory_space<vmem>>, vector<1x8x128xf32>
    %317 = vector.shape_cast %316 : vector<1x8x128xf32> to vector<8x128xf32>
    %318 = vector.shape_cast %315 : vector<8x128xf32> to vector<1x8x128xf32>
    tpu.vector_store %arg9[%c0_114, %c0_115, %c0_116], %318 {strides = array<i32>} : memref<1x8x128xf32, #tpu.memory_space<vmem>>, vector<1x8x128xf32>,
    return
  }
  func.func @transform_0(%arg0: i32) -> (i32, i32, i32) {
    %c0_i32 = arith.constant 0 : i32
    %c0_i32_0 = arith.constant 0 : i32
    %c0_i32_1 = arith.constant 0 : i32
    return %arg0, %c0_i32, %c0_i32_0 : i32, i32, i32
  }
  func.func @transform_1(%arg0: i32) -> (i32, i32) {
    %c0_i32 = arith.constant 0 : i32
    %c0_i32_0 = arith.constant 0 : i32
    %c0_i32_1 = arith.constant 0 : i32
    return %c0_i32, %c0_i32_0 : i32, i32
  }
  func.func @transform_2(%arg0: i32) -> (i32, i32) {
    %c0_i32 = arith.constant 0 : i32
    %c0_i32_0 = arith.constant 0 : i32
    %c0_i32_1 = arith.constant 0 : i32
    return %c0_i32, %c0_i32_0 : i32, i32
  }
  func.func @transform_3(%arg0: i32) -> (i32, i32) {
    %c0_i32 = arith.constant 0 : i32
    %c0_i32_0 = arith.constant 0 : i32
    %c0_i32_1 = arith.constant 0 : i32
    return %c0_i32, %c0_i32_0 : i32, i32
  }
  func.func @transform_4(%arg0: i32) -> (i32, i32) {
    %c0_i32 = arith.constant 0 : i32
    %c0_i32_0 = arith.constant 0 : i32
    %c0_i32_1 = arith.constant 0 : i32
    return %c0_i32, %c0_i32_0 : i32, i32
  }
  func.func @transform_5(%arg0: i32) -> (i32, i32) {
    %c0_i32 = arith.constant 0 : i32
    %c0_i32_0 = arith.constant 0 : i32
    %c0_i32_1 = arith.constant 0 : i32
    return %c0_i32, %c0_i32_0 : i32, i32
  }
  func.func @transform_6(%arg0: i32) -> (i32, i32) {
    %c0_i32 = arith.constant 0 : i32
    %c0_i32_0 = arith.constant 0 : i32
    %c0_i32_1 = arith.constant 0 : i32
    return %c0_i32, %c0_i32_0 : i32, i32
  }
  func.func @transform_7(%arg0: i32) -> (i32, i32) {
    %c0_i32 = arith.constant 0 : i32
    %c0_i32_0 = arith.constant 0 : i32
    %c0_i32_1 = arith.constant 0 : i32
    return %c0_i32, %c0_i32_0 : i32, i32
  }
  func.func @transform_8(%arg0: i32) -> (i32, i32, i32) {
    %c0_i32 = arith.constant 0 : i32
    %c0_i32_0 = arith.constant 0 : i32
    %c0_i32_1 = arith.constant 0 : i32
    return %arg0, %c0_i32, %c0_i32_0 : i32, i32, i32
  }
}

</mosaic_0001>

<bundles_post_ra>
// kernel: tpu_custom_call.1
= control target key start
LH: loop header
LB: loop body
LE: loop exit
PB: predicated region body
PF: predicated region fallthrough
CT: control target
= control target key end

     0   :  { %13 = vsyncpa [#allocation4], 0  ;;  %s5916_s0 = inlined_call_operand.vmem [shape: bf16[1,64,32], index: 0, kind: input, shape index: {}]   ;;  %s5917_s1 = inlined_call_operand.hbm [shape: bf16[32,1024], index: 1, kind: input, shape index: {}]   ;;  %s5918_s2 = inlined_call_operand.hbm [shape: bf16[256,1024], index: 2, kind: input, shape index: {}]   ;;  %s5919_s3 = inlined_call_operand.hbm [shape: f32[1,1024], index: 3, kind: input, shape index: {}]   ;;  %s5920_s4 = inlined_call_operand.hbm [shape: bf16[256,128], index: 4, kind: input, shape index: {}]   ;;  %s5921_s5 = inlined_call_operand.vmem [shape: f32[1,128], index: 5, kind: input, shape index: {}]   ;;  %s5922_s6 = inlined_call_operand.vmem [shape: bf16[128,128], index: 6, kind: input, shape index: {}]   ;;  %s5923_s7 = inlined_call_operand.vmem [shape: f32[1,128], index: 7, kind: input, shape index: {}]   ;;  %s5924_s8 = inlined_call_operand.hbm [shape: f32[1,8,128], index: 8, kind: output, shape index: {}]  }
   0x1   :  { %14 = vsyncpa [#allocation7], 0 }
   0x2   :  { %15 = vsyncpa [#allocation10], 0 }
   0x3   :  { %16 = vsyncpa [#allocation5], 0  ;;  %s3950_s27 = smov [#allocation6]   ;;  %s3951_s29 = smov [#allocation3]  }
   0x4   :  { %s36_s28 = sshll.u32 %s3950_s27, 4  ;;  %s24_s30 = sshll.u32 %s3951_s29, 4  ;;  %s37_s28 = int_to_ptr.vmem [resolvable:$true] %s36_s28  ;;  %s4007_s30 = int_to_ptr.vmem [resolvable:$true] %s24_s30 }
   0x5   :  { %s3832_s11 = scalar_lea.hbm %s5918_s2, 16384 }
   0x6   :  { %p3833_p0 = scmp.ne.s32.totalorder %s5918_s2, %s3832_s11  ;;  %p3836_p1 = scmp.lt.u32.totalorder %s3832_s11, %s5918_s2 }
   0x8   :  { %p3838_p2 = pnand %p3836_p1, %p3833_p0 }
   0xa   :  { %3841 = shalt.err (!%p3838_p2)
}
   0xb   :  { %s3842_s16 = scalar_lea.vmem %s37_s28, 16384  ;;  %p3847_p4 = scmp.lt.s32.totalorder %s37_s28, %s37_s28 }
   0xc   :  { %p3843_p3 = scmp.ne.s32.totalorder %s37_s28, %s3842_s16  ;;  %p3848_p5 = scmp.lt.s32.totalorder %s3842_s16, %s3842_s16 }
   0xe   :  { %p3849_p6 = por %p3848_p5, %p3847_p4 }
  0x10   :  { %p3850_p7 = pnand %p3849_p6, %p3843_p3 }
  0x12   :  { %3853 = shalt.err (!%p3850_p7)
}
  0x13   :  { %s3952_s17 = smov 512   ;;  %s3953_s18 = smov 32  }
  0x14   :  { %42 = dma.hbm_to_vmem [thread:$0]  %s5918_s2, 16384, %s37_s28, [#allocation7], %s3952_s17, %s3952_s17, %s3953_s18  }
  0x15   :  { %s3854_s23 = scalar_lea.hbm %s5917_s1, 2048 }
  0x16   :  { %p3855_p8 = scmp.ne.s32.totalorder %s5917_s1, %s3854_s23  ;;  %p3858_p9 = scmp.lt.u32.totalorder %s3854_s23, %s5917_s1 }
  0x18   :  { %p3860_p10 = pnand %p3858_p9, %p3855_p8 }
  0x1a   :  { %3863 = shalt.err (!%p3860_p10)
}
  0x1b   :  { %s3864_s29 = scalar_lea.vmem %s4007_s30, 2048  ;;  %p3869_p12 = scmp.lt.s32.totalorder %s4007_s30, %s4007_s30 }
  0x1c   :  { %p3865_p11 = scmp.ne.s32.totalorder %s4007_s30, %s3864_s29  ;;  %p3870_p13 = scmp.lt.s32.totalorder %s3864_s29, %s3864_s29 }
  0x1e   :  { %p3871_p0 = por %p3870_p13, %p3869_p12 }
  0x20   :  { %p3872_p1 = pnand %p3871_p0, %p3865_p11 }
  0x22   :  { %3875 = shalt.err (!%p3872_p1)
}
  0x23   :  { %30 = dma.hbm_to_vmem [thread:$0]  %s5917_s1, 2048, %s4007_s30, [#allocation4], %s3952_s17, %s3952_s17, %s3953_s18  }
  0x24   :  { %s3954_s9 = smov [#allocation8]   ;;  %s3955_s11 = smov [#allocation9]  }
  0x25   :  { %s49_s10 = sshll.u32 %s3954_s9, 4  ;;  %s58_s12 = sshll.u32 %s3955_s11, 4  ;;  %s50_s10 = int_to_ptr.vmem [resolvable:$true] %s49_s10  ;;  %s4038_s12 = int_to_ptr.vmem [resolvable:$true] %s58_s12 }
  0x26   :  { %s3876_s15 = scalar_lea.hbm %s5919_s3, 128 }
  0x27   :  { %p3877_p2 = scmp.ne.s32.totalorder %s5919_s3, %s3876_s15  ;;  %p3880_p3 = scmp.lt.u32.totalorder %s3876_s15, %s5919_s3 }
  0x29   :  { %p3882_p4 = pnand %p3880_p3, %p3877_p2 }
  0x2b   :  { %3885 = shalt.err (!%p3882_p4)
}
  0x2c   :  { %s3886_s1 = scalar_lea.vmem %s50_s10, 128  ;;  %p3891_p6 = scmp.lt.s32.totalorder %s50_s10, %s50_s10 }
  0x2d   :  { %p3887_p5 = scmp.ne.s32.totalorder %s50_s10, %s3886_s1  ;;  %p3892_p7 = scmp.lt.s32.totalorder %s3886_s1, %s3886_s1 }
  0x2f   :  { %p3893_p8 = por %p3892_p7, %p3891_p6 }
  0x31   :  { %p3894_p9 = pnand %p3893_p8, %p3887_p5 }
  0x33   :  { %3897 = shalt.err (!%p3894_p9)
}
  0x34   :  { %52 = dma.hbm_to_vmem [thread:$0]  %s5919_s3, 128, %s50_s10, [#allocation7]  }
  0x35   :  { %s3898_s23 = scalar_lea.hbm %s5920_s4, 2048 }
  0x36   :  { %p3899_p10 = scmp.ne.s32.totalorder %s5920_s4, %s3898_s23  ;;  %p3902_p11 = scmp.lt.u32.totalorder %s3898_s23, %s5920_s4 }
  0x38   :  { %p3904_p12 = pnand %p3902_p11, %p3899_p10 }
  0x3a   :  { %3907 = shalt.err (!%p3904_p12)
}
  0x3b   :  { %s3908_s29 = scalar_lea.vmem %s4038_s12, 2048  ;;  %p3913_p0 = scmp.lt.s32.totalorder %s4038_s12, %s4038_s12 }
  0x3c   :  { %p3909_p13 = scmp.ne.s32.totalorder %s4038_s12, %s3908_s29  ;;  %p3914_p1 = scmp.lt.s32.totalorder %s3908_s29, %s3908_s29 }
  0x3e   :  { %p3915_p2 = por %p3914_p1, %p3913_p0 }
  0x40   :  { %p3916_p3 = pnand %p3915_p2, %p3909_p13 }
  0x42   :  { %3919 = shalt.err (!%p3916_p3)
}
  0x43   :  { %s3956_s3 = smov 64   ;;  %s3957_s2 = smov 4  }
  0x44   :  { %64 = dma.hbm_to_vmem [thread:$0]  %s5920_s4, 2048, %s4038_s12, [#allocation10], %s3956_s3, %s3956_s3, %s3957_s2  }
  0x45   :  { %3942 = dma.done.wait [#allocation4], 2048  }
  0x46   :  { %3943 = vsyncadd [#allocation4], 4294965248 }
  0x47   :  { %3944 = dma.done.wait [#allocation7], 16512  }
  0x48   :  { %3945 = vsyncadd [#allocation7], 4294950784 }
  0x49   :  { %3946 = dma.done.wait [#allocation10], 2048  }
  0x4a   :  { %3947 = vsyncadd [#allocation10], 4294965248  ;;  %v5925_v0 = vmov 0   ;;  %v92_v1 = vld [vmem:[#allocation3] sm:$0xff]  ;;  %v93_v3 = vld [vmem:[#allocation3 + $0x8] sm:$0xff]  ;;  %vm250_vm0 = vcmask 261120  }
  0x4b   :  { %295 = vmatprep.mubr.bf16.mxu0 %v5925_v0  ;;  %368 = vmatprep.mubr.bf16.mxu1 %v5925_v0  ;;  %v96_v2 = vld [vmem:[#allocation3 + $0x20] sm:$0xff]  ;;  %v97_v5 = vld [vmem:[#allocation3 + $0x28] sm:$0xff]  ;;  %v94_v15 = vld [vmem:[#allocation3 + $0x10] sm:$0xff]  ;;  %vm3960_vm1 = vmmov 0  }
  0x4c   :  { %v3396_v4 = vcombine.high %v92_v1, %v96_v2  ;;  %v3395_v6 = vcombine.low %v92_v1, %v96_v2  ;;  %v100_v7 = vld [vmem:[#allocation3 + $0x40] sm:$0xff]  ;;  %v3398_v9 = vcombine.high %v93_v3, %v97_v5  ;;  %v3397_v10 = vcombine.low %v93_v3, %v97_v5  ;;  %v101_v12 = vld [vmem:[#allocation3 + $0x48] sm:$0xff]  ;;  %v98_v17 = vld [vmem:[#allocation3 + $0x30] sm:$0xff] }
  0x4d   :  { %v104_v8 = vld [vmem:[#allocation3 + $0x60] sm:$0xff]  ;;  %v105_v13 = vld [vmem:[#allocation3 + $0x68] sm:$0xff]  ;;  %v3400_v19 = vcombine.high %v94_v15, %v98_v17  ;;  %v95_v20 = vld [vmem:[#allocation3 + $0x18] sm:$0xff]  ;;  %v3399_v26 = vcombine.low %v94_v15, %v98_v17 }
  0x4e   :  { %v3404_v11 = vcombine.high %v100_v7, %v104_v8  ;;  %263 = vmatprep.subr.bf16.mxu0 %v3396_v4  ;;  %v3406_v14 = vcombine.high %v101_v12, %v105_v13  ;;  %336 = vmatprep.subr.bf16.mxu1 %v3398_v9  ;;  %v3403_v16 = vcombine.low %v100_v7, %v104_v8  ;;  %v99_v21 = vld [vmem:[#allocation3 + $0x38] sm:$0xff]  ;;  %v4074_v22 = vld [vmem:[%s5916_s0] sm:$0xff]   ;;  %v102_v24 = vld [vmem:[#allocation3 + $0x50] sm:$0xff] }
  0x4f   :  { %264 = vmatpush1.bf16.msra.mxu0 %v3395_v6  ;;  %337 = vmatpush1.bf16.msra.mxu1 %v3397_v10  ;;  %v3405_v18 = vcombine.low %v101_v12, %v105_v13  ;;  %v3402_v23 = vcombine.high %v95_v20, %v99_v21  ;;  %v106_v25 = vld [vmem:[#allocation3 + $0x70] sm:$0xff]  ;;  %v103_v27 = vld [vmem:[#allocation3 + $0x58] sm:$0xff]  ;;  %v3401_v29 = vcombine.low %v95_v20, %v99_v21  ;;  %v619_v31 = vld [vmem:[#allocation6] sm:$0xff] }
  0x50   :  { %265 = vmatprep.subr.bf16.mxu0 %v3404_v11  ;;  %338 = vmatprep.subr.bf16.mxu1 %v3406_v14  ;;  %v107_v28 = vld [vmem:[#allocation3 + $0x78] sm:$0xff]  ;;  %v3408_v30 = vcombine.high %v102_v24, %v106_v25  ;;  %v623_v32 = vld [vmem:[#allocation6 + $0x20] sm:$0xff]  ;;  %v3407_v34 = vcombine.low %v102_v24, %v106_v25  ;;  %v620_v35 = vld [vmem:[#allocation6 + $0x8] sm:$0xff] }
  0x51   :  { %v3410_v33 = vcombine.high %v103_v27, %v107_v28  ;;  %v624_v36 = vld [vmem:[#allocation6 + $0x28] sm:$0xff]  ;;  %v4082_v37 = vcombine.high %v619_v31, %v623_v32  ;;  %v3409_v38 = vcombine.low %v103_v27, %v107_v28  ;;  %v4102_v41 = vld [vmem:[%s5916_s0 + $0x10] sm:$0xff]   ;;  %v4113_v42 = vld [vmem:[%s5916_s0 + $0x18] sm:$0xff]   ;;  %v4121_v47 = vcombine.low %v619_v31, %v623_v32 }
  0x52   :  { %v4087_v39 = vld [vmem:[%s5916_s0 + $0x8] sm:$0xff]   ;;  %v4089_v40 = vcombine.high %v620_v35, %v624_v36  ;;  %v627_v43 = vld [vmem:[#allocation6 + $0x40] sm:$0xff]  ;;  %v4123_v48 = vcombine.low %v620_v35, %v624_v36 }
  0x53   :  { %266 = vmatpush1.bf16.msra.mxu0 %v3403_v16  ;;  %339 = vmatpush1.bf16.msra.mxu1 %v3405_v18  ;;  %6196 = vst [vmem:[#allocation16_spill] sm:$0xff] %v4082_v37  ;;  %v631_v44 = vld [vmem:[#allocation6 + $0x60] sm:$0xff]  ;;  %v628_v45 = vld [vmem:[#allocation6 + $0x48] sm:$0xff]  ;;  %6198 = vst [vmem:[#allocation18_spill] sm:$0xff] %v4121_v47 }
  0x54   :  { %409 = vmatprep.subr.bf16.mxu0 %v3400_v19  ;;  %482 = vmatprep.subr.bf16.mxu1 %v3402_v23  ;;  %6197 = vst [vmem:[#allocation17_spill] sm:$0xff] %v4089_v40  ;;  %v632_v46 = vld [vmem:[#allocation6 + $0x68] sm:$0xff]  ;;  %6199 = vst [vmem:[#allocation19_spill] sm:$0xff] %v4123_v48  ;;  %v4125_v49 = vcombine.high %v627_v43, %v631_v44  ;;  %v635_v51 = vld [vmem:[#allocation6 + $0x80] sm:$0xff]  ;;  %v4134_v55 = vcombine.low %v627_v43, %v631_v44 }
  0x55   :  { %v4127_v50 = vcombine.high %v628_v45, %v632_v46  ;;  %v639_v52 = vld [vmem:[#allocation6 + $0xa0] sm:$0xff]  ;;  %v636_v53 = vld [vmem:[#allocation6 + $0x88] sm:$0xff]  ;;  %v4138_v56 = vcombine.low %v628_v45, %v632_v46 }
  0x56   :  { %3411 = vmatmul.mubr.msk.bf16.vlgmr.msra.gmra.mrb[0].mxu0 %vm250_vm0, %v4074_v22  ;;  %3415 = vmatmul.mubr.msk.bf16.vlgmr.msra.gmra.mrb[0].mxu1 %vm250_vm0, %v4074_v22  ;;  %6200 = vst [vmem:[#allocation20_spill] sm:$0xff] %v4125_v49  ;;  %v640_v54 = vld [vmem:[#allocation6 + $0xa8] sm:$0xff]  ;;  %6202 = vst [vmem:[#allocation22_spill] sm:$0xff] %v4134_v55  ;;  %v4140_v57 = vcombine.high %v635_v51, %v639_v52  ;;  %v643_v59 = vld [vmem:[#allocation6 + $0xc0] sm:$0xff]  ;;  %v4148_v63 = vcombine.low %v635_v51, %v639_v52 }
  0x57   :  { %410 = vmatpush1.bf16.msra.mxu0 %v3399_v26  ;;  %305 = vmatprep.mubr.bf16.mxu0 %v5925_v0  ;;  %6201 = vst [vmem:[#allocation21_spill] sm:$0xff] %v4127_v50  ;;  %6203 = vst [vmem:[#allocation23_spill] sm:$0xff] %v4138_v56  ;;  %v4143_v58 = vcombine.high %v636_v53, %v640_v54  ;;  %v647_v60 = vld [vmem:[#allocation6 + $0xe0] sm:$0xff]  ;;  %v644_v61 = vld [vmem:[#allocation6 + $0xc8] sm:$0xff]  ;;  %v4152_v1 = vcombine.low %v636_v53, %v640_v54 }
  0x58   :  { %378 = vmatprep.mubr.bf16.mxu1 %v5925_v0  ;;  %483 = vmatpush1.bf16.msra.mxu1 %v3401_v29  ;;  %6204 = vst [vmem:[#allocation24_spill] sm:$0xff] %v4140_v57  ;;  %v648_v62 = vld [vmem:[#allocation6 + $0xe8] sm:$0xff]  ;;  %6206 = vst [vmem:[#allocation26_spill] sm:$0xff] %v4148_v63  ;;  %v4154_v2 = vcombine.high %v643_v59, %v647_v60  ;;  %v651_v4 = vld [vmem:[#allocation6 + $0x100] sm:$0xff]  ;;  %v4162_v8 = vcombine.low %v643_v59, %v647_v60 }
  0x59   :  { %411 = vmatprep.subr.bf16.mxu0 %v3408_v30  ;;  %484 = vmatprep.subr.bf16.mxu1 %v3410_v33  ;;  %6205 = vst [vmem:[#allocation25_spill] sm:$0xff] %v4143_v58  ;;  %6207 = vst [vmem:[#allocation27_spill] sm:$0xff] %v4152_v1  ;;  %v4157_v3 = vcombine.high %v644_v61, %v648_v62  ;;  %v655_v5 = vld [vmem:[#allocation6 + $0x120] sm:$0xff]  ;;  %v652_v6 = vld [vmem:[#allocation6 + $0x108] sm:$0xff]  ;;  %v4168_v11 = vcombine.low %v644_v61, %v648_v62 }
  0x5a   :  { %6208 = vst [vmem:[#allocation28_spill] sm:$0xff] %v4154_v2  ;;  %v656_v7 = vld [vmem:[#allocation6 + $0x128] sm:$0xff]  ;;  %6210 = vst [vmem:[#allocation30_spill] sm:$0xff] %v4162_v8  ;;  %v659_v9 = vld [vmem:[#allocation6 + $0x140] sm:$0xff]  ;;  %v4170_v12 = vcombine.high %v651_v4, %v655_v5  ;;  %v4178_v16 = vcombine.low %v651_v4, %v655_v5 }
  0x5b   :  { %412 = vmatpush1.bf16.msra.mxu0 %v3407_v34  ;;  %6209 = vst [vmem:[#allocation29_spill] sm:$0xff] %v4157_v3  ;;  %v663_v10 = vld [vmem:[#allocation6 + $0x160] sm:$0xff]  ;;  %6211 = vst [vmem:[#allocation31_spill] sm:$0xff] %v4168_v11  ;;  %v660_v13 = vld [vmem:[#allocation6 + $0x148] sm:$0xff]  ;;  %v4173_v15 = vcombine.high %v652_v6, %v656_v7  ;;  %v4182_v19 = vcombine.low %v652_v6, %v656_v7 }
  0x5c   :  { %1395 = vmatprep.subr.bf16.mxu0 %v4082_v37  ;;  %485 = vmatpush1.bf16.msra.mxu1 %v3409_v38  ;;  %6212 = vst [vmem:[#allocation32_spill] sm:$0xff] %v4170_v12  ;;  %v664_v14 = vld [vmem:[#allocation6 + $0x168] sm:$0xff]  ;;  %6214 = vst [vmem:[#allocation34_spill] sm:$0xff] %v4178_v16  ;;  %v667_v17 = vld [vmem:[#allocation6 + $0x180] sm:$0xff]  ;;  %v4184_v20 = vcombine.high %v659_v9, %v663_v10  ;;  %v4192_v24 = vcombine.low %v659_v9, %v663_v10 }
  0x5d   :  { %1436 = vmatprep.subr.bf16.mxu1 %v4089_v40  ;;  %6213 = vst [vmem:[#allocation33_spill] sm:$0xff] %v4173_v15  ;;  %v671_v18 = vld [vmem:[#allocation6 + $0x1a0] sm:$0xff]  ;;  %6215 = vst [vmem:[#allocation35_spill] sm:$0xff] %v4182_v19  ;;  %v668_v21 = vld [vmem:[#allocation6 + $0x188] sm:$0xff]  ;;  %v4187_v23 = vcombine.high %v660_v13, %v664_v14  ;;  %v4198_v27 = vcombine.low %v660_v13, %v664_v14 }
  0x5e   :  { %3412 = vmatmul.mubr.msk.bf16.gmra.mrb[4].mxu0 %vm250_vm0, %v4087_v39  ;;  %3416 = vmatmul.mubr.msk.bf16.gmra.mrb[4].mxu1 %vm250_vm0, %v4087_v39  ;;  %6216 = vst [vmem:[#allocation36_spill] sm:$0xff] %v4184_v20  ;;  %6218 = vst [vmem:[#allocation38_spill] sm:$0xff] %v4192_v24  ;;  %v675_v25 = vld [vmem:[#allocation6 + $0x1c0] sm:$0xff]  ;;  %v4200_v28 = vcombine.high %v667_v17, %v671_v18  ;;  %v676_v29 = vld [vmem:[#allocation6 + $0x1c8] sm:$0xff]  ;;  %v4208_v32 = vcombine.low %v667_v17, %v671_v18 }
  0x5f   :  { %315 = vmatprep.mubr.bf16.mxu0 %v5925_v0  ;;  %388 = vmatprep.mubr.bf16.mxu1 %v5925_v0  ;;  %6217 = vst [vmem:[#allocation37_spill] sm:$0xff] %v4187_v23  ;;  %v679_v26 = vld [vmem:[#allocation6 + $0x1e0] sm:$0xff]  ;;  %6219 = vst [vmem:[#allocation39_spill] sm:$0xff] %v4198_v27  ;;  %v680_v30 = vld [vmem:[#allocation6 + $0x1e8] sm:$0xff] }
  0x60   :  { %6220 = vst [vmem:[#allocation40_spill] sm:$0xff] %v4200_v28  ;;  %6222 = vst [vmem:[#allocation42_spill] sm:$0xff] %v4208_v32  ;;  %v683_v33 = vld [vmem:[#allocation6 + $0x200] sm:$0xff]  ;;  %v4214_v36 = vcombine.high %v675_v25, %v679_v26  ;;  %v684_v38 = vld [vmem:[#allocation6 + $0x208] sm:$0xff]  ;;  %v4222_v43 = vcombine.low %v675_v25, %v679_v26  ;;  %v4228_v44 = vcombine.low %v676_v29, %v680_v30 }
  0x61   :  { %v687_v34 = vld [vmem:[#allocation6 + $0x220] sm:$0xff]  ;;  %v692_v53 = vld [vmem:[#allocation6 + $0x248] sm:$0xff] }
  0x62   :  { %6224 = vst [vmem:[#allocation44_spill] sm:$0xff] %v4214_v36  ;;  %6226 = vst [vmem:[#allocation46_spill] sm:$0xff] %v4222_v43  ;;  %v4230_v45 = vcombine.high %v683_v33, %v687_v34  ;;  %v691_v51 = vld [vmem:[#allocation6 + $0x240] sm:$0xff]  ;;  %v696_v54 = vld [vmem:[#allocation6 + $0x268] sm:$0xff] }
  0x63   :  { %6227 = vst [vmem:[#allocation47_spill] sm:$0xff] %v4228_v44  ;;  %v695_v52 = vld [vmem:[#allocation6 + $0x260] sm:$0xff]  ;;  %v4247_v61 = vcombine.high %v692_v53, %v696_v54  ;;  %v700_v5 = vld [vmem:[#allocation6 + $0x288] sm:$0xff]  ;;  %v4254_v9 = vcombine.low %v692_v53, %v696_v54 }
  0x64   :  { %6228 = vst [vmem:[#allocation48_spill] sm:$0xff] %v4230_v45  ;;  %v4244_v60 = vcombine.high %v691_v51, %v695_v52  ;;  %v699_v62 = vld [vmem:[#allocation6 + $0x280] sm:$0xff]  ;;  %v704_v6 = vld [vmem:[#allocation6 + $0x2a8] sm:$0xff]  ;;  %v4250_v7 = vcombine.low %v691_v51, %v695_v52 }
  0x65   :  { %6233 = vst [vmem:[#allocation53_spill] sm:$0xff] %v4247_v61  ;;  %v703_v4 = vld [vmem:[#allocation6 + $0x2a0] sm:$0xff]  ;;  %6235 = vst [vmem:[#allocation55_spill] sm:$0xff] %v4254_v9  ;;  %v4259_v13 = vcombine.high %v700_v5, %v704_v6  ;;  %v708_v18 = vld [vmem:[#allocation6 + $0x2c8] sm:$0xff]  ;;  %v4266_v25 = vcombine.low %v700_v5, %v704_v6 }
  0x66   :  { %3413 = vmatmul.mubr.msk.bf16.gmra.mrb[8].mxu0 %vm250_vm0, %v4102_v41  ;;  %3417 = vmatmul.mubr.msk.bf16.gmra.mrb[8].mxu1 %vm250_vm0, %v4102_v41  ;;  %6232 = vst [vmem:[#allocation52_spill] sm:$0xff] %v4244_v60  ;;  %6234 = vst [vmem:[#allocation54_spill] sm:$0xff] %v4250_v7  ;;  %v4256_v10 = vcombine.high %v699_v62, %v703_v4  ;;  %v707_v14 = vld [vmem:[#allocation6 + $0x2c0] sm:$0xff]  ;;  %v728_v5 = vld [vmem:[#allocation6 + $0x368] sm:$0xff] }
  0x67   :  { %325 = vmatprep.mubr.bf16.mxu0 %v5925_v0  ;;  %398 = vmatprep.mubr.bf16.mxu1 %v5925_v0  ;;  %6237 = vst [vmem:[#allocation57_spill] sm:$0xff] %v4259_v13  ;;  %v711_v17 = vld [vmem:[#allocation6 + $0x2e0] sm:$0xff]  ;;  %6239 = vst [vmem:[#allocation59_spill] sm:$0xff] %v4266_v25 }
  0x68   :  { %6236 = vst [vmem:[#allocation56_spill] sm:$0xff] %v4256_v10  ;;  %v4268_v26 = vcombine.high %v707_v14, %v711_v17  ;;  %v723_v54 = vld [vmem:[#allocation6 + $0x340] sm:$0xff] }
  0x6a   :  { %6240 = vst [vmem:[#allocation60_spill] sm:$0xff] %v4268_v26 }
  0x6e   :  { %3414 = vmatmul.mubr.msk.bf16.gmra.mrb[12].mxu0 %vm250_vm0, %v4113_v42  ;;  %3418 = vmatmul.mubr.msk.bf16.gmra.mrb[12].mxu1 %vm250_vm0, %v4113_v42 }
  0x6f   :  { %441 = vmatprep.mubr.bf16.mxu0 %v5925_v0  ;;  %514 = vmatprep.mubr.bf16.mxu1 %v5925_v0 }
  0x76   :  { %3419 = vmatmul.mubr.msk.bf16.vlgmr.msra.gmra.mrb[16].mxu0 %vm250_vm0, %v4074_v22  ;;  %3423 = vmatmul.mubr.msk.bf16.vlgmr.msra.gmra.mrb[16].mxu1 %vm250_vm0, %v4074_v22  ;;  %v672_v22 = vld [vmem:[#allocation6 + $0x1a8] sm:$0xff] }
  0x77   :  { %1396 = vmatpush1.bf16.msra.mxu0 %v4121_v47  ;;  %1437 = vmatpush1.bf16.msra.mxu1 %v4123_v48  ;;  %v4203_v31 = vcombine.high %v668_v21, %v672_v22  ;;  %v4212_v35 = vcombine.low %v668_v21, %v672_v22  ;;  %v712_v21 = vld [vmem:[#allocation6 + $0x2e8] sm:$0xff]  ;;  %v4262_v22 = vcombine.low %v699_v62, %v703_v4  ;;  %v727_v62 = vld [vmem:[#allocation6 + $0x360] sm:$0xff] }
  0x78   :  { %1397 = vmatprep.subr.bf16.mxu0 %v4125_v49  ;;  %1438 = vmatprep.subr.bf16.mxu1 %v4127_v50  ;;  %v4278_v51 = vcombine.low %v708_v18, %v712_v21  ;;  %v724_v4 = vld [vmem:[#allocation6 + $0x348] sm:$0xff] }
  0x79   :  { %451 = vmatprep.mubr.bf16.mxu0 %v5925_v0  ;;  %524 = vmatprep.mubr.bf16.mxu1 %v5925_v0  ;;  %6221 = vst [vmem:[#allocation41_spill] sm:$0xff] %v4203_v31  ;;  %6223 = vst [vmem:[#allocation43_spill] sm:$0xff] %v4212_v35 }
  0x7a   :  { %6238 = vst [vmem:[#allocation58_spill] sm:$0xff] %v4262_v22  ;;  %6243 = vst [vmem:[#allocation63_spill] sm:$0xff] %v4278_v51 }
  0x7b   :  { %1398 = vmatpush1.bf16.msra.mxu0 %v4134_v55  ;;  %1439 = vmatpush1.bf16.msra.mxu1 %v4138_v56 }
  0x7c   :  { %1399 = vmatprep.subr.bf16.mxu0 %v4140_v57  ;;  %1440 = vmatprep.subr.bf16.mxu1 %v4143_v58 }
  0x7e   :  { %3420 = vmatmul.mubr.msk.bf16.gmra.mrb[20].mxu0 %vm250_vm0, %v4087_v39  ;;  %3424 = vmatmul.mubr.msk.bf16.gmra.mrb[20].mxu1 %vm250_vm0, %v4087_v39  ;;  %v688_v39 = vld [vmem:[#allocation6 + $0x228] sm:$0xff] }
  0x7f   :  { %1400 = vmatpush1.bf16.msra.mxu0 %v4148_v63  ;;  %1441 = vmatpush1.bf16.msra.mxu1 %v4152_v1  ;;  %v4233_v46 = vcombine.high %v684_v38, %v688_v39  ;;  %v4242_v59 = vcombine.low %v684_v38, %v688_v39  ;;  %v720_v38 = vld [vmem:[#allocation6 + $0x328] sm:$0xff]  ;;  %v4274_v39 = vcombine.low %v707_v14, %v711_v17 }
  0x80   :  { %1401 = vmatprep.subr.bf16.mxu0 %v4154_v2  ;;  %1442 = vmatprep.subr.bf16.mxu1 %v4157_v3  ;;  %v4292_v17 = vcombine.high %v723_v54, %v727_v62 }
  0x81   :  { %461 = vmatprep.mubr.bf16.mxu0 %v5925_v0  ;;  %534 = vmatprep.mubr.bf16.mxu1 %v5925_v0  ;;  %6229 = vst [vmem:[#allocation49_spill] sm:$0xff] %v4233_v46  ;;  %6231 = vst [vmem:[#allocation51_spill] sm:$0xff] %v4242_v59 }
  0x82   :  { %6242 = vst [vmem:[#allocation62_spill] sm:$0xff] %v4274_v39  ;;  %6248 = vst [vmem:[#allocation68_spill] sm:$0xff] %v4292_v17 }
  0x83   :  { %1402 = vmatpush1.bf16.msra.mxu0 %v4162_v8  ;;  %1443 = vmatpush1.bf16.msra.mxu1 %v4168_v11 }
  0x84   :  { %1403 = vmatprep.subr.bf16.mxu0 %v4170_v12  ;;  %1444 = vmatprep.subr.bf16.mxu1 %v4173_v15 }
  0x86   :  { %3421 = vmatmul.mubr.msk.bf16.gmra.mrb[24].mxu0 %vm250_vm0, %v4102_v41  ;;  %3425 = vmatmul.mubr.msk.bf16.gmra.mrb[24].mxu1 %vm250_vm0, %v4102_v41  ;;  %v4217_v41 = vcombine.high %v676_v29, %v680_v30  ;;  %v4271_v29 = vcombine.high %v708_v18, %v712_v21  ;;  %v715_v30 = vld [vmem:[#allocation6 + $0x300] sm:$0xff]  ;;  %v4295_v18 = vcombine.high %v724_v4, %v728_v5 }
  0x87   :  { %1404 = vmatpush1.bf16.msra.mxu0 %v4178_v16  ;;  %1445 = vmatpush1.bf16.msra.mxu1 %v4182_v19  ;;  %v731_v21 = vld [vmem:[#allocation6 + $0x380] sm:$0xff] }
  0x88   :  { %1405 = vmatprep.subr.bf16.mxu0 %v4184_v20  ;;  %1446 = vmatprep.subr.bf16.mxu1 %v4187_v23  ;;  %6225 = vst [vmem:[#allocation45_spill] sm:$0xff] %v4217_v41  ;;  %6241 = vst [vmem:[#allocation61_spill] sm:$0xff] %v4271_v29 }
  0x89   :  { %471 = vmatprep.mubr.bf16.mxu0 %v5925_v0  ;;  %544 = vmatprep.mubr.bf16.mxu1 %v5925_v0  ;;  %6249 = vst [vmem:[#allocation69_spill] sm:$0xff] %v4295_v18 }
  0x8b   :  { %1406 = vmatpush1.bf16.msra.mxu0 %v4192_v24  ;;  %1447 = vmatpush1.bf16.msra.mxu1 %v4198_v27 }
  0x8c   :  { %1407 = vmatprep.subr.bf16.mxu0 %v4200_v28  ;;  %1448 = vmatprep.subr.bf16.mxu1 %v4203_v31 }
  0x8e   :  { %3422 = vmatmul.mubr.msk.bf16.gmra.mrb[28].mxu0 %vm250_vm0, %v4113_v42  ;;  %3426 = vmatmul.mubr.msk.bf16.gmra.mrb[28].mxu1 %vm250_vm0, %v4113_v42  ;;  %v4238_v42 = vcombine.low %v683_v33, %v687_v34  ;;  %v719_v33 = vld [vmem:[#allocation6 + $0x320] sm:$0xff]  ;;  %v716_v34 = vld [vmem:[#allocation6 + $0x308] sm:$0xff] }
  0x8f   :  { %1408 = vmatpush1.bf16.msra.mxu0 %v4208_v32  ;;  %1449 = vmatpush1.bf16.msra.mxu1 %v4212_v35  ;;  %v4280_v52 = vcombine.high %v715_v30, %v719_v33  ;;  %v4283_v53 = vcombine.high %v716_v34, %v720_v38  ;;  %v4286_v6 = vcombine.low %v715_v30, %v719_v33 }
  0x90   :  { %1409 = vmatprep.subr.bf16.mxu0 %v4214_v36  ;;  %1450 = vmatprep.subr.bf16.mxu1 %v4217_v41  ;;  %6230 = vst [vmem:[#allocation50_spill] sm:$0xff] %v4238_v42  ;;  %v4290_v14 = vcombine.low %v716_v34, %v720_v38  ;;  %v4298_v30 = vcombine.low %v723_v54, %v727_v62 }
  0x91   :  { %1427 = vmatprep.mubr.bf16.mxu0 %v5925_v0  ;;  %1468 = vmatprep.mubr.bf16.mxu1 %v5925_v0  ;;  %6244 = vst [vmem:[#allocation64_spill] sm:$0xff] %v4280_v52  ;;  %6245 = vst [vmem:[#allocation65_spill] sm:$0xff] %v4283_v53  ;;  %v735_v0 = vld [vmem:[#allocation6 + $0x3a0] sm:$0xff]  ;;  %v4302_v33 = vcombine.low %v724_v4, %v728_v5 }
  0x92   :  { %6246 = vst [vmem:[#allocation66_spill] sm:$0xff] %v4286_v6  ;;  %6247 = vst [vmem:[#allocation67_spill] sm:$0xff] %v4290_v14  ;;  %v4304_v34 = vcombine.high %v731_v21, %v735_v0  ;;  %v4310_v54 = vcombine.low %v731_v21, %v735_v0 }
  0x93   :  { %1410 = vmatpush1.bf16.msra.mxu0 %v4222_v43  ;;  %1451 = vmatpush1.bf16.msra.mxu1 %v4228_v44  ;;  %6250 = vst [vmem:[#allocation70_spill] sm:$0xff] %v4298_v30  ;;  %6251 = vst [vmem:[#allocation71_spill] sm:$0xff] %v4302_v33 }
  0x94   :  { %1411 = vmatprep.subr.bf16.mxu0 %v4230_v45  ;;  %1452 = vmatprep.subr.bf16.mxu1 %v4233_v46  ;;  %6252 = vst [vmem:[#allocation72_spill] sm:$0xff] %v4304_v34  ;;  %6254 = vst [vmem:[#allocation74_spill] sm:$0xff] %v4310_v54 }
  0x97   :  { %1412 = vmatpush1.bf16.msra.mxu0 %v4238_v42  ;;  %1453 = vmatpush1.bf16.msra.mxu1 %v4242_v59 }
  0x98   :  { %1413 = vmatprep.subr.bf16.mxu0 %v4244_v60  ;;  %1454 = vmatprep.subr.bf16.mxu1 %v4247_v61 }
  0x9b   :  { %1414 = vmatpush1.bf16.msra.mxu0 %v4250_v7  ;;  %1455 = vmatpush1.bf16.msra.mxu1 %v4254_v9 }
  0x9c   :  { %1415 = vmatprep.subr.bf16.mxu0 %v4256_v10  ;;  %1456 = vmatprep.subr.bf16.mxu1 %v4259_v13 }
  0x9f   :  { %1416 = vmatpush1.bf16.msra.mxu0 %v4262_v22  ;;  %1457 = vmatpush1.bf16.msra.mxu1 %v4266_v25  ;;  %v658_v25 = vld [vmem:[#allocation6 + $0x138] sm:$0xff] }
  0xa0   :  { %1417 = vmatprep.subr.bf16.mxu0 %v4268_v26  ;;  %1458 = vmatprep.subr.bf16.mxu1 %v4271_v29  ;;  %v732_v29 = vld [vmem:[#allocation6 + $0x388] sm:$0xff] }
  0xa1   :  { %v736_v26 = vld [vmem:[#allocation6 + $0x3a8] sm:$0xff] }
  0xa2   :  { %v4307_v38 = vcombine.high %v732_v29, %v736_v26  ;;  %v4314_v62 = vcombine.low %v732_v29, %v736_v26 }
  0xa3   :  { %1418 = vmatpush1.bf16.msra.mxu0 %v4274_v39  ;;  %1459 = vmatpush1.bf16.msra.mxu1 %v4278_v51  ;;  %v740_v51 = vld [vmem:[#allocation6 + $0x3c8] sm:$0xff] }
  0xa4   :  { %1419 = vmatprep.subr.bf16.mxu0 %v4280_v52  ;;  %1460 = vmatprep.subr.bf16.mxu1 %v4283_v53  ;;  %6253 = vst [vmem:[#allocation73_spill] sm:$0xff] %v4307_v38  ;;  %v739_v53 = vld [vmem:[#allocation6 + $0x3c0] sm:$0xff]  ;;  %v744_v39 = vld [vmem:[#allocation6 + $0x3e8] sm:$0xff]  ;;  %6255 = vst [vmem:[#allocation75_spill] sm:$0xff] %v4314_v62 }
  0xa5   :  { %v743_v52 = vld [vmem:[#allocation6 + $0x3e0] sm:$0xff]  ;;  %v4319_v5 = vcombine.high %v740_v51, %v744_v39  ;;  %v4326_v26 = vcombine.low %v740_v51, %v744_v39 }
  0xa6   :  { %v4316_v4 = vcombine.high %v739_v53, %v743_v52  ;;  %v4322_v0 = vcombine.low %v739_v53, %v743_v52 }
  0xa7   :  { %1420 = vmatpush1.bf16.msra.mxu0 %v4286_v6  ;;  %1461 = vmatpush1.bf16.msra.mxu1 %v4290_v14  ;;  %6257 = vst [vmem:[#allocation77_spill] sm:$0xff] %v4319_v5  ;;  %v622_v14 = vld [vmem:[#allocation6 + $0x18] sm:$0xff]  ;;  %6259 = vst [vmem:[#allocation79_spill] sm:$0xff] %v4326_v26 }
  0xa8   :  { %1421 = vmatprep.subr.bf16.mxu0 %v4292_v17  ;;  %1462 = vmatprep.subr.bf16.mxu1 %v4295_v18  ;;  %6256 = vst [vmem:[#allocation76_spill] sm:$0xff] %v4316_v4  ;;  %v621_v18 = vld [vmem:[#allocation6 + $0x10] sm:$0xff]  ;;  %v626_v6 = vld [vmem:[#allocation6 + $0x38] sm:$0xff]  ;;  %6258 = vst [vmem:[#allocation78_spill] sm:$0xff] %v4322_v0 }
  0xa9   :  { %v625_v17 = vld [vmem:[#allocation6 + $0x30] sm:$0xff]  ;;  %v4331_v21 = vcombine.high %v622_v14, %v626_v6  ;;  %v4338_v39 = vcombine.low %v622_v14, %v626_v6 }
  0xaa   :  { %v4328_v29 = vcombine.high %v621_v18, %v625_v17  ;;  %v4334_v52 = vcombine.low %v621_v18, %v625_v17 }
  0xab   :  { %1422 = vmatpush1.bf16.msra.mxu0 %v4298_v30  ;;  %1463 = vmatpush1.bf16.msra.mxu1 %v4302_v33  ;;  %6261 = vst [vmem:[#allocation81_spill] sm:$0xff] %v4331_v21  ;;  %v630_v33 = vld [vmem:[#allocation6 + $0x58] sm:$0xff]  ;;  %6263 = vst [vmem:[#allocation83_spill] sm:$0xff] %v4338_v39 }
  0xac   :  { %1423 = vmatprep.subr.bf16.mxu0 %v4304_v34  ;;  %1464 = vmatprep.subr.bf16.mxu1 %v4307_v38  ;;  %6260 = vst [vmem:[#allocation80_spill] sm:$0xff] %v4328_v29  ;;  %v629_v38 = vld [vmem:[#allocation6 + $0x50] sm:$0xff]  ;;  %v634_v30 = vld [vmem:[#allocation6 + $0x78] sm:$0xff]  ;;  %6262 = vst [vmem:[#allocation82_spill] sm:$0xff] %v4334_v52 }
  0xad   :  { %v633_v34 = vld [vmem:[#allocation6 + $0x70] sm:$0xff]  ;;  %v4343_v53 = vcombine.high %v630_v33, %v634_v30  ;;  %v4352_v6 = vcombine.low %v630_v33, %v634_v30 }
  0xae   :  { %v4340_v51 = vcombine.high %v629_v38, %v633_v34  ;;  %v4348_v17 = vcombine.low %v629_v38, %v633_v34 }
  0xaf   :  { %1424 = vmatpush1.bf16.msra.mxu0 %v4310_v54  ;;  %1465 = vmatpush1.bf16.msra.mxu1 %v4314_v62  ;;  %6265 = vst [vmem:[#allocation85_spill] sm:$0xff] %v4343_v53  ;;  %v6266_v62 = vmov 0   ;;  %v638_v54 = vld [vmem:[#allocation6 + $0x98] sm:$0xff]  ;;  %6268 = vst [vmem:[#allocation87_spill] sm:$0xff] %v4352_v6 }
  0xb0   :  { %1425 = vmatprep.subr.bf16.mxu0 %v4316_v4  ;;  %1466 = vmatprep.subr.bf16.mxu1 %v4319_v5  ;;  %6264 = vst [vmem:[#allocation84_spill] sm:$0xff] %v4340_v51  ;;  %v637_v5 = vld [vmem:[#allocation6 + $0x90] sm:$0xff]  ;;  %6267 = vst [vmem:[#allocation86_spill] sm:$0xff] %v4348_v17 }
  0xb1   :  { %v641_v4 = vld [vmem:[#allocation6 + $0xb0] sm:$0xff] }
  0xb2   :  { %v4354_v14 = vcombine.high %v637_v5, %v641_v4  ;;  %v4362_v34 = vcombine.low %v637_v5, %v641_v4 }
  0xb3   :  { %1426 = vmatpush1.bf16.msra.mxu0 %v4322_v0  ;;  %1467 = vmatpush1.bf16.msra.mxu1 %v4326_v26  ;;  %v642_v0 = vld [vmem:[#allocation6 + $0xb8] sm:$0xff] }
  0xb4   :  { %1477 = vmatprep.subr.bf16.mxu0 %v4328_v29  ;;  %1518 = vmatprep.subr.bf16.mxu1 %v4331_v21  ;;  %6269 = vst [vmem:[#allocation88_spill] sm:$0xff] %v4354_v14  ;;  %v4357_v18 = vcombine.high %v638_v54, %v642_v0  ;;  %v645_v21 = vld [vmem:[#allocation6 + $0xd0] sm:$0xff]  ;;  %v646_v26 = vld [vmem:[#allocation6 + $0xd8] sm:$0xff]  ;;  %6271 = vst [vmem:[#allocation90_spill] sm:$0xff] %v4362_v34  ;;  %v4366_v30 = vcombine.low %v638_v54, %v642_v0 }
  0xb5   :  { %v649_v29 = vld [vmem:[#allocation6 + $0xf0] sm:$0xff] }
  0xb6   :  { %1428 = vmatmul.mubr.bf16.vlgmr.msra.gmra.mrb[32].mxu0 %v6266_v62  ;;  %1469 = vmatmul.mubr.bf16.vlgmr.msra.gmra.mrb[32].mxu1 %v6266_v62  ;;  %6270 = vst [vmem:[#allocation89_spill] sm:$0xff] %v4357_v18  ;;  %6272 = vst [vmem:[#allocation91_spill] sm:$0xff] %v4366_v30  ;;  %v4368_v33 = vcombine.high %v645_v21, %v649_v29  ;;  %v4374_v4 = vcombine.low %v645_v21, %v649_v29 }
  0xb7   :  { %1478 = vmatpush1.bf16.msra.mxu0 %v4334_v52  ;;  %1519 = vmatpush1.bf16.msra.mxu1 %v4338_v39  ;;  %v650_v52 = vld [vmem:[#allocation6 + $0xf8] sm:$0xff] }
  0xb8   :  { %1479 = vmatprep.subr.bf16.mxu0 %v4340_v51  ;;  %1520 = vmatprep.subr.bf16.mxu1 %v4343_v53  ;;  %6273 = vst [vmem:[#allocation92_spill] sm:$0xff] %v4368_v33  ;;  %v4371_v38 = vcombine.high %v646_v26, %v650_v52  ;;  %v653_v53 = vld [vmem:[#allocation6 + $0x110] sm:$0xff]  ;;  %v654_v39 = vld [vmem:[#allocation6 + $0x118] sm:$0xff]  ;;  %6275 = vst [vmem:[#allocation94_spill] sm:$0xff] %v4374_v4  ;;  %v4378_v54 = vcombine.low %v646_v26, %v650_v52 }
  0xb9   :  { %1509 = vmatprep.mubr.bf16.mxu0 %v6266_v62  ;;  %1550 = vmatprep.mubr.bf16.mxu1 %v6266_v62  ;;  %v657_v51 = vld [vmem:[#allocation6 + $0x130] sm:$0xff]  ;;  %v4383_v0 = vcombine.high %v654_v39, %v658_v25  ;;  %v4390_v26 = vcombine.low %v654_v39, %v658_v25 }
  0xba   :  { %6274 = vst [vmem:[#allocation93_spill] sm:$0xff] %v4371_v38  ;;  %6276 = vst [vmem:[#allocation95_spill] sm:$0xff] %v4378_v54  ;;  %v4380_v5 = vcombine.high %v653_v53, %v657_v51  ;;  %v4386_v29 = vcombine.low %v653_v53, %v657_v51 }
  0xbb   :  { %1480 = vmatpush1.bf16.msra.mxu0 %v4348_v17  ;;  %1521 = vmatpush1.bf16.msra.mxu1 %v4352_v6  ;;  %6278 = vst [vmem:[#allocation97_spill] sm:$0xff] %v4383_v0  ;;  %v662_v6 = vld [vmem:[#allocation6 + $0x158] sm:$0xff]  ;;  %6280 = vst [vmem:[#allocation99_spill] sm:$0xff] %v4390_v26 }
  0xbc   :  { %1481 = vmatprep.subr.bf16.mxu0 %v4354_v14  ;;  %1522 = vmatprep.subr.bf16.mxu1 %v4357_v18  ;;  %6277 = vst [vmem:[#allocation96_spill] sm:$0xff] %v4380_v5  ;;  %v661_v18 = vld [vmem:[#allocation6 + $0x150] sm:$0xff]  ;;  %v666_v17 = vld [vmem:[#allocation6 + $0x178] sm:$0xff]  ;;  %6279 = vst [vmem:[#allocation98_spill] sm:$0xff] %v4386_v29 }
  0xbd   :  { %v665_v14 = vld [vmem:[#allocation6 + $0x170] sm:$0xff]  ;;  %v4395_v52 = vcombine.high %v662_v6, %v666_v17  ;;  %v4402_v25 = vcombine.low %v662_v6, %v666_v17 }
  0xbe   :  { %v4392_v21 = vcombine.high %v661_v18, %v665_v14  ;;  %v4398_v51 = vcombine.low %v661_v18, %v665_v14 }
  0xbf   :  { %1482 = vmatpush1.bf16.msra.mxu0 %v4362_v34  ;;  %1523 = vmatpush1.bf16.msra.mxu1 %v4366_v30  ;;  %6282 = vst [vmem:[#allocation101_spill] sm:$0xff] %v4395_v52  ;;  %v670_v30 = vld [vmem:[#allocation6 + $0x198] sm:$0xff]  ;;  %6284 = vst [vmem:[#allocation103_spill] sm:$0xff] %v4402_v25 }
  0xc0   :  { %1483 = vmatprep.subr.bf16.mxu0 %v4368_v33  ;;  %1524 = vmatprep.subr.bf16.mxu1 %v4371_v38  ;;  %6281 = vst [vmem:[#allocation100_spill] sm:$0xff] %v4392_v21  ;;  %v669_v38 = vld [vmem:[#allocation6 + $0x190] sm:$0xff]  ;;  %v674_v34 = vld [vmem:[#allocation6 + $0x1b8] sm:$0xff]  ;;  %6283 = vst [vmem:[#allocation102_spill] sm:$0xff] %v4398_v51 }
  0xc1   :  { %v673_v33 = vld [vmem:[#allocation6 + $0x1b0] sm:$0xff]  ;;  %v4407_v53 = vcombine.high %v670_v30, %v674_v34  ;;  %v4414_v17 = vcombine.low %v670_v30, %v674_v34 }
  0xc2   :  { %v4404_v39 = vcombine.high %v669_v38, %v673_v33  ;;  %v4410_v14 = vcombine.low %v669_v38, %v673_v33 }
  0xc3   :  { %1484 = vmatpush1.bf16.msra.mxu0 %v4374_v4  ;;  %1525 = vmatpush1.bf16.msra.mxu1 %v4378_v54  ;;  %6286 = vst [vmem:[#allocation105_spill] sm:$0xff] %v4407_v53  ;;  %v678_v54 = vld [vmem:[#allocation6 + $0x1d8] sm:$0xff]  ;;  %6288 = vst [vmem:[#allocation107_spill] sm:$0xff] %v4414_v17 }
  0xc4   :  { %1485 = vmatprep.subr.bf16.mxu0 %v4380_v5  ;;  %1526 = vmatprep.subr.bf16.mxu1 %v4383_v0  ;;  %6285 = vst [vmem:[#allocation104_spill] sm:$0xff] %v4404_v39  ;;  %v677_v0 = vld [vmem:[#allocation6 + $0x1d0] sm:$0xff]  ;;  %v682_v4 = vld [vmem:[#allocation6 + $0x1f8] sm:$0xff]  ;;  %6287 = vst [vmem:[#allocation106_spill] sm:$0xff] %v4410_v14 }
  0xc5   :  { %v681_v5 = vld [vmem:[#allocation6 + $0x1f0] sm:$0xff]  ;;  %v4419_v18 = vcombine.high %v678_v54, %v682_v4  ;;  %v4426_v34 = vcombine.low %v678_v54, %v682_v4 }
  0xc6   :  { %v4416_v6 = vcombine.high %v677_v0, %v681_v5  ;;  %v4422_v33 = vcombine.low %v677_v0, %v681_v5 }
  0xc7   :  { %1486 = vmatpush1.bf16.msra.mxu0 %v4386_v29  ;;  %1527 = vmatpush1.bf16.msra.mxu1 %v4390_v26  ;;  %6290 = vst [vmem:[#allocation109_spill] sm:$0xff] %v4419_v18  ;;  %v686_v26 = vld [vmem:[#allocation6 + $0x218] sm:$0xff]  ;;  %6292 = vst [vmem:[#allocation111_spill] sm:$0xff] %v4426_v34 }
  0xc8   :  { %1487 = vmatprep.subr.bf16.mxu0 %v4392_v21  ;;  %1528 = vmatprep.subr.bf16.mxu1 %v4395_v52  ;;  %6289 = vst [vmem:[#allocation108_spill] sm:$0xff] %v4416_v6  ;;  %v685_v52 = vld [vmem:[#allocation6 + $0x210] sm:$0xff]  ;;  %v690_v29 = vld [vmem:[#allocation6 + $0x238] sm:$0xff]  ;;  %6291 = vst [vmem:[#allocation110_spill] sm:$0xff] %v4422_v33 }
  0xc9   :  { %v689_v21 = vld [vmem:[#allocation6 + $0x230] sm:$0xff]  ;;  %v4431_v38 = vcombine.high %v686_v26, %v690_v29  ;;  %v4438_v4 = vcombine.low %v686_v26, %v690_v29 }
  0xca   :  { %v4428_v30 = vcombine.high %v685_v52, %v689_v21  ;;  %v4434_v5 = vcombine.low %v685_v52, %v689_v21 }
  0xcb   :  { %1488 = vmatpush1.bf16.msra.mxu0 %v4398_v51  ;;  %1529 = vmatpush1.bf16.msra.mxu1 %v4402_v25  ;;  %6294 = vst [vmem:[#allocation113_spill] sm:$0xff] %v4431_v38  ;;  %v694_v25 = vld [vmem:[#allocation6 + $0x258] sm:$0xff]  ;;  %6296 = vst [vmem:[#allocation115_spill] sm:$0xff] %v4438_v4 }
  0xcc   :  { %1489 = vmatprep.subr.bf16.mxu0 %v4404_v39  ;;  %1530 = vmatprep.subr.bf16.mxu1 %v4407_v53  ;;  %6293 = vst [vmem:[#allocation112_spill] sm:$0xff] %v4428_v30  ;;  %v693_v53 = vld [vmem:[#allocation6 + $0x250] sm:$0xff]  ;;  %v698_v51 = vld [vmem:[#allocation6 + $0x278] sm:$0xff]  ;;  %6295 = vst [vmem:[#allocation114_spill] sm:$0xff] %v4434_v5 }
  0xcd   :  { %v697_v39 = vld [vmem:[#allocation6 + $0x270] sm:$0xff]  ;;  %v4443_v0 = vcombine.high %v694_v25, %v698_v51  ;;  %v4450_v29 = vcombine.low %v694_v25, %v698_v51 }
  0xce   :  { %v4440_v54 = vcombine.high %v693_v53, %v697_v39  ;;  %v4446_v21 = vcombine.low %v693_v53, %v697_v39 }
  0xcf   :  { %1490 = vmatpush1.bf16.msra.mxu0 %v4410_v14  ;;  %1531 = vmatpush1.bf16.msra.mxu1 %v4414_v17  ;;  %6298 = vst [vmem:[#allocation117_spill] sm:$0xff] %v4443_v0  ;;  %v702_v17 = vld [vmem:[#allocation6 + $0x298] sm:$0xff]  ;;  %6300 = vst [vmem:[#allocation119_spill] sm:$0xff] %v4450_v29 }
  0xd0   :  { %1491 = vmatprep.subr.bf16.mxu0 %v4416_v6  ;;  %1532 = vmatprep.subr.bf16.mxu1 %v4419_v18  ;;  %6297 = vst [vmem:[#allocation116_spill] sm:$0xff] %v4440_v54  ;;  %v701_v18 = vld [vmem:[#allocation6 + $0x290] sm:$0xff]  ;;  %v706_v14 = vld [vmem:[#allocation6 + $0x2b8] sm:$0xff]  ;;  %6299 = vst [vmem:[#allocation118_spill] sm:$0xff] %v4446_v21 }
  0xd1   :  { %v705_v6 = vld [vmem:[#allocation6 + $0x2b0] sm:$0xff]  ;;  %v4455_v52 = vcombine.high %v702_v17, %v706_v14  ;;  %v4462_v51 = vcombine.low %v702_v17, %v706_v14 }
  0xd2   :  { %v4452_v26 = vcombine.high %v701_v18, %v705_v6  ;;  %v4458_v39 = vcombine.low %v701_v18, %v705_v6 }
  0xd3   :  { %1492 = vmatpush1.bf16.msra.mxu0 %v4422_v33  ;;  %1533 = vmatpush1.bf16.msra.mxu1 %v4426_v34  ;;  %6302 = vst [vmem:[#allocation121_spill] sm:$0xff] %v4455_v52  ;;  %v710_v34 = vld [vmem:[#allocation6 + $0x2d8] sm:$0xff]  ;;  %6304 = vst [vmem:[#allocation123_spill] sm:$0xff] %v4462_v51 }
  0xd4   :  { %1493 = vmatprep.subr.bf16.mxu0 %v4428_v30  ;;  %1534 = vmatprep.subr.bf16.mxu1 %v4431_v38  ;;  %6301 = vst [vmem:[#allocation120_spill] sm:$0xff] %v4452_v26  ;;  %v709_v38 = vld [vmem:[#allocation6 + $0x2d0] sm:$0xff]  ;;  %v714_v33 = vld [vmem:[#allocation6 + $0x2f8] sm:$0xff]  ;;  %6303 = vst [vmem:[#allocation122_spill] sm:$0xff] %v4458_v39 }
  0xd5   :  { %v713_v30 = vld [vmem:[#allocation6 + $0x2f0] sm:$0xff]  ;;  %v4467_v53 = vcombine.high %v710_v34, %v714_v33  ;;  %v4474_v14 = vcombine.low %v710_v34, %v714_v33 }
  0xd6   :  { %v4464_v25 = vcombine.high %v709_v38, %v713_v30  ;;  %v4470_v6 = vcombine.low %v709_v38, %v713_v30 }
  0xd7   :  { %1494 = vmatpush1.bf16.msra.mxu0 %v4434_v5  ;;  %1535 = vmatpush1.bf16.msra.mxu1 %v4438_v4  ;;  %6306 = vst [vmem:[#allocation125_spill] sm:$0xff] %v4467_v53  ;;  %v718_v4 = vld [vmem:[#allocation6 + $0x318] sm:$0xff]  ;;  %6308 = vst [vmem:[#allocation127_spill] sm:$0xff] %v4474_v14 }
  0xd8   :  { %1495 = vmatprep.subr.bf16.mxu0 %v4440_v54  ;;  %1536 = vmatprep.subr.bf16.mxu1 %v4443_v0  ;;  %6305 = vst [vmem:[#allocation124_spill] sm:$0xff] %v4464_v25  ;;  %v717_v0 = vld [vmem:[#allocation6 + $0x310] sm:$0xff]  ;;  %v722_v5 = vld [vmem:[#allocation6 + $0x338] sm:$0xff]  ;;  %6307 = vst [vmem:[#allocation126_spill] sm:$0xff] %v4470_v6 }
  0xd9   :  { %v721_v54 = vld [vmem:[#allocation6 + $0x330] sm:$0xff]  ;;  %v4479_v18 = vcombine.high %v718_v4, %v722_v5  ;;  %v4486_v33 = vcombine.low %v718_v4, %v722_v5 }
  0xda   :  { %v4476_v17 = vcombine.high %v717_v0, %v721_v54  ;;  %v4482_v30 = vcombine.low %v717_v0, %v721_v54 }
  0xdb   :  { %1496 = vmatpush1.bf16.msra.mxu0 %v4446_v21  ;;  %1537 = vmatpush1.bf16.msra.mxu1 %v4450_v29  ;;  %6310 = vst [vmem:[#allocation129_spill] sm:$0xff] %v4479_v18  ;;  %v726_v29 = vld [vmem:[#allocation6 + $0x358] sm:$0xff]  ;;  %6312 = vst [vmem:[#allocation131_spill] sm:$0xff] %v4486_v33 }
  0xdc   :  { %1497 = vmatprep.subr.bf16.mxu0 %v4452_v26  ;;  %1538 = vmatprep.subr.bf16.mxu1 %v4455_v52  ;;  %6309 = vst [vmem:[#allocation128_spill] sm:$0xff] %v4476_v17  ;;  %v725_v52 = vld [vmem:[#allocation6 + $0x350] sm:$0xff]  ;;  %v730_v21 = vld [vmem:[#allocation6 + $0x378] sm:$0xff]  ;;  %6311 = vst [vmem:[#allocation130_spill] sm:$0xff] %v4482_v30 }
  0xdd   :  { %v729_v26 = vld [vmem:[#allocation6 + $0x370] sm:$0xff]  ;;  %v4491_v38 = vcombine.high %v726_v29, %v730_v21  ;;  %v4498_v5 = vcombine.low %v726_v29, %v730_v21 }
  0xde   :  { %v4488_v34 = vcombine.high %v725_v52, %v729_v26  ;;  %v4494_v54 = vcombine.low %v725_v52, %v729_v26 }
  0xdf   :  { %1498 = vmatpush1.bf16.msra.mxu0 %v4458_v39  ;;  %1539 = vmatpush1.bf16.msra.mxu1 %v4462_v51  ;;  %6314 = vst [vmem:[#allocation133_spill] sm:$0xff] %v4491_v38  ;;  %v734_v51 = vld [vmem:[#allocation6 + $0x398] sm:$0xff]  ;;  %6316 = vst [vmem:[#allocation135_spill] sm:$0xff] %v4498_v5 }
  0xe0   :  { %1499 = vmatprep.subr.bf16.mxu0 %v4464_v25  ;;  %1540 = vmatprep.subr.bf16.mxu1 %v4467_v53  ;;  %6313 = vst [vmem:[#allocation132_spill] sm:$0xff] %v4488_v34  ;;  %v733_v53 = vld [vmem:[#allocation6 + $0x390] sm:$0xff]  ;;  %v738_v39 = vld [vmem:[#allocation6 + $0x3b8] sm:$0xff]  ;;  %6315 = vst [vmem:[#allocation134_spill] sm:$0xff] %v4494_v54 }
  0xe1   :  { %v737_v25 = vld [vmem:[#allocation6 + $0x3b0] sm:$0xff]  ;;  %v4503_v0 = vcombine.high %v734_v51, %v738_v39  ;;  %v4510_v21 = vcombine.low %v734_v51, %v738_v39  ;;  %v6325_v39 = vld [vmem:[#allocation59_spill] sm:$0xff] }
  0xe2   :  { %v4500_v4 = vcombine.high %v733_v53, %v737_v25  ;;  %v4506_v26 = vcombine.low %v733_v53, %v737_v25  ;;  %v6326_v51 = vld [vmem:[#allocation60_spill] sm:$0xff]  ;;  %v6327_v53 = vld [vmem:[#allocation61_spill] sm:$0xff] }
  0xe3   :  { %1500 = vmatpush1.bf16.msra.mxu0 %v4470_v6  ;;  %1541 = vmatpush1.bf16.msra.mxu1 %v4474_v14  ;;  %6318 = vst [vmem:[#allocation137_spill] sm:$0xff] %v4503_v0  ;;  %v742_v14 = vld [vmem:[#allocation6 + $0x3d8] sm:$0xff]  ;;  %6320 = vst [vmem:[#allocation139_spill] sm:$0xff] %v4510_v21 }
  0xe4   :  { %1501 = vmatprep.subr.bf16.mxu0 %v4476_v17  ;;  %1542 = vmatprep.subr.bf16.mxu1 %v4479_v18  ;;  %6317 = vst [vmem:[#allocation136_spill] sm:$0xff] %v4500_v4  ;;  %v741_v18 = vld [vmem:[#allocation6 + $0x3d0] sm:$0xff]  ;;  %v746_v6 = vld [vmem:[#allocation6 + $0x3f8] sm:$0xff]  ;;  %6319 = vst [vmem:[#allocation138_spill] sm:$0xff] %v4506_v26 }
  0xe5   :  { %v745_v17 = vld [vmem:[#allocation6 + $0x3f0] sm:$0xff]  ;;  %v4515_v52 = vcombine.high %v742_v14, %v746_v6  ;;  %v4522_v25 = vcombine.low %v742_v14, %v746_v6  ;;  %v6328_v14 = vld [vmem:[#allocation62_spill] sm:$0xff] }
  0xe6   :  { %v4512_v29 = vcombine.high %v741_v18, %v745_v17 }
  0xe7   :  { %1502 = vmatpush1.bf16.msra.mxu0 %v4482_v30  ;;  %1543 = vmatpush1.bf16.msra.mxu1 %v4486_v33  ;;  %6322 = vst [vmem:[#allocation141_spill] sm:$0xff] %v4515_v52  ;;  %6324 = vst [vmem:[#allocation143_spill] sm:$0xff] %v4522_v25 }
  0xe8   :  { %1503 = vmatprep.subr.bf16.mxu0 %v4488_v34  ;;  %1544 = vmatprep.subr.bf16.mxu1 %v4491_v38  ;;  %6321 = vst [vmem:[#allocation140_spill] sm:$0xff] %v4512_v29  ;;  %v4518_v38 = vcombine.low %v741_v18, %v745_v17  ;;  %v6329_v17 = vld [vmem:[#allocation63_spill] sm:$0xff]  ;;  %v6330_v18 = vld [vmem:[#allocation64_spill] sm:$0xff] }
  0xea   :  { %6323 = vst [vmem:[#allocation142_spill] sm:$0xff] %v4518_v38 }
  0xeb   :  { %1504 = vmatpush1.bf16.msra.mxu0 %v4494_v54  ;;  %1545 = vmatpush1.bf16.msra.mxu1 %v4498_v5 }
  0xec   :  { %1505 = vmatprep.subr.bf16.mxu0 %v4500_v4  ;;  %1546 = vmatprep.subr.bf16.mxu1 %v4503_v0 }
  0xef   :  { %1506 = vmatpush1.bf16.msra.mxu0 %v4506_v26  ;;  %1547 = vmatpush1.bf16.msra.mxu1 %v4510_v21 }
  0xf0   :  { %1507 = vmatprep.subr.bf16.mxu0 %v4512_v29  ;;  %1548 = vmatprep.subr.bf16.mxu1 %v4515_v52 }
  0xf3   :  { %1508 = vmatpush1.bf16.msra.mxu0 %v4518_v38  ;;  %1549 = vmatpush1.bf16.msra.mxu1 %v4522_v25 }
  0xf4   :  { %1607 = vmatprep.subr.bf16.mxu0 %v4082_v37  ;;  %1648 = vmatprep.subr.bf16.mxu1 %v4089_v40 }
  0xf6   :  { %1510 = vmatmul.mubr.bf16.vlgmr.msra.gmra.mrb[36].mxu0 %v6266_v62  ;;  %1551 = vmatmul.mubr.bf16.vlgmr.msra.gmra.mrb[36].mxu1 %v6266_v62  ;;  %v110_v62 = vlaneseq }
  0xf7   :  { %1608 = vmatpush1.bf16.msra.mxu0 %v4121_v47  ;;  %1649 = vmatpush1.bf16.msra.mxu1 %v4123_v48 }
  0xf8   :  { %1609 = vmatprep.subr.bf16.mxu0 %v4125_v49  ;;  %1650 = vmatprep.subr.bf16.mxu1 %v4127_v50  ;;  %v4575_v6 = vshrl.u32 %v110_v62, 7  ;;  %v6332_v62 = vld [vmem:[#allocation66_spill] sm:$0xff] }
  0xfb   :  { %1610 = vmatpush1.bf16.msra.mxu0 %v4134_v55  ;;  %1651 = vmatpush1.bf16.msra.mxu1 %v4138_v56 }
  0xfc   :  { %1611 = vmatprep.subr.bf16.mxu0 %v4140_v57  ;;  %1652 = vmatprep.subr.bf16.mxu1 %v4143_v58 }
  0xff   :  { %1612 = vmatpush1.bf16.msra.mxu0 %v4148_v63  ;;  %1653 = vmatpush1.bf16.msra.mxu1 %v4152_v1 }
 0x100   :  { %1613 = vmatprep.subr.bf16.mxu0 %v4154_v2  ;;  %1654 = vmatprep.subr.bf16.mxu1 %v4157_v3 }
 0x103   :  { %1614 = vmatpush1.bf16.msra.mxu0 %v4162_v8  ;;  %1655 = vmatpush1.bf16.msra.mxu1 %v4168_v11 }
 0x104   :  { %1615 = vmatprep.subr.bf16.mxu0 %v4170_v12  ;;  %1656 = vmatprep.subr.bf16.mxu1 %v4173_v15 }
 0x107   :  { %1616 = vmatpush1.bf16.msra.mxu0 %v4178_v16  ;;  %1657 = vmatpush1.bf16.msra.mxu1 %v4182_v19 }
 0x108   :  { %1617 = vmatprep.subr.bf16.mxu0 %v4184_v20  ;;  %1658 = vmatprep.subr.bf16.mxu1 %v4187_v23 }
 0x10b   :  { %1618 = vmatpush1.bf16.msra.mxu0 %v4192_v24  ;;  %1659 = vmatpush1.bf16.msra.mxu1 %v4198_v27 }
 0x10c   :  { %1619 = vmatprep.subr.bf16.mxu0 %v4200_v28  ;;  %1660 = vmatprep.subr.bf16.mxu1 %v4203_v31 }
 0x10f   :  { %1620 = vmatpush1.bf16.msra.mxu0 %v4208_v32  ;;  %1661 = vmatpush1.bf16.msra.mxu1 %v4212_v35 }
 0x110   :  { %1621 = vmatprep.subr.bf16.mxu0 %v4214_v36  ;;  %1662 = vmatprep.subr.bf16.mxu1 %v4217_v41  ;;  %v6346_v41 = vld [vmem:[#allocation76_spill] sm:$0xff] }
 0x111   :  { %v6355_v36 = vld [vmem:[#allocation80_spill] sm:$0xff] }
 0x113   :  { %1622 = vmatpush1.bf16.msra.mxu0 %v4222_v43  ;;  %1663 = vmatpush1.bf16.msra.mxu1 %v4228_v44  ;;  %v6342_v43 = vld [vmem:[#allocation73_spill] sm:$0xff] }
 0x114   :  { %1623 = vmatprep.subr.bf16.mxu0 %v4230_v45  ;;  %1664 = vmatprep.subr.bf16.mxu1 %v4233_v46  ;;  %v6338_v46 = vld [vmem:[#allocation71_spill] sm:$0xff]  ;;  %v6339_v45 = vld [vmem:[#allocation72_spill] sm:$0xff] }
 0x117   :  { %1624 = vmatpush1.bf16.msra.mxu0 %v4238_v42  ;;  %1665 = vmatpush1.bf16.msra.mxu1 %v4242_v59 }
 0x118   :  { %1625 = vmatprep.subr.bf16.mxu0 %v4244_v60  ;;  %1666 = vmatprep.subr.bf16.mxu1 %v4247_v61 }
 0x11b   :  { %1626 = vmatpush1.bf16.msra.mxu0 %v4250_v7  ;;  %1667 = vmatpush1.bf16.msra.mxu1 %v4254_v9  ;;  %v4584_v9 = vld [vmem:[#allocation8] sm:$0xff] }
 0x11c   :  { %1627 = vmatprep.subr.bf16.mxu0 %v4256_v10  ;;  %1668 = vmatprep.subr.bf16.mxu1 %v4259_v13  ;;  %v120_v10 = vsub.s32 2, %v4575_v6  ;;  %v6331_v13 = vld [vmem:[#allocation65_spill] sm:$0xff] }
 0x11f   :  { %1628 = vmatpush1.bf16.msra.mxu0 %v4262_v22  ;;  %1669 = vmatpush1.bf16.msra.mxu1 %v6325_v39  ;;  %v112_v22 = vsub.s32 0, %v4575_v6  ;;  %v124_v39 = vsub.s32 3, %v4575_v6 }
 0x120   :  { %1629 = vmatprep.subr.bf16.mxu0 %v6326_v51  ;;  %1670 = vmatprep.subr.bf16.mxu1 %v6327_v53  ;;  %v116_v53 = vsub.s32 1, %v4575_v6  ;;  %v6333_v51 = vld [vmem:[#allocation67_spill] sm:$0xff] }
 0x121   :  { %v4597_v7 = vrot.slane %v4584_v9, %v112_v22 }
 0x123   :  { %1630 = vmatpush1.bf16.msra.mxu0 %v6328_v14  ;;  %1671 = vmatpush1.bf16.msra.mxu1 %v6329_v17  ;;  %v6334_v14 = vld [vmem:[#allocation68_spill] sm:$0xff] }
 0x124   :  { %1631 = vmatprep.subr.bf16.mxu0 %v6330_v18  ;;  %1672 = vmatprep.subr.bf16.mxu1 %v6331_v13  ;;  %v4593_v18 = vrot.slane %v4584_v9, %v120_v10  ;;  %v6335_v13 = vld [vmem:[#allocation69_spill] sm:$0xff]  ;;  %v6336_v10 = vld [vmem:[#allocation70_spill] sm:$0xff] }
 0x127   :  { %1632 = vmatpush1.bf16.msra.mxu0 %v6332_v62  ;;  %1673 = vmatpush1.bf16.msra.mxu1 %v6333_v51  ;;  %v4604_v62 = vrot.slane %v4584_v9, %v124_v39  ;;  %v4607_v51 = vrot.slane %v4584_v9, %v116_v53 }
 0x128   :  { %1633 = vmatprep.subr.bf16.mxu0 %v6334_v14  ;;  %1674 = vmatprep.subr.bf16.mxu1 %v6335_v13 }
 0x129   :  { %v4590_v17 = vpop.f32.mrb[0].mxu0  ;;  %v4601_v60 = vpop.f32.mrb[0].mxu1 }
 0x12a   :  { %v4599_v61 = vpop.f32.mrb[1].mxu0  ;;  %v4609_v59 = vpop.f32.mrb[1].mxu1 }
 0x12b   :  { %v301_v14 = vpop.f32.mrb[2].mxu0  ;;  %1634 = vmatpush1.bf16.msra.mxu0 %v6336_v10  ;;  %v374_v42 = vpop.f32.mrb[2].mxu1  ;;  %1675 = vmatpush1.bf16.msra.mxu1 %v6338_v46 }
 0x12c   :  { %v4613_v13 = vadd.f32 %v301_v14, %v4597_v7  ;;  %v303_v22 = vpop.f32.mrb[3].mxu0  ;;  %1635 = vmatprep.subr.bf16.mxu0 %v6339_v45  ;;  %v4621_v53 = vadd.f32 %v374_v42, %v4593_v18  ;;  %v376_v44 = vpop.f32.mrb[3].mxu1  ;;  %1676 = vmatprep.subr.bf16.mxu1 %v6342_v43  ;;  %v6344_v14 = vld [vmem:[#allocation74_spill] sm:$0xff]  ;;  %v6347_v45 = vld [vmem:[#allocation77_spill] sm:$0xff] }
 0x12d   :  { %v4618_v39 = vadd.f32 %v303_v22, %v4607_v51  ;;  %v4625_v10 = vadd.f32 %v376_v44, %v4604_v62 }
 0x12e   :  { %6337 = vst [vmem:[#allocation144_spill] sm:$0xff] %v4613_v13  ;;  %6341 = vst [vmem:[#allocation146_spill] sm:$0xff] %v4621_v53  ;;  %v6345_v13 = vld [vmem:[#allocation75_spill] sm:$0xff] }
 0x12f   :  { %6340 = vst [vmem:[#allocation145_spill] sm:$0xff] %v4618_v39  ;;  %6343 = vst [vmem:[#allocation147_spill] sm:$0xff] %v4625_v10  ;;  %1636 = vmatpush1.bf16.msra.mxu0 %v6344_v14  ;;  %1677 = vmatpush1.bf16.msra.mxu1 %v6345_v13  ;;  %v6351_v14 = vld [vmem:[#allocation78_spill] sm:$0xff] }
 0x130   :  { %1637 = vmatprep.subr.bf16.mxu0 %v6346_v41  ;;  %1678 = vmatprep.subr.bf16.mxu1 %v6347_v45 }
 0x131   :  { %v307_v46 = vpop.f32.mrb[4].mxu0  ;;  %v380_v39 = vpop.f32.mrb[4].mxu1 }
 0x132   :  { %v4632_v22 = vadd.f32 %v307_v46, %v4597_v7  ;;  %v309_v42 = vpop.f32.mrb[5].mxu0  ;;  %v4638_v44 = vadd.f32 %v380_v39, %v4593_v18  ;;  %v382_v10 = vpop.f32.mrb[5].mxu1 }
 0x133   :  { %v4635_v53 = vadd.f32 %v309_v42, %v4607_v51  ;;  %v311_v43 = vpop.f32.mrb[6].mxu0  ;;  %1638 = vmatpush1.bf16.msra.mxu0 %v6351_v14  ;;  %v4645_v45 = vadd.f32 %v382_v10, %v4604_v62  ;;  %v384_v46 = vpop.f32.mrb[6].mxu1 }
 0x134   :  { %6348 = vst [vmem:[#allocation148_spill] sm:$0xff] %v4632_v22  ;;  %6350 = vst [vmem:[#allocation150_spill] sm:$0xff] %v4638_v44  ;;  %v4642_v41 = vadd.f32 %v311_v43, %v4597_v7  ;;  %v313_v13 = vpop.f32.mrb[7].mxu0  ;;  %v6354_v22 = vld [vmem:[#allocation79_spill] sm:$0xff]  ;;  %1689 = vmatprep.subr.bf16.mxu0 %v6355_v36  ;;  %v4653_v39 = vadd.f32 %v384_v46, %v4593_v18  ;;  %v6358_v44 = vld [vmem:[#allocation81_spill] sm:$0xff] }
 0x135   :  { %6349 = vst [vmem:[#allocation149_spill] sm:$0xff] %v4635_v53  ;;  %6353 = vst [vmem:[#allocation152_spill] sm:$0xff] %v4645_v45  ;;  %1679 = vmatpush1.bf16.msra.mxu1 %v6354_v22  ;;  %v4650_v42 = vadd.f32 %v313_v13, %v4607_v51  ;;  %v386_v53 = vpop.f32.mrb[7].mxu1 }
 0x136   :  { %6352 = vst [vmem:[#allocation151_spill] sm:$0xff] %v4642_v41  ;;  %6357 = vst [vmem:[#allocation154_spill] sm:$0xff] %v4653_v39  ;;  %1730 = vmatprep.subr.bf16.mxu1 %v6358_v44  ;;  %v4657_v43 = vadd.f32 %v386_v53, %v4604_v62 }
 0x137   :  { %6356 = vst [vmem:[#allocation153_spill] sm:$0xff] %v4650_v42 }
 0x138   :  { %6359 = vst [vmem:[#allocation155_spill] sm:$0xff] %v4657_v43 }
 0x139   :  { %v317_v41 = vpop.f32.mrb[8].mxu0  ;;  %v390_v22 = vpop.f32.mrb[8].mxu1 }
 0x13a   :  { %v4660_v10 = vadd.f32 %v317_v41, %v4597_v7  ;;  %v319_v45 = vpop.f32.mrb[9].mxu0  ;;  %v4666_v42 = vadd.f32 %v390_v22, %v4593_v18  ;;  %v392_v46 = vpop.f32.mrb[9].mxu1 }
 0x13b   :  { %v4663_v36 = vadd.f32 %v319_v45, %v4607_v51  ;;  %v321_v13 = vpop.f32.mrb[10].mxu0  ;;  %v4672_v53 = vadd.f32 %v392_v46, %v4604_v62  ;;  %v394_v43 = vpop.f32.mrb[10].mxu1 }
 0x13c   :  { %6360 = vst [vmem:[#allocation156_spill] sm:$0xff] %v4660_v10  ;;  %6362 = vst [vmem:[#allocation158_spill] sm:$0xff] %v4666_v42  ;;  %v4669_v39 = vadd.f32 %v321_v13, %v4597_v7  ;;  %v323_v44 = vpop.f32.mrb[11].mxu0  ;;  %v4678_v10 = vadd.f32 %v394_v43, %v4593_v18  ;;  %v396_v45 = vpop.f32.mrb[11].mxu1 }
 0x13d   :  { %6361 = vst [vmem:[#allocation157_spill] sm:$0xff] %v4663_v36  ;;  %6364 = vst [vmem:[#allocation160_spill] sm:$0xff] %v4672_v53  ;;  %v4675_v41 = vadd.f32 %v323_v44, %v4607_v51  ;;  %v4681_v36 = vadd.f32 %v396_v45, %v4604_v62 }
 0x13e   :  { %6363 = vst [vmem:[#allocation159_spill] sm:$0xff] %v4669_v39  ;;  %6366 = vst [vmem:[#allocation162_spill] sm:$0xff] %v4678_v10 }
 0x13f   :  { %6365 = vst [vmem:[#allocation161_spill] sm:$0xff] %v4675_v41  ;;  %6367 = vst [vmem:[#allocation163_spill] sm:$0xff] %v4681_v36 }
 0x141   :  { %v327_v22 = vpop.f32.mrb[12].mxu0  ;;  %v400_v39 = vpop.f32.mrb[12].mxu1 }
 0x142   :  { %v4684_v42 = vadd.f32 %v327_v22, %v4597_v7  ;;  %v329_v13 = vpop.f32.mrb[13].mxu0  ;;  %v4690_v44 = vadd.f32 %v400_v39, %v4593_v18  ;;  %v402_v41 = vpop.f32.mrb[13].mxu1  ;;  %v128_v39 = vsub.s32 4, %v4575_v6 }
 0x143   :  { %v4687_v46 = vadd.f32 %v329_v13, %v4607_v51  ;;  %v331_v53 = vpop.f32.mrb[14].mxu0  ;;  %v4696_v45 = vadd.f32 %v402_v41, %v4604_v62  ;;  %v404_v36 = vpop.f32.mrb[14].mxu1  ;;  %v132_v41 = vsub.s32 5, %v4575_v6 }
 0x144   :  { %6368 = vst [vmem:[#allocation164_spill] sm:$0xff] %v4684_v42  ;;  %6370 = vst [vmem:[#allocation166_spill] sm:$0xff] %v4690_v44  ;;  %v4693_v43 = vadd.f32 %v331_v53, %v4597_v7  ;;  %v333_v10 = vpop.f32.mrb[15].mxu0  ;;  %v4702_v42 = vadd.f32 %v404_v36, %v4593_v18  ;;  %v406_v13 = vpop.f32.mrb[15].mxu1  ;;  %v140_v53 = vsub.s32 7, %v4575_v6  ;;  %v4717_v36 = vrot.slane %v4584_v9, %v128_v39 }
 0x145   :  { %6369 = vst [vmem:[#allocation165_spill] sm:$0xff] %v4687_v46  ;;  %6372 = vst [vmem:[#allocation168_spill] sm:$0xff] %v4696_v45  ;;  %v4699_v22 = vadd.f32 %v333_v10, %v4607_v51  ;;  %v136_v46 = vsub.s32 6, %v4575_v6  ;;  %v4707_v44 = vadd.f32 %v406_v13, %v4604_v62  ;;  %v4727_v13 = vrot.slane %v4584_v9, %v132_v41 }
 0x146   :  { %6371 = vst [vmem:[#allocation167_spill] sm:$0xff] %v4693_v43  ;;  %6374 = vst [vmem:[#allocation170_spill] sm:$0xff] %v4702_v42  ;;  %v4724_v45 = vrot.slane %v4584_v9, %v140_v53 }
 0x147   :  { %6373 = vst [vmem:[#allocation169_spill] sm:$0xff] %v4699_v22  ;;  %6375 = vst [vmem:[#allocation171_spill] sm:$0xff] %v4707_v44  ;;  %v4714_v10 = vrot.slane %v4584_v9, %v136_v46 }
 0x149   :  { %v4711_v43 = vpop.f32.mrb[16].mxu0  ;;  %v4721_v42 = vpop.f32.mrb[16].mxu1 }
 0x14a   :  { %v4719_v22 = vpop.f32.mrb[17].mxu0  ;;  %v4729_v6 = vpop.f32.mrb[17].mxu1 }
 0x14b   :  { %v447_v44 = vpop.f32.mrb[18].mxu0  ;;  %v520_v35 = vpop.f32.mrb[18].mxu1 }
 0x14c   :  { %v4732_v14 = vadd.f32 %v447_v44, %v4717_v36  ;;  %v449_v46 = vpop.f32.mrb[19].mxu0  ;;  %v4738_v32 = vadd.f32 %v520_v35, %v4714_v10  ;;  %v522_v31 = vpop.f32.mrb[19].mxu1 }
 0x14d   :  { %v4735_v39 = vadd.f32 %v449_v46, %v4727_v13  ;;  %v4741_v53 = vadd.f32 %v522_v31, %v4724_v45 }
 0x14e   :  { %6376 = vst [vmem:[#allocation172_spill] sm:$0xff] %v4732_v14  ;;  %6378 = vst [vmem:[#allocation174_spill] sm:$0xff] %v4738_v32 }
 0x14f   :  { %6377 = vst [vmem:[#allocation173_spill] sm:$0xff] %v4735_v39  ;;  %6379 = vst [vmem:[#allocation175_spill] sm:$0xff] %v4741_v53 }
 0x151   :  { %v453_v9 = vpop.f32.mrb[20].mxu0  ;;  %v526_v27 = vpop.f32.mrb[20].mxu1 }
 0x152   :  { %v4744_v41 = vadd.f32 %v453_v9, %v4717_v36  ;;  %v455_v28 = vpop.f32.mrb[21].mxu0  ;;  %v4750_v46 = vadd.f32 %v526_v27, %v4714_v10  ;;  %v528_v39 = vpop.f32.mrb[21].mxu1 }
 0x153   :  { %v4747_v44 = vadd.f32 %v455_v28, %v4727_v13  ;;  %v457_v14 = vpop.f32.mrb[22].mxu0  ;;  %v4756_v31 = vadd.f32 %v528_v39, %v4724_v45  ;;  %v530_v53 = vpop.f32.mrb[22].mxu1 }
 0x154   :  { %6380 = vst [vmem:[#allocation176_spill] sm:$0xff] %v4744_v41  ;;  %6382 = vst [vmem:[#allocation178_spill] sm:$0xff] %v4750_v46  ;;  %v4753_v35 = vadd.f32 %v457_v14, %v4717_v36  ;;  %v459_v32 = vpop.f32.mrb[23].mxu0  ;;  %v4762_v41 = vadd.f32 %v530_v53, %v4714_v10  ;;  %v532_v28 = vpop.f32.mrb[23].mxu1 }
 0x155   :  { %6381 = vst [vmem:[#allocation177_spill] sm:$0xff] %v4747_v44  ;;  %6384 = vst [vmem:[#allocation180_spill] sm:$0xff] %v4756_v31  ;;  %v4759_v9 = vadd.f32 %v459_v32, %v4727_v13  ;;  %v4765_v44 = vadd.f32 %v532_v28, %v4724_v45 }
 0x156   :  { %6383 = vst [vmem:[#allocation179_spill] sm:$0xff] %v4753_v35  ;;  %6386 = vst [vmem:[#allocation182_spill] sm:$0xff] %v4762_v41 }
 0x157   :  { %6385 = vst [vmem:[#allocation181_spill] sm:$0xff] %v4759_v9  ;;  %6387 = vst [vmem:[#allocation183_spill] sm:$0xff] %v4765_v44 }
 0x159   :  { %v463_v27 = vpop.f32.mrb[24].mxu0  ;;  %v536_v35 = vpop.f32.mrb[24].mxu1 }
 0x15a   :  { %v4768_v46 = vadd.f32 %v463_v27, %v4717_v36  ;;  %v465_v14 = vpop.f32.mrb[25].mxu0  ;;  %v4774_v32 = vadd.f32 %v536_v35, %v4714_v10  ;;  %v538_v9 = vpop.f32.mrb[25].mxu1 }
 0x15b   :  { %v4771_v39 = vadd.f32 %v465_v14, %v4727_v13  ;;  %v467_v31 = vpop.f32.mrb[26].mxu0  ;;  %v4780_v28 = vadd.f32 %v538_v9, %v4724_v45  ;;  %v540_v44 = vpop.f32.mrb[26].mxu1 }
 0x15c   :  { %6388 = vst [vmem:[#allocation184_spill] sm:$0xff] %v4768_v46  ;;  %6390 = vst [vmem:[#allocation186_spill] sm:$0xff] %v4774_v32  ;;  %v4777_v53 = vadd.f32 %v467_v31, %v4717_v36  ;;  %v469_v41 = vpop.f32.mrb[27].mxu0  ;;  %v4786_v46 = vadd.f32 %v540_v44, %v4714_v10  ;;  %v542_v14 = vpop.f32.mrb[27].mxu1 }
 0x15d   :  { %6389 = vst [vmem:[#allocation185_spill] sm:$0xff] %v4771_v39  ;;  %6392 = vst [vmem:[#allocation188_spill] sm:$0xff] %v4780_v28  ;;  %v4783_v27 = vadd.f32 %v469_v41, %v4727_v13  ;;  %v4789_v39 = vadd.f32 %v542_v14, %v4724_v45 }
 0x15e   :  { %6391 = vst [vmem:[#allocation187_spill] sm:$0xff] %v4777_v53  ;;  %6394 = vst [vmem:[#allocation190_spill] sm:$0xff] %v4786_v46 }
 0x15f   :  { %6393 = vst [vmem:[#allocation189_spill] sm:$0xff] %v4783_v27  ;;  %6395 = vst [vmem:[#allocation191_spill] sm:$0xff] %v4789_v39 }
 0x161   :  { %v473_v35 = vpop.f32.mrb[28].mxu0  ;;  %v546_v53 = vpop.f32.mrb[28].mxu1 }
 0x162   :  { %v4792_v32 = vadd.f32 %v473_v35, %v4717_v36  ;;  %v475_v31 = vpop.f32.mrb[29].mxu0  ;;  %v4798_v41 = vadd.f32 %v546_v53, %v4714_v10  ;;  %v548_v27 = vpop.f32.mrb[29].mxu1  ;;  %v298_v53 = vadd.f32 %v4590_v17, %v4597_v7 }
 0x163   :  { %v4795_v9 = vadd.f32 %v475_v31, %v4727_v13  ;;  %v477_v28 = vpop.f32.mrb[30].mxu0  ;;  %v4804_v14 = vadd.f32 %v548_v27, %v4724_v45  ;;  %v550_v39 = vpop.f32.mrb[30].mxu1  ;;  %v371_v27 = vadd.f32 %v4601_v60, %v4593_v18  ;;  %v446_v60 = vadd.f32 %v4719_v22, %v4727_v13 }
 0x164   :  { %6396 = vst [vmem:[#allocation192_spill] sm:$0xff] %v4792_v32  ;;  %6398 = vst [vmem:[#allocation194_spill] sm:$0xff] %v4798_v41  ;;  %v4801_v44 = vadd.f32 %v477_v28, %v4717_v36  ;;  %v479_v46 = vpop.f32.mrb[31].mxu0  ;;  %v4810_v32 = vadd.f32 %v550_v39, %v4714_v10  ;;  %v552_v31 = vpop.f32.mrb[31].mxu1  ;;  %v300_v28 = vadd.f32 %v4599_v61, %v4607_v51 }
 0x165   :  { %6397 = vst [vmem:[#allocation193_spill] sm:$0xff] %v4795_v9  ;;  %6400 = vst [vmem:[#allocation196_spill] sm:$0xff] %v4804_v14  ;;  %v4807_v35 = vadd.f32 %v479_v46, %v4727_v13  ;;  %v4813_v9 = vadd.f32 %v552_v31, %v4724_v45  ;;  %v373_v46 = vadd.f32 %v4609_v59, %v4604_v62 }
 0x166   :  { %6399 = vst [vmem:[#allocation195_spill] sm:$0xff] %v4801_v44  ;;  %6402 = vst [vmem:[#allocation198_spill] sm:$0xff] %v4810_v32  ;;  %v444_v59 = vadd.f32 %v4711_v43, %v4717_v36  ;;  %v517_v18 = vadd.f32 %v4721_v42, %v4714_v10  ;;  %v519_v62 = vadd.f32 %v4729_v6, %v4724_v45 }
 0x167   :  { %6401 = vst [vmem:[#allocation197_spill] sm:$0xff] %v4807_v35  ;;  %6403 = vst [vmem:[#allocation199_spill] sm:$0xff] %v4813_v9 }
 0x189   :  { %v1429_v44 = vpop.f32.mrb[32].mxu0  ;;  %v1470_v39 = vpop.f32.mrb[32].mxu1 }
 0x18a   :  { %v1430_v35 = vadd.f32 %v1429_v44, %v298_v53  ;;  %v1431_v32 = vpop.f32.mrb[33].mxu0  ;;  %v1471_v14 = vadd.f32 %v1470_v39, %v371_v27  ;;  %v1472_v31 = vpop.f32.mrb[33].mxu1 }
 0x18b   :  { %v1432_v41 = vadd.f32 %v1431_v32, %v300_v28  ;;  %v1433_v9 = vpop.f32.mrb[34].mxu0  ;;  %v1473_v24 = vadd.f32 %v1472_v31, %v373_v46  ;;  %v1474_v7 = vpop.f32.mrb[34].mxu1 }
 0x18c   :  { %v1434_v23 = vpop.f32.mrb[35].mxu0  ;;  %v1475_v17 = vpop.f32.mrb[35].mxu1  ;;  %v1567_v20 = vmul.f32 0.5, %v1471_v14  ;;  %v1559_v51 = vmul.f32 0.5, %v1430_v35 }
 0x18d   :  { %v1568_v61 = vmul.f32 0.5, %v1473_v24  ;;  %v1560_v19 = vmul.f32 0.5, %v1432_v41 }
 0x18e   :  { %3672 = vtanh.f32 %v1567_v20 }
 0x18f   :  { %3674 = vtanh.f32 %v1568_v61 }
 0x190   :  { %3676 = vtanh.f32 %v1559_v51 }
 0x191   :  { %3678 = vtanh.f32 %v1560_v19 }
 0x198   :  { %v3673_v14 = vpop.eup %3672 }
 0x199   :  { %v3675_v22 = vpop.eup %3674  ;;  %v1571_v53 = vmul.f32 0.5, %v3673_v14 }
 0x19a   :  { %v3677_v42 = vpop.eup %3676  ;;  %v1572_v45 = vmul.f32 0.5, %v3675_v22 }
 0x19b   :  { %v3679_v10 = vpop.eup %3678  ;;  %v1563_v27 = vmul.f32 0.5, %v3677_v42  ;;  %v1573_v39 = vadd.f32 0.5, %v1571_v53  ;;  %v6406_v42 = vld [vmem:[#allocation82_spill] sm:$0xff]  ;;  %v6408_v53 = vld [vmem:[#allocation84_spill] sm:$0xff] }
 0x19c   :  { %v1564_v46 = vmul.f32 0.5, %v3679_v10  ;;  %v1574_v31 = vadd.f32 0.5, %v1572_v45  ;;  %v6407_v10 = vld [vmem:[#allocation83_spill] sm:$0xff]  ;;  %v6410_v45 = vld [vmem:[#allocation86_spill] sm:$0xff] }
 0x19d   :  { %v1565_v7 = vadd.f32 0.5, %v1563_v27  ;;  %v6412_v27 = vld [vmem:[#allocation88_spill] sm:$0xff] }
 0x19e   :  { %v1566_v61 = vadd.f32 0.5, %v1564_v46  ;;  %v6413_v46 = vld [vmem:[#allocation89_spill] sm:$0xff] }
 0x1c9   :  { %v1511_v23 = vpop.f32.mrb[36].mxu0  ;;  %v1552_v32 = vpop.f32.mrb[36].mxu1 }
 0x1ca   :  { %v1512_v24 = vadd.f32 %v1511_v23, %v444_v59  ;;  %v1513_v9 = vpop.f32.mrb[37].mxu0  ;;  %v1553_v20 = vadd.f32 %v1552_v32, %v517_v18  ;;  %v1554_v44 = vpop.f32.mrb[37].mxu1  ;;  %v1585_v59 = vmul.f32 0.0, %v1573_v39  ;;  %v1586_v18 = vmul.f32 0.0, %v1574_v31  ;;  %v6414_v39 = vld [vmem:[#allocation90_spill] sm:$0xff]  ;;  %v6415_v31 = vld [vmem:[#allocation91_spill] sm:$0xff] }
 0x1cb   :  { %v1514_v41 = vadd.f32 %v1513_v9, %v446_v60  ;;  %v1515_v19 = vpop.f32.mrb[38].mxu0  ;;  %v1555_v43 = vadd.f32 %v1554_v44, %v519_v62  ;;  %v1556_v35 = vpop.f32.mrb[38].mxu1 }
 0x1cc   :  { %3680 = vtanh.f32 %v1512_v24  ;;  %v1516_v36 = vpop.f32.mrb[39].mxu0  ;;  %v1557_v13 = vpop.f32.mrb[39].mxu1  ;;  %v1577_v28 = vmul.f32 0.5, %v1553_v20 }
 0x1cd   :  { %3682 = vtanh.f32 %v1514_v41  ;;  %v1578_v6 = vmul.f32 0.5, %v1555_v43 }
 0x1ce   :  { %3684 = vtanh.f32 %v1577_v28  ;;  %v6409_v28 = vld [vmem:[#allocation85_spill] sm:$0xff] }
 0x1cf   :  { %3686 = vtanh.f32 %v1578_v6  ;;  %v6411_v6 = vld [vmem:[#allocation87_spill] sm:$0xff] }
 0x1d6   :  { %v3681_v17 = vpop.eup %3680 }
 0x1d7   :  { %v3683_v51 = vpop.eup %3682  ;;  %v1587_v60 = vmul.f32 %v3681_v17, %v1565_v7  ;;  %v6416_v7 = vld [vmem:[#allocation92_spill] sm:$0xff]  ;;  %v6417_v17 = vld [vmem:[#allocation93_spill] sm:$0xff] }
 0x1d8   :  { %v1588_v23 = vmul.f32 %v3683_v51, %v1566_v61  ;;  %v3685_v32 = vpop.eup %3684  ;;  %v6418_v61 = vld [vmem:[#allocation94_spill] sm:$0xff]  ;;  %v6419_v51 = vld [vmem:[#allocation95_spill] sm:$0xff] }
 0x1d9   :  { %v4831_v62 = vadd.f32 %v1587_v60, %v1585_v59  ;;  %v3687_v9 = vpop.eup %3686  ;;  %v1581_v20 = vmul.f32 0.5, %v3685_v32  ;;  %v6420_v59 = vld [vmem:[#allocation96_spill] sm:$0xff]  ;;  %v6421_v60 = vld [vmem:[#allocation97_spill] sm:$0xff] }
 0x1da   :  { %v4833_v24 = vadd.f32 %v1588_v23, %v1586_v18  ;;  %v1582_v41 = vmul.f32 0.5, %v3687_v9  ;;  %v6422_v18 = vld [vmem:[#allocation98_spill] sm:$0xff]  ;;  %v6423_v23 = vld [vmem:[#allocation99_spill] sm:$0xff]  ;;  %v6424_v32 = vld [vmem:[#allocation100_spill] sm:$0xff] }
 0x1db   :  { %3688 = vtanh.f32 %v4831_v62  ;;  %v1583_v44 = vadd.f32 0.5, %v1581_v20  ;;  %v6425_v9 = vld [vmem:[#allocation101_spill] sm:$0xff]  ;;  %v6426_v20 = vld [vmem:[#allocation102_spill] sm:$0xff] }
 0x1dc   :  { %3690 = vtanh.f32 %v4833_v24  ;;  %v1584_v14 = vadd.f32 0.5, %v1582_v41  ;;  %v6427_v41 = vld [vmem:[#allocation103_spill] sm:$0xff] }
 0x1e5   :  { %v3689_v19 = vpop.eup %3688 }
 0x1e6   :  { %v3691_v43 = vpop.eup %3690  ;;  %v4837_v36 = vmul.f32 %v3689_v19, %v1583_v44  ;;  %v6428_v44 = vld [vmem:[#allocation104_spill] sm:$0xff]  ;;  %v6429_v19 = vld [vmem:[#allocation105_spill] sm:$0xff] }
 0x1e7   :  { %v4839_v35 = vmul.f32 %v3691_v43, %v1584_v14  ;;  %v6430_v14 = vld [vmem:[#allocation106_spill] sm:$0xff]  ;;  %v6431_v43 = vld [vmem:[#allocation107_spill] sm:$0xff] }
 0x1e8   :  { %6404 = vst [vmem:[#allocation200_spill] sm:$0xff] %v4837_v36  ;;  %v4845_v13 = vpack.c.bf16 %v4837_v36, %v4837_v36  ;;  %v6434_v36 = vld [vmem:[#allocation110_spill] sm:$0xff] }
 0x1e9   :  { %6405 = vst [vmem:[#allocation201_spill] sm:$0xff] %v4839_v35  ;;  %v1606_v22 = vpack.c.bf16 %v4839_v35, %v4839_v35  ;;  %v6433_v35 = vld [vmem:[#allocation109_spill] sm:$0xff] }
 0x1eb   :  { %1639 = vmatprep.mubr.bf16.mxu0 %v1606_v22  ;;  %1680 = vmatprep.mubr.bf16.mxu1 %v1606_v22 }
 0x1ec   :  { %1640 = vmatmul.mubr.bf16.vlgmr.msra.gmra.mrb[40].mxu0 %v4845_v13  ;;  %1681 = vmatmul.mubr.bf16.vlgmr.msra.gmra.mrb[40].mxu1 %v4845_v13 }
 0x1ed   :  { %1690 = vmatpush1.bf16.msra.mxu0 %v6406_v42  ;;  %1731 = vmatpush1.bf16.msra.mxu1 %v6407_v10 }
 0x1ee   :  { %1721 = vmatprep.mubr.bf16.mxu0 %v1606_v22  ;;  %1762 = vmatprep.mubr.bf16.mxu1 %v1606_v22  ;;  %v6432_v22 = vld [vmem:[#allocation108_spill] sm:$0xff] }
 0x1ef   :  { %1691 = vmatprep.subr.bf16.mxu0 %v6408_v53  ;;  %1732 = vmatprep.subr.bf16.mxu1 %v6409_v28 }
 0x1f1   :  { %1692 = vmatpush1.bf16.msra.mxu0 %v6410_v45  ;;  %1733 = vmatpush1.bf16.msra.mxu1 %v6411_v6 }
 0x1f2   :  { %1693 = vmatprep.subr.bf16.mxu0 %v6412_v27  ;;  %1734 = vmatprep.subr.bf16.mxu1 %v6413_v46 }
 0x1f5   :  { %1694 = vmatpush1.bf16.msra.mxu0 %v6414_v39  ;;  %1735 = vmatpush1.bf16.msra.mxu1 %v6415_v31 }
 0x1f6   :  { %1695 = vmatprep.subr.bf16.mxu0 %v6416_v7  ;;  %1736 = vmatprep.subr.bf16.mxu1 %v6417_v17 }
 0x1f9   :  { %1696 = vmatpush1.bf16.msra.mxu0 %v6418_v61  ;;  %1737 = vmatpush1.bf16.msra.mxu1 %v6419_v51 }
 0x1fa   :  { %1697 = vmatprep.subr.bf16.mxu0 %v6420_v59  ;;  %1738 = vmatprep.subr.bf16.mxu1 %v6421_v60 }
 0x1fd   :  { %1698 = vmatpush1.bf16.msra.mxu0 %v6422_v18  ;;  %1739 = vmatpush1.bf16.msra.mxu1 %v6423_v23 }
 0x1fe   :  { %1699 = vmatprep.subr.bf16.mxu0 %v6424_v32  ;;  %1740 = vmatprep.subr.bf16.mxu1 %v6425_v9  ;;  %v6435_v32 = vld [vmem:[#allocation111_spill] sm:$0xff]  ;;  %v6436_v9 = vld [vmem:[#allocation112_spill] sm:$0xff] }
 0x201   :  { %1700 = vmatpush1.bf16.msra.mxu0 %v6426_v20  ;;  %1741 = vmatpush1.bf16.msra.mxu1 %v6427_v41  ;;  %v6437_v20 = vld [vmem:[#allocation113_spill] sm:$0xff]  ;;  %v6438_v41 = vld [vmem:[#allocation114_spill] sm:$0xff] }
 0x202   :  { %1701 = vmatprep.subr.bf16.mxu0 %v6428_v44  ;;  %1742 = vmatprep.subr.bf16.mxu1 %v6429_v19  ;;  %v6439_v44 = vld [vmem:[#allocation115_spill] sm:$0xff]  ;;  %v6440_v19 = vld [vmem:[#allocation116_spill] sm:$0xff] }
 0x205   :  { %1702 = vmatpush1.bf16.msra.mxu0 %v6430_v14  ;;  %1743 = vmatpush1.bf16.msra.mxu1 %v6431_v43  ;;  %v6441_v14 = vld [vmem:[#allocation117_spill] sm:$0xff]  ;;  %v6442_v43 = vld [vmem:[#allocation118_spill] sm:$0xff] }
 0x206   :  { %1703 = vmatprep.subr.bf16.mxu0 %v6432_v22  ;;  %1744 = vmatprep.subr.bf16.mxu1 %v6433_v35  ;;  %v6443_v22 = vld [vmem:[#allocation119_spill] sm:$0xff]  ;;  %v6444_v35 = vld [vmem:[#allocation120_spill] sm:$0xff] }
 0x209   :  { %1704 = vmatpush1.bf16.msra.mxu0 %v6434_v36  ;;  %1745 = vmatpush1.bf16.msra.mxu1 %v6435_v32  ;;  %v6445_v36 = vld [vmem:[#allocation121_spill] sm:$0xff]  ;;  %v6446_v32 = vld [vmem:[#allocation122_spill] sm:$0xff] }
 0x20a   :  { %1705 = vmatprep.subr.bf16.mxu0 %v6436_v9  ;;  %1746 = vmatprep.subr.bf16.mxu1 %v6437_v20  ;;  %v6447_v9 = vld [vmem:[#allocation123_spill] sm:$0xff]  ;;  %v6448_v20 = vld [vmem:[#allocation124_spill] sm:$0xff] }
 0x20d   :  { %1706 = vmatpush1.bf16.msra.mxu0 %v6438_v41  ;;  %1747 = vmatpush1.bf16.msra.mxu1 %v6439_v44  ;;  %v6449_v41 = vld [vmem:[#allocation125_spill] sm:$0xff]  ;;  %v6450_v44 = vld [vmem:[#allocation126_spill] sm:$0xff] }
 0x20e   :  { %1707 = vmatprep.subr.bf16.mxu0 %v6440_v19  ;;  %1748 = vmatprep.subr.bf16.mxu1 %v6441_v14  ;;  %v6451_v19 = vld [vmem:[#allocation127_spill] sm:$0xff]  ;;  %v6452_v14 = vld [vmem:[#allocation128_spill] sm:$0xff] }
 0x211   :  { %1708 = vmatpush1.bf16.msra.mxu0 %v6442_v43  ;;  %1749 = vmatpush1.bf16.msra.mxu1 %v6443_v22  ;;  %v6453_v43 = vld [vmem:[#allocation129_spill] sm:$0xff] }
 0x212   :  { %1709 = vmatprep.subr.bf16.mxu0 %v6444_v35  ;;  %1750 = vmatprep.subr.bf16.mxu1 %v6445_v36 }
 0x215   :  { %1710 = vmatpush1.bf16.msra.mxu0 %v6446_v32  ;;  %1751 = vmatpush1.bf16.msra.mxu1 %v6447_v9  ;;  %v6454_v32 = vld [vmem:[#allocation133_spill] sm:$0xff] }
 0x216   :  { %1711 = vmatprep.subr.bf16.mxu0 %v6448_v20  ;;  %1752 = vmatprep.subr.bf16.mxu1 %v6449_v41 }
 0x219   :  { %1712 = vmatpush1.bf16.msra.mxu0 %v6450_v44  ;;  %1753 = vmatpush1.bf16.msra.mxu1 %v6451_v19 }
 0x21a   :  { %1713 = vmatprep.subr.bf16.mxu0 %v6452_v14  ;;  %1754 = vmatprep.subr.bf16.mxu1 %v6453_v43 }
 0x21d   :  { %1714 = vmatpush1.bf16.msra.mxu0 %v4482_v30  ;;  %1755 = vmatpush1.bf16.msra.mxu1 %v4486_v33 }
 0x21e   :  { %1715 = vmatprep.subr.bf16.mxu0 %v4488_v34  ;;  %1756 = vmatprep.subr.bf16.mxu1 %v6454_v32 }
 0x221   :  { %1716 = vmatpush1.bf16.msra.mxu0 %v4494_v54  ;;  %1757 = vmatpush1.bf16.msra.mxu1 %v4498_v5 }
 0x222   :  { %1717 = vmatprep.subr.bf16.mxu0 %v4500_v4  ;;  %1758 = vmatprep.subr.bf16.mxu1 %v4503_v0 }
 0x225   :  { %1718 = vmatpush1.bf16.msra.mxu0 %v4506_v26  ;;  %1759 = vmatpush1.bf16.msra.mxu1 %v4510_v21 }
 0x226   :  { %1719 = vmatprep.subr.bf16.mxu0 %v4512_v29  ;;  %1760 = vmatprep.subr.bf16.mxu1 %v4515_v52 }
 0x229   :  { %1720 = vmatpush1.bf16.msra.mxu0 %v4518_v38  ;;  %1761 = vmatpush1.bf16.msra.mxu1 %v4522_v25  ;;  %v6507_v25 = vld [vmem:[#allocation174_spill] sm:$0xff] }
 0x22a   :  { %1819 = vmatprep.subr.bf16.mxu0 %v4082_v37  ;;  %1860 = vmatprep.subr.bf16.mxu1 %v4089_v40 }
 0x22c   :  { %1722 = vmatmul.mubr.bf16.vlgmr.msra.gmra.mrb[44].mxu0 %v4845_v13  ;;  %1763 = vmatmul.mubr.bf16.vlgmr.msra.gmra.mrb[44].mxu1 %v4845_v13  ;;  %v6455_v13 = vld [vmem:[#allocation35_spill] sm:$0xff] }
 0x22d   :  { %1820 = vmatpush1.bf16.msra.mxu0 %v4121_v47  ;;  %1861 = vmatpush1.bf16.msra.mxu1 %v4123_v48 }
 0x22e   :  { %1821 = vmatprep.subr.bf16.mxu0 %v4125_v49  ;;  %1862 = vmatprep.subr.bf16.mxu1 %v4127_v50  ;;  %v6504_v50 = vld [vmem:[#allocation145_spill] sm:$0xff]  ;;  %v6505_v49 = vld [vmem:[#allocation147_spill] sm:$0xff] }
 0x231   :  { %1822 = vmatpush1.bf16.msra.mxu0 %v4134_v55  ;;  %1863 = vmatpush1.bf16.msra.mxu1 %v4138_v56  ;;  %v6503_v56 = vld [vmem:[#allocation146_spill] sm:$0xff] }
 0x232   :  { %1823 = vmatprep.subr.bf16.mxu0 %v4140_v57  ;;  %1864 = vmatprep.subr.bf16.mxu1 %v4143_v58  ;;  %v6456_v58 = vld [vmem:[#allocation36_spill] sm:$0xff] }
 0x233   :  { %v6502_v57 = vld [vmem:[#allocation144_spill] sm:$0xff] }
 0x235   :  { %1824 = vmatpush1.bf16.msra.mxu0 %v4148_v63  ;;  %1865 = vmatpush1.bf16.msra.mxu1 %v4152_v1  ;;  %v6457_v63 = vld [vmem:[#allocation37_spill] sm:$0xff]  ;;  %v6458_v1 = vld [vmem:[#allocation38_spill] sm:$0xff] }
 0x236   :  { %1825 = vmatprep.subr.bf16.mxu0 %v4154_v2  ;;  %1866 = vmatprep.subr.bf16.mxu1 %v4157_v3  ;;  %v6459_v2 = vld [vmem:[#allocation39_spill] sm:$0xff]  ;;  %v6460_v3 = vld [vmem:[#allocation40_spill] sm:$0xff] }
 0x239   :  { %1826 = vmatpush1.bf16.msra.mxu0 %v4162_v8  ;;  %1867 = vmatpush1.bf16.msra.mxu1 %v4168_v11  ;;  %v6461_v8 = vld [vmem:[#allocation41_spill] sm:$0xff]  ;;  %v6462_v11 = vld [vmem:[#allocation42_spill] sm:$0xff] }
 0x23a   :  { %1827 = vmatprep.subr.bf16.mxu0 %v4170_v12  ;;  %1868 = vmatprep.subr.bf16.mxu1 %v4173_v15  ;;  %v6463_v12 = vld [vmem:[#allocation43_spill] sm:$0xff]  ;;  %v6464_v15 = vld [vmem:[#allocation44_spill] sm:$0xff] }
 0x23d   :  { %1828 = vmatpush1.bf16.msra.mxu0 %v4178_v16  ;;  %1869 = vmatpush1.bf16.msra.mxu1 %v6455_v13  ;;  %v6465_v16 = vld [vmem:[#allocation45_spill] sm:$0xff]  ;;  %v6466_v13 = vld [vmem:[#allocation46_spill] sm:$0xff] }
 0x23e   :  { %1829 = vmatprep.subr.bf16.mxu0 %v6456_v58  ;;  %1870 = vmatprep.subr.bf16.mxu1 %v6457_v63  ;;  %v6467_v58 = vld [vmem:[#allocation47_spill] sm:$0xff]  ;;  %v6468_v63 = vld [vmem:[#allocation48_spill] sm:$0xff] }
 0x241   :  { %1830 = vmatpush1.bf16.msra.mxu0 %v6458_v1  ;;  %1871 = vmatpush1.bf16.msra.mxu1 %v6459_v2  ;;  %v6469_v1 = vld [vmem:[#allocation49_spill] sm:$0xff]  ;;  %v6470_v2 = vld [vmem:[#allocation50_spill] sm:$0xff] }
 0x242   :  { %1831 = vmatprep.subr.bf16.mxu0 %v6460_v3  ;;  %1872 = vmatprep.subr.bf16.mxu1 %v6461_v8  ;;  %v6471_v3 = vld [vmem:[#allocation51_spill] sm:$0xff]  ;;  %v6472_v8 = vld [vmem:[#allocation52_spill] sm:$0xff] }
 0x245   :  { %1832 = vmatpush1.bf16.msra.mxu0 %v6462_v11  ;;  %1873 = vmatpush1.bf16.msra.mxu1 %v6463_v12  ;;  %v6473_v11 = vld [vmem:[#allocation53_spill] sm:$0xff]  ;;  %v6474_v12 = vld [vmem:[#allocation54_spill] sm:$0xff] }
 0x246   :  { %1833 = vmatprep.subr.bf16.mxu0 %v6464_v15  ;;  %1874 = vmatprep.subr.bf16.mxu1 %v6465_v16  ;;  %v6475_v15 = vld [vmem:[#allocation55_spill] sm:$0xff]  ;;  %v6476_v16 = vld [vmem:[#allocation56_spill] sm:$0xff] }
 0x249   :  { %1834 = vmatpush1.bf16.msra.mxu0 %v6466_v13  ;;  %1875 = vmatpush1.bf16.msra.mxu1 %v6467_v58  ;;  %v6477_v13 = vld [vmem:[#allocation57_spill] sm:$0xff]  ;;  %v6478_v58 = vld [vmem:[#allocation58_spill] sm:$0xff] }
 0x24a   :  { %1835 = vmatprep.subr.bf16.mxu0 %v6468_v63  ;;  %1876 = vmatprep.subr.bf16.mxu1 %v6469_v1  ;;  %v6479_v63 = vld [vmem:[#allocation59_spill] sm:$0xff]  ;;  %v6480_v1 = vld [vmem:[#allocation60_spill] sm:$0xff] }
 0x24d   :  { %1836 = vmatpush1.bf16.msra.mxu0 %v6470_v2  ;;  %1877 = vmatpush1.bf16.msra.mxu1 %v6471_v3  ;;  %v6481_v2 = vld [vmem:[#allocation61_spill] sm:$0xff]  ;;  %v6482_v3 = vld [vmem:[#allocation62_spill] sm:$0xff] }
 0x24e   :  { %1837 = vmatprep.subr.bf16.mxu0 %v6472_v8  ;;  %1878 = vmatprep.subr.bf16.mxu1 %v6473_v11  ;;  %v6483_v8 = vld [vmem:[#allocation63_spill] sm:$0xff]  ;;  %v6484_v11 = vld [vmem:[#allocation64_spill] sm:$0xff] }
 0x251   :  { %1838 = vmatpush1.bf16.msra.mxu0 %v6474_v12  ;;  %1879 = vmatpush1.bf16.msra.mxu1 %v6475_v15  ;;  %v6485_v12 = vld [vmem:[#allocation65_spill] sm:$0xff]  ;;  %v6486_v15 = vld [vmem:[#allocation66_spill] sm:$0xff] }
 0x252   :  { %1839 = vmatprep.subr.bf16.mxu0 %v6476_v16  ;;  %1880 = vmatprep.subr.bf16.mxu1 %v6477_v13  ;;  %v6487_v16 = vld [vmem:[#allocation67_spill] sm:$0xff]  ;;  %v6488_v13 = vld [vmem:[#allocation68_spill] sm:$0xff] }
 0x255   :  { %1840 = vmatpush1.bf16.msra.mxu0 %v6478_v58  ;;  %1881 = vmatpush1.bf16.msra.mxu1 %v6479_v63  ;;  %v6489_v58 = vld [vmem:[#allocation69_spill] sm:$0xff]  ;;  %v6490_v63 = vld [vmem:[#allocation70_spill] sm:$0xff] }
 0x256   :  { %1841 = vmatprep.subr.bf16.mxu0 %v6480_v1  ;;  %1882 = vmatprep.subr.bf16.mxu1 %v6481_v2  ;;  %v6491_v1 = vld [vmem:[#allocation71_spill] sm:$0xff]  ;;  %v6492_v2 = vld [vmem:[#allocation72_spill] sm:$0xff] }
 0x259   :  { %1842 = vmatpush1.bf16.msra.mxu0 %v6482_v3  ;;  %1883 = vmatpush1.bf16.msra.mxu1 %v6483_v8  ;;  %v6493_v3 = vld [vmem:[#allocation73_spill] sm:$0xff]  ;;  %v6494_v8 = vld [vmem:[#allocation74_spill] sm:$0xff] }
 0x25a   :  { %1843 = vmatprep.subr.bf16.mxu0 %v6484_v11  ;;  %1884 = vmatprep.subr.bf16.mxu1 %v6485_v12  ;;  %v6495_v11 = vld [vmem:[#allocation75_spill] sm:$0xff]  ;;  %v6496_v12 = vld [vmem:[#allocation76_spill] sm:$0xff] }
 0x25d   :  { %1844 = vmatpush1.bf16.msra.mxu0 %v6486_v15  ;;  %1885 = vmatpush1.bf16.msra.mxu1 %v6487_v16  ;;  %v6497_v15 = vld [vmem:[#allocation77_spill] sm:$0xff]  ;;  %v6498_v16 = vld [vmem:[#allocation78_spill] sm:$0xff] }
 0x25e   :  { %1845 = vmatprep.subr.bf16.mxu0 %v6488_v13  ;;  %1886 = vmatprep.subr.bf16.mxu1 %v6489_v58  ;;  %v6499_v13 = vld [vmem:[#allocation79_spill] sm:$0xff]  ;;  %v6500_v58 = vld [vmem:[#allocation80_spill] sm:$0xff] }
 0x261   :  { %1846 = vmatpush1.bf16.msra.mxu0 %v6490_v63  ;;  %1887 = vmatpush1.bf16.msra.mxu1 %v6491_v1  ;;  %v6501_v63 = vld [vmem:[#allocation81_spill] sm:$0xff] }
 0x262   :  { %1847 = vmatprep.subr.bf16.mxu0 %v6492_v2  ;;  %1888 = vmatprep.subr.bf16.mxu1 %v6493_v3 }
 0x265   :  { %1848 = vmatpush1.bf16.msra.mxu0 %v6494_v8  ;;  %1889 = vmatpush1.bf16.msra.mxu1 %v6495_v11 }
 0x266   :  { %1849 = vmatprep.subr.bf16.mxu0 %v6496_v12  ;;  %1890 = vmatprep.subr.bf16.mxu1 %v6497_v15 }
 0x269   :  { %1850 = vmatpush1.bf16.msra.mxu0 %v6498_v16  ;;  %1891 = vmatpush1.bf16.msra.mxu1 %v6499_v13 }
 0x26a   :  { %1901 = vmatprep.subr.bf16.mxu0 %v6500_v58  ;;  %1942 = vmatprep.subr.bf16.mxu1 %v6501_v63 }
 0x2bf   :  { %v1641_v1 = vpop.f32.mrb[40].mxu0  ;;  %v1682_v2 = vpop.f32.mrb[40].mxu1 }
 0x2c0   :  { %v1642_v3 = vadd.f32 %v1641_v1, %v6502_v57  ;;  %v1683_v8 = vadd.f32 %v1682_v2, %v6503_v56  ;;  %v1643_v55 = vpop.f32.mrb[41].mxu0  ;;  %v1684_v11 = vpop.f32.mrb[41].mxu1  ;;  %v6506_v1 = vld [vmem:[#allocation172_spill] sm:$0xff] }
 0x2c1   :  { %v1644_v12 = vadd.f32 %v1643_v55, %v6504_v50  ;;  %v1685_v15 = vadd.f32 %v1684_v11, %v6505_v49  ;;  %v1645_v48 = vpop.f32.mrb[42].mxu0  ;;  %v1686_v16 = vpop.f32.mrb[42].mxu1 }
 0x2c2   :  { %v1646_v47 = vpop.f32.mrb[43].mxu0  ;;  %v1687_v13 = vpop.f32.mrb[43].mxu1  ;;  %v1779_v40 = vmul.f32 0.5, %v1683_v8  ;;  %v1771_v37 = vmul.f32 0.5, %v1642_v3  ;;  %v6508_v48 = vld [vmem:[#allocation173_spill] sm:$0xff] }
 0x2c3   :  { %v1780_v58 = vmul.f32 0.5, %v1685_v15  ;;  %v1772_v63 = vmul.f32 0.5, %v1644_v12  ;;  %v6509_v47 = vld [vmem:[#allocation175_spill] sm:$0xff] }
 0x2c4   :  { %3692 = vtanh.f32 %v1779_v40 }
 0x2c5   :  { %3694 = vtanh.f32 %v1780_v58 }
 0x2c6   :  { %3696 = vtanh.f32 %v1771_v37 }
 0x2c7   :  { %3698 = vtanh.f32 %v1772_v63 }
 0x2ce   :  { %v3693_v3 = vpop.eup %3692 }
 0x2cf   :  { %v3695_v37 = vpop.eup %3694  ;;  %v1783_v13 = vmul.f32 0.5, %v3693_v3 }
 0x2d0   :  { %v3697_v63 = vpop.eup %3696 }
 0x2d1   :  { %v3699_v12 = vpop.eup %3698  ;;  %v1785_v52 = vadd.f32 0.5, %v1783_v13 }
 0x2d2   :  { %v1776_v38 = vmul.f32 0.5, %v3699_v12 }
 0x2ff   :  { %v1723_v57 = vpop.f32.mrb[44].mxu0  ;;  %v1764_v56 = vpop.f32.mrb[44].mxu1 }
 0x300   :  { %v1724_v2 = vadd.f32 %v1723_v57, %v6506_v1  ;;  %v1765_v50 = vadd.f32 %v1764_v56, %v6507_v25  ;;  %v1725_v55 = vpop.f32.mrb[45].mxu0  ;;  %v1766_v49 = vpop.f32.mrb[45].mxu1  ;;  %v1784_v1 = vmul.f32 0.5, %v3695_v37  ;;  %v1775_v56 = vmul.f32 0.5, %v3697_v63 }
 0x301   :  { %v1726_v11 = vadd.f32 %v1725_v55, %v6508_v48  ;;  %v1767_v16 = vadd.f32 %v1766_v49, %v6509_v47  ;;  %v1727_v8 = vpop.f32.mrb[46].mxu0  ;;  %v1768_v15 = vpop.f32.mrb[46].mxu1  ;;  %v1778_v47 = vadd.f32 0.5, %v1776_v38 }
 0x302   :  { %3700 = vtanh.f32 %v1724_v2  ;;  %v1728_v40 = vpop.f32.mrb[47].mxu0  ;;  %v1769_v58 = vpop.f32.mrb[47].mxu1  ;;  %v1789_v57 = vmul.f32 0.5, %v1765_v50  ;;  %v1786_v55 = vadd.f32 0.5, %v1784_v1  ;;  %v1777_v49 = vadd.f32 0.5, %v1775_v56  ;;  %v6511_v56 = vld [vmem:[#allocation101_spill] sm:$0xff] }
 0x303   :  { %3702 = vtanh.f32 %v1726_v11  ;;  %v1790_v25 = vmul.f32 0.5, %v1767_v16  ;;  %v1797_v8 = vmul.f32 %v1785_v52, %v4831_v62 }
 0x304   :  { %3704 = vtanh.f32 %v1789_v57  ;;  %v1798_v11 = vmul.f32 %v1786_v55, %v4833_v24  ;;  %v6512_v55 = vld [vmem:[#allocation102_spill] sm:$0xff] }
 0x305   :  { %3706 = vtanh.f32 %v1790_v25  ;;  %v6510_v25 = vld [vmem:[#allocation100_spill] sm:$0xff] }
 0x30c   :  { %v3701_v48 = vpop.eup %3700 }
 0x30d   :  { %v3703_v2 = vpop.eup %3702  ;;  %v1799_v15 = vmul.f32 %v3701_v48, %v1777_v49  ;;  %v6513_v49 = vld [vmem:[#allocation103_spill] sm:$0xff]  ;;  %v6514_v48 = vld [vmem:[#allocation104_spill] sm:$0xff] }
 0x30e   :  { %v1800_v40 = vmul.f32 %v3703_v2, %v1778_v47  ;;  %v3705_v16 = vpop.eup %3704  ;;  %v6515_v47 = vld [vmem:[#allocation105_spill] sm:$0xff]  ;;  %v6516_v2 = vld [vmem:[#allocation106_spill] sm:$0xff] }
 0x30f   :  { %v4989_v3 = vadd.f32 %v1799_v15, %v1797_v8  ;;  %v3707_v58 = vpop.eup %3706  ;;  %v1793_v37 = vmul.f32 0.5, %v3705_v16  ;;  %v6517_v8 = vld [vmem:[#allocation107_spill] sm:$0xff]  ;;  %v6518_v15 = vld [vmem:[#allocation108_spill] sm:$0xff] }
 0x310   :  { %v4991_v50 = vadd.f32 %v1800_v40, %v1798_v11  ;;  %v1794_v63 = vmul.f32 0.5, %v3707_v58  ;;  %v6519_v11 = vld [vmem:[#allocation109_spill] sm:$0xff]  ;;  %v6520_v40 = vld [vmem:[#allocation110_spill] sm:$0xff]  ;;  %v6521_v16 = vld [vmem:[#allocation111_spill] sm:$0xff] }
 0x311   :  { %3708 = vtanh.f32 %v4989_v3  ;;  %v1795_v38 = vadd.f32 0.5, %v1793_v37  ;;  %v6522_v58 = vld [vmem:[#allocation112_spill] sm:$0xff]  ;;  %v6523_v37 = vld [vmem:[#allocation113_spill] sm:$0xff] }
 0x312   :  { %3710 = vtanh.f32 %v4991_v50  ;;  %v1796_v13 = vadd.f32 0.5, %v1794_v63  ;;  %v6524_v63 = vld [vmem:[#allocation114_spill] sm:$0xff] }
 0x31b   :  { %v3709_v12 = vpop.eup %3708 }
 0x31c   :  { %v3711_v52 = vpop.eup %3710  ;;  %v4995_v62 = vmul.f32 %v3709_v12, %v1795_v38  ;;  %v6525_v38 = vld [vmem:[#allocation115_spill] sm:$0xff]  ;;  %v6526_v12 = vld [vmem:[#allocation116_spill] sm:$0xff] }
 0x31d   :  { %v4997_v24 = vmul.f32 %v3711_v52, %v1796_v13  ;;  %v6527_v13 = vld [vmem:[#allocation117_spill] sm:$0xff]  ;;  %v6528_v52 = vld [vmem:[#allocation118_spill] sm:$0xff] }
 0x31e   :  { %v5003_v1 = vpack.c.bf16 %v4995_v62, %v4995_v62 }
 0x31f   :  { %v1818_v57 = vpack.c.bf16 %v4997_v24, %v4997_v24 }
 0x321   :  { %1851 = vmatprep.mubr.bf16.mxu0 %v1818_v57  ;;  %1892 = vmatprep.mubr.bf16.mxu1 %v1818_v57 }
 0x322   :  { %1852 = vmatmul.mubr.bf16.vlgmr.msra.gmra.mrb[48].mxu0 %v5003_v1  ;;  %1893 = vmatmul.mubr.bf16.vlgmr.msra.gmra.mrb[48].mxu1 %v5003_v1 }
 0x323   :  { %1902 = vmatpush1.bf16.msra.mxu0 %v6406_v42  ;;  %1943 = vmatpush1.bf16.msra.mxu1 %v6407_v10 }
 0x324   :  { %1933 = vmatprep.mubr.bf16.mxu0 %v1818_v57  ;;  %1974 = vmatprep.mubr.bf16.mxu1 %v1818_v57  ;;  %v6529_v57 = vld [vmem:[#allocation122_spill] sm:$0xff] }
 0x325   :  { %1903 = vmatprep.subr.bf16.mxu0 %v6408_v53  ;;  %1944 = vmatprep.subr.bf16.mxu1 %v6409_v28 }
 0x327   :  { %1904 = vmatpush1.bf16.msra.mxu0 %v6410_v45  ;;  %1945 = vmatpush1.bf16.msra.mxu1 %v6411_v6 }
 0x328   :  { %1905 = vmatprep.subr.bf16.mxu0 %v6412_v27  ;;  %1946 = vmatprep.subr.bf16.mxu1 %v6413_v46 }
 0x32b   :  { %1906 = vmatpush1.bf16.msra.mxu0 %v6414_v39  ;;  %1947 = vmatpush1.bf16.msra.mxu1 %v6415_v31 }
 0x32c   :  { %1907 = vmatprep.subr.bf16.mxu0 %v6416_v7  ;;  %1948 = vmatprep.subr.bf16.mxu1 %v6417_v17 }
 0x32f   :  { %1908 = vmatpush1.bf16.msra.mxu0 %v6418_v61  ;;  %1949 = vmatpush1.bf16.msra.mxu1 %v6419_v51 }
 0x330   :  { %1909 = vmatprep.subr.bf16.mxu0 %v6420_v59  ;;  %1950 = vmatprep.subr.bf16.mxu1 %v6421_v60 }
 0x333   :  { %1910 = vmatpush1.bf16.msra.mxu0 %v6422_v18  ;;  %1951 = vmatpush1.bf16.msra.mxu1 %v6423_v23 }
 0x334   :  { %1911 = vmatprep.subr.bf16.mxu0 %v6510_v25  ;;  %1952 = vmatprep.subr.bf16.mxu1 %v6511_v56 }
 0x337   :  { %1912 = vmatpush1.bf16.msra.mxu0 %v6512_v55  ;;  %1953 = vmatpush1.bf16.msra.mxu1 %v6513_v49 }
 0x338   :  { %1913 = vmatprep.subr.bf16.mxu0 %v6514_v48  ;;  %1954 = vmatprep.subr.bf16.mxu1 %v6515_v47 }
 0x33b   :  { %1914 = vmatpush1.bf16.msra.mxu0 %v6516_v2  ;;  %1955 = vmatpush1.bf16.msra.mxu1 %v6517_v8 }
 0x33c   :  { %1915 = vmatprep.subr.bf16.mxu0 %v6518_v15  ;;  %1956 = vmatprep.subr.bf16.mxu1 %v6519_v11 }
 0x33f   :  { %1916 = vmatpush1.bf16.msra.mxu0 %v6520_v40  ;;  %1957 = vmatpush1.bf16.msra.mxu1 %v6521_v16 }
 0x340   :  { %1917 = vmatprep.subr.bf16.mxu0 %v6522_v58  ;;  %1958 = vmatprep.subr.bf16.mxu1 %v6523_v37 }
 0x343   :  { %1918 = vmatpush1.bf16.msra.mxu0 %v6524_v63  ;;  %1959 = vmatpush1.bf16.msra.mxu1 %v6525_v38 }
 0x344   :  { %1919 = vmatprep.subr.bf16.mxu0 %v6526_v12  ;;  %1960 = vmatprep.subr.bf16.mxu1 %v6527_v13 }
 0x347   :  { %1920 = vmatpush1.bf16.msra.mxu0 %v6528_v52  ;;  %1961 = vmatpush1.bf16.msra.mxu1 %v6443_v22 }
 0x348   :  { %1921 = vmatprep.subr.bf16.mxu0 %v6444_v35  ;;  %1962 = vmatprep.subr.bf16.mxu1 %v6445_v36  ;;  %v6604_v36 = vld [vmem:[#allocation178_spill] sm:$0xff] }
 0x34b   :  { %1922 = vmatpush1.bf16.msra.mxu0 %v6529_v57  ;;  %1963 = vmatpush1.bf16.msra.mxu1 %v6447_v9 }
 0x34c   :  { %1923 = vmatprep.subr.bf16.mxu0 %v6448_v20  ;;  %1964 = vmatprep.subr.bf16.mxu1 %v6449_v41 }
 0x34f   :  { %1924 = vmatpush1.bf16.msra.mxu0 %v6450_v44  ;;  %1965 = vmatpush1.bf16.msra.mxu1 %v6451_v19  ;;  %v6601_v19 = vld [vmem:[#allocation149_spill] sm:$0xff]  ;;  %v6602_v44 = vld [vmem:[#allocation152_spill] sm:$0xff] }
 0x350   :  { %1925 = vmatprep.subr.bf16.mxu0 %v6452_v14  ;;  %1966 = vmatprep.subr.bf16.mxu1 %v6453_v43  ;;  %v6600_v43 = vld [vmem:[#allocation150_spill] sm:$0xff] }
 0x353   :  { %1926 = vmatpush1.bf16.msra.mxu0 %v4482_v30  ;;  %1967 = vmatpush1.bf16.msra.mxu1 %v4486_v33  ;;  %v6530_v30 = vld [vmem:[#allocation141_spill] sm:$0xff]  ;;  %v6531_v33 = vld [vmem:[#allocation142_spill] sm:$0xff] }
 0x354   :  { %1927 = vmatprep.subr.bf16.mxu0 %v4488_v34  ;;  %1968 = vmatprep.subr.bf16.mxu1 %v6454_v32  ;;  %v6532_v34 = vld [vmem:[#allocation143_spill] sm:$0xff]  ;;  %v6533_v32 = vld [vmem:[#allocation16_spill] sm:$0xff] }
 0x357   :  { %1928 = vmatpush1.bf16.msra.mxu0 %v4494_v54  ;;  %1969 = vmatpush1.bf16.msra.mxu1 %v4498_v5  ;;  %v6534_v54 = vld [vmem:[#allocation17_spill] sm:$0xff]  ;;  %v6599_v5 = vld [vmem:[#allocation148_spill] sm:$0xff] }
 0x358   :  { %1929 = vmatprep.subr.bf16.mxu0 %v4500_v4  ;;  %1970 = vmatprep.subr.bf16.mxu1 %v4503_v0  ;;  %v6535_v0 = vld [vmem:[#allocation18_spill] sm:$0xff]  ;;  %v6544_v4 = vld [vmem:[#allocation27_spill] sm:$0xff] }
 0x35b   :  { %1930 = vmatpush1.bf16.msra.mxu0 %v4506_v26  ;;  %1971 = vmatpush1.bf16.msra.mxu1 %v4510_v21  ;;  %v6536_v26 = vld [vmem:[#allocation19_spill] sm:$0xff]  ;;  %v6537_v21 = vld [vmem:[#allocation20_spill] sm:$0xff] }
 0x35c   :  { %1931 = vmatprep.subr.bf16.mxu0 %v4512_v29  ;;  %1972 = vmatprep.subr.bf16.mxu1 %v6530_v30  ;;  %v6538_v29 = vld [vmem:[#allocation21_spill] sm:$0xff]  ;;  %v6539_v30 = vld [vmem:[#allocation22_spill] sm:$0xff] }
 0x35f   :  { %1932 = vmatpush1.bf16.msra.mxu0 %v6531_v33  ;;  %1973 = vmatpush1.bf16.msra.mxu1 %v6532_v34  ;;  %v6540_v33 = vld [vmem:[#allocation23_spill] sm:$0xff]  ;;  %v6541_v34 = vld [vmem:[#allocation24_spill] sm:$0xff] }
 0x360   :  { %2031 = vmatprep.subr.bf16.mxu0 %v6533_v32  ;;  %2072 = vmatprep.subr.bf16.mxu1 %v6534_v54  ;;  %v6542_v32 = vld [vmem:[#allocation25_spill] sm:$0xff]  ;;  %v6543_v54 = vld [vmem:[#allocation26_spill] sm:$0xff] }
 0x362   :  { %1934 = vmatmul.mubr.bf16.vlgmr.msra.gmra.mrb[52].mxu0 %v5003_v1  ;;  %1975 = vmatmul.mubr.bf16.vlgmr.msra.gmra.mrb[52].mxu1 %v5003_v1  ;;  %v6545_v1 = vld [vmem:[#allocation28_spill] sm:$0xff] }
 0x363   :  { %2032 = vmatpush1.bf16.msra.mxu0 %v6535_v0  ;;  %2073 = vmatpush1.bf16.msra.mxu1 %v6536_v26  ;;  %v6546_v0 = vld [vmem:[#allocation29_spill] sm:$0xff]  ;;  %v6547_v26 = vld [vmem:[#allocation30_spill] sm:$0xff] }
 0x364   :  { %2033 = vmatprep.subr.bf16.mxu0 %v6537_v21  ;;  %2074 = vmatprep.subr.bf16.mxu1 %v6538_v29  ;;  %v6548_v21 = vld [vmem:[#allocation31_spill] sm:$0xff]  ;;  %v6549_v29 = vld [vmem:[#allocation32_spill] sm:$0xff] }
 0x367   :  { %2034 = vmatpush1.bf16.msra.mxu0 %v6539_v30  ;;  %2075 = vmatpush1.bf16.msra.mxu1 %v6540_v33  ;;  %v6550_v30 = vld [vmem:[#allocation33_spill] sm:$0xff]  ;;  %v6551_v33 = vld [vmem:[#allocation34_spill] sm:$0xff] }
 0x368   :  { %2035 = vmatprep.subr.bf16.mxu0 %v6541_v34  ;;  %2076 = vmatprep.subr.bf16.mxu1 %v6542_v32  ;;  %v6552_v34 = vld [vmem:[#allocation35_spill] sm:$0xff]  ;;  %v6553_v32 = vld [vmem:[#allocation36_spill] sm:$0xff] }
 0x36b   :  { %2036 = vmatpush1.bf16.msra.mxu0 %v6543_v54  ;;  %2077 = vmatpush1.bf16.msra.mxu1 %v6544_v4  ;;  %v6554_v54 = vld [vmem:[#allocation37_spill] sm:$0xff]  ;;  %v6555_v4 = vld [vmem:[#allocation38_spill] sm:$0xff] }
 0x36c   :  { %2037 = vmatprep.subr.bf16.mxu0 %v6545_v1  ;;  %2078 = vmatprep.subr.bf16.mxu1 %v6546_v0  ;;  %v6556_v1 = vld [vmem:[#allocation39_spill] sm:$0xff]  ;;  %v6557_v0 = vld [vmem:[#allocation40_spill] sm:$0xff] }
 0x36f   :  { %2038 = vmatpush1.bf16.msra.mxu0 %v6547_v26  ;;  %2079 = vmatpush1.bf16.msra.mxu1 %v6548_v21  ;;  %v6558_v26 = vld [vmem:[#allocation41_spill] sm:$0xff]  ;;  %v6559_v21 = vld [vmem:[#allocation42_spill] sm:$0xff] }
 0x370   :  { %2039 = vmatprep.subr.bf16.mxu0 %v6549_v29  ;;  %2080 = vmatprep.subr.bf16.mxu1 %v6550_v30  ;;  %v6560_v29 = vld [vmem:[#allocation43_spill] sm:$0xff]  ;;  %v6561_v30 = vld [vmem:[#allocation44_spill] sm:$0xff] }
 0x373   :  { %2040 = vmatpush1.bf16.msra.mxu0 %v6551_v33  ;;  %2081 = vmatpush1.bf16.msra.mxu1 %v6552_v34  ;;  %v6562_v33 = vld [vmem:[#allocation45_spill] sm:$0xff]  ;;  %v6563_v34 = vld [vmem:[#allocation46_spill] sm:$0xff] }
 0x374   :  { %2041 = vmatprep.subr.bf16.mxu0 %v6553_v32  ;;  %2082 = vmatprep.subr.bf16.mxu1 %v6554_v54  ;;  %v6564_v32 = vld [vmem:[#allocation47_spill] sm:$0xff]  ;;  %v6565_v54 = vld [vmem:[#allocation48_spill] sm:$0xff] }
 0x377   :  { %2042 = vmatpush1.bf16.msra.mxu0 %v6555_v4  ;;  %2083 = vmatpush1.bf16.msra.mxu1 %v6556_v1  ;;  %v6566_v4 = vld [vmem:[#allocation49_spill] sm:$0xff]  ;;  %v6567_v1 = vld [vmem:[#allocation50_spill] sm:$0xff] }
 0x378   :  { %2043 = vmatprep.subr.bf16.mxu0 %v6557_v0  ;;  %2084 = vmatprep.subr.bf16.mxu1 %v6558_v26  ;;  %v6568_v0 = vld [vmem:[#allocation51_spill] sm:$0xff]  ;;  %v6569_v26 = vld [vmem:[#allocation52_spill] sm:$0xff] }
 0x37b   :  { %2044 = vmatpush1.bf16.msra.mxu0 %v6559_v21  ;;  %2085 = vmatpush1.bf16.msra.mxu1 %v6560_v29  ;;  %v6570_v21 = vld [vmem:[#allocation53_spill] sm:$0xff]  ;;  %v6571_v29 = vld [vmem:[#allocation54_spill] sm:$0xff] }
 0x37c   :  { %2045 = vmatprep.subr.bf16.mxu0 %v6561_v30  ;;  %2086 = vmatprep.subr.bf16.mxu1 %v6562_v33  ;;  %v6572_v30 = vld [vmem:[#allocation55_spill] sm:$0xff]  ;;  %v6573_v33 = vld [vmem:[#allocation56_spill] sm:$0xff] }
 0x37f   :  { %2046 = vmatpush1.bf16.msra.mxu0 %v6563_v34  ;;  %2087 = vmatpush1.bf16.msra.mxu1 %v6564_v32  ;;  %v6574_v34 = vld [vmem:[#allocation57_spill] sm:$0xff]  ;;  %v6575_v32 = vld [vmem:[#allocation58_spill] sm:$0xff] }
 0x380   :  { %2047 = vmatprep.subr.bf16.mxu0 %v6565_v54  ;;  %2088 = vmatprep.subr.bf16.mxu1 %v6566_v4  ;;  %v6576_v54 = vld [vmem:[#allocation59_spill] sm:$0xff]  ;;  %v6577_v4 = vld [vmem:[#allocation60_spill] sm:$0xff] }
 0x383   :  { %2048 = vmatpush1.bf16.msra.mxu0 %v6567_v1  ;;  %2089 = vmatpush1.bf16.msra.mxu1 %v6568_v0  ;;  %v6578_v1 = vld [vmem:[#allocation61_spill] sm:$0xff]  ;;  %v6579_v0 = vld [vmem:[#allocation62_spill] sm:$0xff] }
 0x384   :  { %2049 = vmatprep.subr.bf16.mxu0 %v6569_v26  ;;  %2090 = vmatprep.subr.bf16.mxu1 %v6570_v21  ;;  %v6580_v26 = vld [vmem:[#allocation63_spill] sm:$0xff]  ;;  %v6581_v21 = vld [vmem:[#allocation64_spill] sm:$0xff] }
 0x387   :  { %2050 = vmatpush1.bf16.msra.mxu0 %v6571_v29  ;;  %2091 = vmatpush1.bf16.msra.mxu1 %v6572_v30  ;;  %v6582_v29 = vld [vmem:[#allocation65_spill] sm:$0xff]  ;;  %v6583_v30 = vld [vmem:[#allocation66_spill] sm:$0xff] }
 0x388   :  { %2051 = vmatprep.subr.bf16.mxu0 %v6573_v33  ;;  %2092 = vmatprep.subr.bf16.mxu1 %v6574_v34  ;;  %v6584_v33 = vld [vmem:[#allocation67_spill] sm:$0xff]  ;;  %v6585_v34 = vld [vmem:[#allocation68_spill] sm:$0xff] }
 0x38b   :  { %2052 = vmatpush1.bf16.msra.mxu0 %v6575_v32  ;;  %2093 = vmatpush1.bf16.msra.mxu1 %v6576_v54  ;;  %v6586_v32 = vld [vmem:[#allocation69_spill] sm:$0xff]  ;;  %v6587_v54 = vld [vmem:[#allocation70_spill] sm:$0xff] }
 0x38c   :  { %2053 = vmatprep.subr.bf16.mxu0 %v6577_v4  ;;  %2094 = vmatprep.subr.bf16.mxu1 %v6578_v1  ;;  %v6588_v4 = vld [vmem:[#allocation71_spill] sm:$0xff]  ;;  %v6589_v1 = vld [vmem:[#allocation72_spill] sm:$0xff] }
 0x38f   :  { %2054 = vmatpush1.bf16.msra.mxu0 %v6579_v0  ;;  %2095 = vmatpush1.bf16.msra.mxu1 %v6580_v26  ;;  %v6590_v0 = vld [vmem:[#allocation73_spill] sm:$0xff]  ;;  %v6591_v26 = vld [vmem:[#allocation74_spill] sm:$0xff] }
 0x390   :  { %2055 = vmatprep.subr.bf16.mxu0 %v6581_v21  ;;  %2096 = vmatprep.subr.bf16.mxu1 %v6582_v29  ;;  %v6592_v21 = vld [vmem:[#allocation75_spill] sm:$0xff]  ;;  %v6593_v29 = vld [vmem:[#allocation76_spill] sm:$0xff] }
 0x393   :  { %2056 = vmatpush1.bf16.msra.mxu0 %v6583_v30  ;;  %2097 = vmatpush1.bf16.msra.mxu1 %v6584_v33  ;;  %v6594_v30 = vld [vmem:[#allocation77_spill] sm:$0xff]  ;;  %v6595_v33 = vld [vmem:[#allocation78_spill] sm:$0xff] }
 0x394   :  { %2057 = vmatprep.subr.bf16.mxu0 %v6585_v34  ;;  %2098 = vmatprep.subr.bf16.mxu1 %v6586_v32  ;;  %v6596_v34 = vld [vmem:[#allocation79_spill] sm:$0xff]  ;;  %v6597_v32 = vld [vmem:[#allocation80_spill] sm:$0xff] }
 0x397   :  { %2058 = vmatpush1.bf16.msra.mxu0 %v6587_v54  ;;  %2099 = vmatpush1.bf16.msra.mxu1 %v6588_v4  ;;  %v6598_v54 = vld [vmem:[#allocation81_spill] sm:$0xff] }
 0x398   :  { %2059 = vmatprep.subr.bf16.mxu0 %v6589_v1  ;;  %2100 = vmatprep.subr.bf16.mxu1 %v6590_v0 }
 0x39b   :  { %2060 = vmatpush1.bf16.msra.mxu0 %v6591_v26  ;;  %2101 = vmatpush1.bf16.msra.mxu1 %v6592_v21 }
 0x39c   :  { %2061 = vmatprep.subr.bf16.mxu0 %v6593_v29  ;;  %2102 = vmatprep.subr.bf16.mxu1 %v6594_v30 }
 0x39f   :  { %2062 = vmatpush1.bf16.msra.mxu0 %v6595_v33  ;;  %2103 = vmatpush1.bf16.msra.mxu1 %v6596_v34 }
 0x3a0   :  { %2113 = vmatprep.subr.bf16.mxu0 %v6597_v32  ;;  %2154 = vmatprep.subr.bf16.mxu1 %v6598_v54 }
 0x3f5   :  { %v1853_v4 = vpop.f32.mrb[48].mxu0  ;;  %v1894_v1 = vpop.f32.mrb[48].mxu1 }
 0x3f6   :  { %v1854_v0 = vadd.f32 %v1853_v4, %v6599_v5  ;;  %v1895_v26 = vadd.f32 %v1894_v1, %v6600_v43  ;;  %v1855_v14 = vpop.f32.mrb[49].mxu0  ;;  %v1896_v21 = vpop.f32.mrb[49].mxu1  ;;  %v6603_v43 = vld [vmem:[#allocation176_spill] sm:$0xff] }
 0x3f7   :  { %v1856_v29 = vadd.f32 %v1855_v14, %v6601_v19  ;;  %v1897_v30 = vadd.f32 %v1896_v21, %v6602_v44  ;;  %v1857_v41 = vpop.f32.mrb[50].mxu0  ;;  %v1898_v33 = vpop.f32.mrb[50].mxu1 }
 0x3f8   :  { %v1858_v20 = vpop.f32.mrb[51].mxu0  ;;  %v1899_v34 = vpop.f32.mrb[51].mxu1  ;;  %v1991_v9 = vmul.f32 0.5, %v1895_v26  ;;  %v1983_v57 = vmul.f32 0.5, %v1854_v0  ;;  %v6605_v41 = vld [vmem:[#allocation177_spill] sm:$0xff] }
 0x3f9   :  { %v1992_v32 = vmul.f32 0.5, %v1897_v30  ;;  %v1984_v54 = vmul.f32 0.5, %v1856_v29  ;;  %v6606_v20 = vld [vmem:[#allocation180_spill] sm:$0xff] }
 0x3fa   :  { %3712 = vtanh.f32 %v1991_v9 }
 0x3fb   :  { %3714 = vtanh.f32 %v1992_v32 }
 0x3fc   :  { %3716 = vtanh.f32 %v1983_v57 }
 0x3fd   :  { %3718 = vtanh.f32 %v1984_v54 }
 0x404   :  { %v3713_v0 = vpop.eup %3712 }
 0x405   :  { %v3715_v9 = vpop.eup %3714  ;;  %v1995_v57 = vmul.f32 0.5, %v3713_v0 }
 0x406   :  { %v3717_v54 = vpop.eup %3716 }
 0x407   :  { %v3719_v44 = vpop.eup %3718  ;;  %v1997_v22 = vadd.f32 0.5, %v1995_v57 }
 0x408   :  { %v1988_v35 = vmul.f32 0.5, %v3719_v44 }
 0x435   :  { %v1935_v5 = vpop.f32.mrb[52].mxu0  ;;  %v1976_v4 = vpop.f32.mrb[52].mxu1 }
 0x436   :  { %v1936_v1 = vadd.f32 %v1935_v5, %v6603_v43  ;;  %v1977_v19 = vadd.f32 %v1976_v4, %v6604_v36  ;;  %v1937_v14 = vpop.f32.mrb[53].mxu0  ;;  %v1978_v21 = vpop.f32.mrb[53].mxu1  ;;  %v1996_v43 = vmul.f32 0.5, %v3715_v9  ;;  %v1987_v4 = vmul.f32 0.5, %v3717_v54 }
 0x437   :  { %v1938_v33 = vadd.f32 %v1937_v14, %v6605_v41  ;;  %v1979_v34 = vadd.f32 %v1978_v21, %v6606_v20  ;;  %v1939_v26 = vpop.f32.mrb[54].mxu0  ;;  %v1980_v30 = vpop.f32.mrb[54].mxu1  ;;  %v1990_v20 = vadd.f32 0.5, %v1988_v35 }
 0x438   :  { %3720 = vtanh.f32 %v1936_v1  ;;  %v1940_v29 = vpop.f32.mrb[55].mxu0  ;;  %v1981_v32 = vpop.f32.mrb[55].mxu1  ;;  %v2001_v5 = vmul.f32 0.5, %v1977_v19  ;;  %v1998_v14 = vadd.f32 0.5, %v1996_v43  ;;  %v1989_v21 = vadd.f32 0.5, %v1987_v4  ;;  %v6608_v43 = vld [vmem:[#allocation201_spill] sm:$0xff] }
 0x439   :  { %3722 = vtanh.f32 %v1938_v33  ;;  %v2002_v36 = vmul.f32 0.5, %v1979_v34  ;;  %v2009_v26 = vmul.f32 %v1997_v22, %v4989_v3  ;;  %v6607_v3 = vld [vmem:[#allocation200_spill] sm:$0xff] }
 0x43a   :  { %3724 = vtanh.f32 %v2001_v5  ;;  %v2010_v33 = vmul.f32 %v1998_v14, %v4991_v50  ;;  %v1807_v50 = vadd.f32 %v4995_v62, %v6607_v3  ;;  %v6609_v62 = vld [vmem:[#allocation119_spill] sm:$0xff]  ;;  %v6624_v3 = vld [vmem:[#allocation134_spill] sm:$0xff] }
 0x43b   :  { %3726 = vtanh.f32 %v2002_v36  ;;  %v1808_v36 = vadd.f32 %v4997_v24, %v6608_v43  ;;  %v6610_v24 = vld [vmem:[#allocation120_spill] sm:$0xff]  ;;  %v6627_v43 = vld [vmem:[#allocation137_spill] sm:$0xff] }
 0x442   :  { %v3721_v41 = vpop.eup %3720 }
 0x443   :  { %v3723_v1 = vpop.eup %3722  ;;  %v2011_v30 = vmul.f32 %v3721_v41, %v1989_v21 }
 0x444   :  { %v2012_v29 = vmul.f32 %v3723_v1, %v1990_v20  ;;  %v3725_v34 = vpop.eup %3724  ;;  %v6611_v1 = vld [vmem:[#allocation121_spill] sm:$0xff] }
 0x445   :  { %v5147_v0 = vadd.f32 %v2011_v30, %v2009_v26  ;;  %v3727_v32 = vpop.eup %3726  ;;  %v2005_v9 = vmul.f32 0.5, %v3725_v34  ;;  %v6612_v26 = vld [vmem:[#allocation122_spill] sm:$0xff]  ;;  %v6613_v30 = vld [vmem:[#allocation123_spill] sm:$0xff] }
 0x446   :  { %v5149_v19 = vadd.f32 %v2012_v29, %v2010_v33  ;;  %v2006_v54 = vmul.f32 0.5, %v3727_v32  ;;  %v6614_v33 = vld [vmem:[#allocation124_spill] sm:$0xff]  ;;  %v6615_v29 = vld [vmem:[#allocation125_spill] sm:$0xff]  ;;  %v6616_v34 = vld [vmem:[#allocation126_spill] sm:$0xff] }
 0x447   :  { %3728 = vtanh.f32 %v5147_v0  ;;  %v2007_v35 = vadd.f32 0.5, %v2005_v9  ;;  %v6617_v32 = vld [vmem:[#allocation127_spill] sm:$0xff]  ;;  %v6618_v9 = vld [vmem:[#allocation128_spill] sm:$0xff] }
 0x448   :  { %3730 = vtanh.f32 %v5149_v19  ;;  %v2008_v57 = vadd.f32 0.5, %v2006_v54  ;;  %v6619_v54 = vld [vmem:[#allocation129_spill] sm:$0xff] }
 0x451   :  { %v3729_v44 = vpop.eup %3728 }
 0x452   :  { %v3731_v22 = vpop.eup %3730  ;;  %v2017_v5 = vmul.f32 %v3729_v44, %v2007_v35  ;;  %v6620_v35 = vld [vmem:[#allocation130_spill] sm:$0xff]  ;;  %v6621_v44 = vld [vmem:[#allocation131_spill] sm:$0xff] }
 0x453   :  { %v2018_v4 = vmul.f32 %v3731_v22, %v2008_v57  ;;  %v6622_v57 = vld [vmem:[#allocation132_spill] sm:$0xff]  ;;  %v6623_v22 = vld [vmem:[#allocation133_spill] sm:$0xff] }
 0x454   :  { %v5157_v14 = vadd.f32 %v2017_v5, %v1807_v50  ;;  %v5161_v20 = vpack.c.bf16 %v2017_v5, %v2017_v5  ;;  %v6625_v50 = vld [vmem:[#allocation135_spill] sm:$0xff]  ;;  %v6626_v5 = vld [vmem:[#allocation136_spill] sm:$0xff] }
 0x455   :  { %v5159_v21 = vadd.f32 %v2018_v4, %v1808_v36  ;;  %v2030_v41 = vpack.c.bf16 %v2018_v4, %v2018_v4  ;;  %v6628_v36 = vld [vmem:[#allocation138_spill] sm:$0xff]  ;;  %v6629_v4 = vld [vmem:[#allocation139_spill] sm:$0xff] }
 0x457   :  { %2063 = vmatprep.mubr.bf16.mxu0 %v2030_v41  ;;  %2104 = vmatprep.mubr.bf16.mxu1 %v2030_v41 }
 0x458   :  { %2064 = vmatmul.mubr.bf16.vlgmr.msra.gmra.mrb[56].mxu0 %v5161_v20  ;;  %2105 = vmatmul.mubr.bf16.vlgmr.msra.gmra.mrb[56].mxu1 %v5161_v20 }
 0x459   :  { %2114 = vmatpush1.bf16.msra.mxu0 %v6406_v42  ;;  %2155 = vmatpush1.bf16.msra.mxu1 %v6407_v10 }
 0x45a   :  { %2145 = vmatprep.mubr.bf16.mxu0 %v2030_v41  ;;  %2186 = vmatprep.mubr.bf16.mxu1 %v2030_v41  ;;  %v6630_v41 = vld [vmem:[#allocation140_spill] sm:$0xff] }
 0x45b   :  { %2115 = vmatprep.subr.bf16.mxu0 %v6408_v53  ;;  %2156 = vmatprep.subr.bf16.mxu1 %v6409_v28 }
 0x45d   :  { %2116 = vmatpush1.bf16.msra.mxu0 %v6410_v45  ;;  %2157 = vmatpush1.bf16.msra.mxu1 %v6411_v6 }
 0x45e   :  { %2117 = vmatprep.subr.bf16.mxu0 %v6412_v27  ;;  %2158 = vmatprep.subr.bf16.mxu1 %v6413_v46 }
 0x461   :  { %2118 = vmatpush1.bf16.msra.mxu0 %v6414_v39  ;;  %2159 = vmatpush1.bf16.msra.mxu1 %v6415_v31 }
 0x462   :  { %2119 = vmatprep.subr.bf16.mxu0 %v6416_v7  ;;  %2160 = vmatprep.subr.bf16.mxu1 %v6417_v17 }
 0x465   :  { %2120 = vmatpush1.bf16.msra.mxu0 %v6418_v61  ;;  %2161 = vmatpush1.bf16.msra.mxu1 %v6419_v51 }
 0x466   :  { %2121 = vmatprep.subr.bf16.mxu0 %v6420_v59  ;;  %2162 = vmatprep.subr.bf16.mxu1 %v6421_v60 }
 0x469   :  { %2122 = vmatpush1.bf16.msra.mxu0 %v6422_v18  ;;  %2163 = vmatpush1.bf16.msra.mxu1 %v6423_v23 }
 0x46a   :  { %2123 = vmatprep.subr.bf16.mxu0 %v6510_v25  ;;  %2164 = vmatprep.subr.bf16.mxu1 %v6511_v56 }
 0x46d   :  { %2124 = vmatpush1.bf16.msra.mxu0 %v6512_v55  ;;  %2165 = vmatpush1.bf16.msra.mxu1 %v6513_v49 }
 0x46e   :  { %2125 = vmatprep.subr.bf16.mxu0 %v6514_v48  ;;  %2166 = vmatprep.subr.bf16.mxu1 %v6515_v47 }
 0x471   :  { %2126 = vmatpush1.bf16.msra.mxu0 %v6516_v2  ;;  %2167 = vmatpush1.bf16.msra.mxu1 %v6517_v8 }
 0x472   :  { %2127 = vmatprep.subr.bf16.mxu0 %v6518_v15  ;;  %2168 = vmatprep.subr.bf16.mxu1 %v6519_v11 }
 0x475   :  { %2128 = vmatpush1.bf16.msra.mxu0 %v6520_v40  ;;  %2169 = vmatpush1.bf16.msra.mxu1 %v6521_v16 }
 0x476   :  { %2129 = vmatprep.subr.bf16.mxu0 %v6522_v58  ;;  %2170 = vmatprep.subr.bf16.mxu1 %v6523_v37 }
 0x479   :  { %2130 = vmatpush1.bf16.msra.mxu0 %v6524_v63  ;;  %2171 = vmatpush1.bf16.msra.mxu1 %v6525_v38 }
 0x47a   :  { %2131 = vmatprep.subr.bf16.mxu0 %v6526_v12  ;;  %2172 = vmatprep.subr.bf16.mxu1 %v6527_v13 }
 0x47d   :  { %2132 = vmatpush1.bf16.msra.mxu0 %v6528_v52  ;;  %2173 = vmatpush1.bf16.msra.mxu1 %v6609_v62 }
 0x47e   :  { %2133 = vmatprep.subr.bf16.mxu0 %v6610_v24  ;;  %2174 = vmatprep.subr.bf16.mxu1 %v6611_v1  ;;  %v6705_v1 = vld [vmem:[#allocation182_spill] sm:$0xff] }
 0x481   :  { %2134 = vmatpush1.bf16.msra.mxu0 %v6612_v26  ;;  %2175 = vmatpush1.bf16.msra.mxu1 %v6613_v30 }
 0x482   :  { %2135 = vmatprep.subr.bf16.mxu0 %v6614_v33  ;;  %2176 = vmatprep.subr.bf16.mxu1 %v6615_v29 }
 0x485   :  { %2136 = vmatpush1.bf16.msra.mxu0 %v6616_v34  ;;  %2177 = vmatpush1.bf16.msra.mxu1 %v6617_v32  ;;  %v6702_v32 = vld [vmem:[#allocation153_spill] sm:$0xff]  ;;  %v6703_v34 = vld [vmem:[#allocation155_spill] sm:$0xff] }
 0x486   :  { %2137 = vmatprep.subr.bf16.mxu0 %v6618_v9  ;;  %2178 = vmatprep.subr.bf16.mxu1 %v6619_v54  ;;  %v6701_v54 = vld [vmem:[#allocation154_spill] sm:$0xff] }
 0x489   :  { %2138 = vmatpush1.bf16.msra.mxu0 %v6620_v35  ;;  %2179 = vmatpush1.bf16.msra.mxu1 %v6621_v44  ;;  %v6631_v35 = vld [vmem:[#allocation141_spill] sm:$0xff]  ;;  %v6632_v44 = vld [vmem:[#allocation142_spill] sm:$0xff] }
 0x48a   :  { %2139 = vmatprep.subr.bf16.mxu0 %v6622_v57  ;;  %2180 = vmatprep.subr.bf16.mxu1 %v6623_v22  ;;  %v6633_v57 = vld [vmem:[#allocation143_spill] sm:$0xff]  ;;  %v6634_v22 = vld [vmem:[#allocation16_spill] sm:$0xff] }
 0x48d   :  { %2140 = vmatpush1.bf16.msra.mxu0 %v6624_v3  ;;  %2181 = vmatpush1.bf16.msra.mxu1 %v6625_v50  ;;  %v6635_v3 = vld [vmem:[#allocation17_spill] sm:$0xff]  ;;  %v6700_v50 = vld [vmem:[#allocation151_spill] sm:$0xff] }
 0x48e   :  { %2141 = vmatprep.subr.bf16.mxu0 %v6626_v5  ;;  %2182 = vmatprep.subr.bf16.mxu1 %v6627_v43  ;;  %v6636_v43 = vld [vmem:[#allocation18_spill] sm:$0xff]  ;;  %v6645_v5 = vld [vmem:[#allocation27_spill] sm:$0xff] }
 0x491   :  { %2142 = vmatpush1.bf16.msra.mxu0 %v6628_v36  ;;  %2183 = vmatpush1.bf16.msra.mxu1 %v6629_v4  ;;  %v6637_v36 = vld [vmem:[#allocation19_spill] sm:$0xff]  ;;  %v6638_v4 = vld [vmem:[#allocation20_spill] sm:$0xff] }
 0x492   :  { %2143 = vmatprep.subr.bf16.mxu0 %v6630_v41  ;;  %2184 = vmatprep.subr.bf16.mxu1 %v6631_v35  ;;  %v6639_v41 = vld [vmem:[#allocation21_spill] sm:$0xff]  ;;  %v6640_v35 = vld [vmem:[#allocation22_spill] sm:$0xff] }
 0x495   :  { %2144 = vmatpush1.bf16.msra.mxu0 %v6632_v44  ;;  %2185 = vmatpush1.bf16.msra.mxu1 %v6633_v57  ;;  %v6641_v44 = vld [vmem:[#allocation23_spill] sm:$0xff]  ;;  %v6642_v57 = vld [vmem:[#allocation24_spill] sm:$0xff] }
 0x496   :  { %2243 = vmatprep.subr.bf16.mxu0 %v6634_v22  ;;  %2284 = vmatprep.subr.bf16.mxu1 %v6635_v3  ;;  %v6643_v22 = vld [vmem:[#allocation25_spill] sm:$0xff]  ;;  %v6644_v3 = vld [vmem:[#allocation26_spill] sm:$0xff] }
 0x498   :  { %2146 = vmatmul.mubr.bf16.vlgmr.msra.gmra.mrb[60].mxu0 %v5161_v20  ;;  %2187 = vmatmul.mubr.bf16.vlgmr.msra.gmra.mrb[60].mxu1 %v5161_v20  ;;  %v6646_v20 = vld [vmem:[#allocation28_spill] sm:$0xff] }
 0x499   :  { %2244 = vmatpush1.bf16.msra.mxu0 %v6636_v43  ;;  %2285 = vmatpush1.bf16.msra.mxu1 %v6637_v36  ;;  %v6647_v43 = vld [vmem:[#allocation29_spill] sm:$0xff]  ;;  %v6648_v36 = vld [vmem:[#allocation30_spill] sm:$0xff] }
 0x49a   :  { %2245 = vmatprep.subr.bf16.mxu0 %v6638_v4  ;;  %2286 = vmatprep.subr.bf16.mxu1 %v6639_v41  ;;  %v6649_v4 = vld [vmem:[#allocation31_spill] sm:$0xff]  ;;  %v6650_v41 = vld [vmem:[#allocation32_spill] sm:$0xff] }
 0x49d   :  { %2246 = vmatpush1.bf16.msra.mxu0 %v6640_v35  ;;  %2287 = vmatpush1.bf16.msra.mxu1 %v6641_v44  ;;  %v6651_v35 = vld [vmem:[#allocation33_spill] sm:$0xff]  ;;  %v6652_v44 = vld [vmem:[#allocation34_spill] sm:$0xff] }
 0x49e   :  { %2247 = vmatprep.subr.bf16.mxu0 %v6642_v57  ;;  %2288 = vmatprep.subr.bf16.mxu1 %v6643_v22  ;;  %v6653_v57 = vld [vmem:[#allocation35_spill] sm:$0xff]  ;;  %v6654_v22 = vld [vmem:[#allocation36_spill] sm:$0xff] }
 0x4a1   :  { %2248 = vmatpush1.bf16.msra.mxu0 %v6644_v3  ;;  %2289 = vmatpush1.bf16.msra.mxu1 %v6645_v5  ;;  %v6655_v3 = vld [vmem:[#allocation37_spill] sm:$0xff]  ;;  %v6656_v5 = vld [vmem:[#allocation38_spill] sm:$0xff] }
 0x4a2   :  { %2249 = vmatprep.subr.bf16.mxu0 %v6646_v20  ;;  %2290 = vmatprep.subr.bf16.mxu1 %v6647_v43  ;;  %v6657_v20 = vld [vmem:[#allocation39_spill] sm:$0xff]  ;;  %v6658_v43 = vld [vmem:[#allocation40_spill] sm:$0xff] }
 0x4a5   :  { %2250 = vmatpush1.bf16.msra.mxu0 %v6648_v36  ;;  %2291 = vmatpush1.bf16.msra.mxu1 %v6649_v4  ;;  %v6659_v36 = vld [vmem:[#allocation41_spill] sm:$0xff]  ;;  %v6660_v4 = vld [vmem:[#allocation42_spill] sm:$0xff] }
 0x4a6   :  { %2251 = vmatprep.subr.bf16.mxu0 %v6650_v41  ;;  %2292 = vmatprep.subr.bf16.mxu1 %v6651_v35  ;;  %v6661_v41 = vld [vmem:[#allocation43_spill] sm:$0xff]  ;;  %v6662_v35 = vld [vmem:[#allocation44_spill] sm:$0xff] }
 0x4a9   :  { %2252 = vmatpush1.bf16.msra.mxu0 %v6652_v44  ;;  %2293 = vmatpush1.bf16.msra.mxu1 %v6653_v57  ;;  %v6663_v44 = vld [vmem:[#allocation45_spill] sm:$0xff]  ;;  %v6664_v57 = vld [vmem:[#allocation46_spill] sm:$0xff] }
 0x4aa   :  { %2253 = vmatprep.subr.bf16.mxu0 %v6654_v22  ;;  %2294 = vmatprep.subr.bf16.mxu1 %v6655_v3  ;;  %v6665_v22 = vld [vmem:[#allocation47_spill] sm:$0xff]  ;;  %v6666_v3 = vld [vmem:[#allocation48_spill] sm:$0xff] }
 0x4ad   :  { %2254 = vmatpush1.bf16.msra.mxu0 %v6656_v5  ;;  %2295 = vmatpush1.bf16.msra.mxu1 %v6657_v20  ;;  %v6667_v5 = vld [vmem:[#allocation49_spill] sm:$0xff]  ;;  %v6668_v20 = vld [vmem:[#allocation50_spill] sm:$0xff] }
 0x4ae   :  { %2255 = vmatprep.subr.bf16.mxu0 %v6658_v43  ;;  %2296 = vmatprep.subr.bf16.mxu1 %v6659_v36  ;;  %v6669_v43 = vld [vmem:[#allocation51_spill] sm:$0xff]  ;;  %v6670_v36 = vld [vmem:[#allocation52_spill] sm:$0xff] }
 0x4b1   :  { %2256 = vmatpush1.bf16.msra.mxu0 %v6660_v4  ;;  %2297 = vmatpush1.bf16.msra.mxu1 %v6661_v41  ;;  %v6671_v4 = vld [vmem:[#allocation53_spill] sm:$0xff]  ;;  %v6672_v41 = vld [vmem:[#allocation54_spill] sm:$0xff] }
 0x4b2   :  { %2257 = vmatprep.subr.bf16.mxu0 %v6662_v35  ;;  %2298 = vmatprep.subr.bf16.mxu1 %v6663_v44  ;;  %v6673_v35 = vld [vmem:[#allocation55_spill] sm:$0xff]  ;;  %v6674_v44 = vld [vmem:[#allocation56_spill] sm:$0xff] }
 0x4b5   :  { %2258 = vmatpush1.bf16.msra.mxu0 %v6664_v57  ;;  %2299 = vmatpush1.bf16.msra.mxu1 %v6665_v22  ;;  %v6675_v57 = vld [vmem:[#allocation57_spill] sm:$0xff]  ;;  %v6676_v22 = vld [vmem:[#allocation58_spill] sm:$0xff] }
 0x4b6   :  { %2259 = vmatprep.subr.bf16.mxu0 %v6666_v3  ;;  %2300 = vmatprep.subr.bf16.mxu1 %v6667_v5  ;;  %v6677_v3 = vld [vmem:[#allocation59_spill] sm:$0xff]  ;;  %v6678_v5 = vld [vmem:[#allocation60_spill] sm:$0xff] }
 0x4b9   :  { %2260 = vmatpush1.bf16.msra.mxu0 %v6668_v20  ;;  %2301 = vmatpush1.bf16.msra.mxu1 %v6669_v43  ;;  %v6679_v20 = vld [vmem:[#allocation61_spill] sm:$0xff]  ;;  %v6680_v43 = vld [vmem:[#allocation62_spill] sm:$0xff] }
 0x4ba   :  { %2261 = vmatprep.subr.bf16.mxu0 %v6670_v36  ;;  %2302 = vmatprep.subr.bf16.mxu1 %v6671_v4  ;;  %v6681_v36 = vld [vmem:[#allocation63_spill] sm:$0xff]  ;;  %v6682_v4 = vld [vmem:[#allocation64_spill] sm:$0xff] }
 0x4bd   :  { %2262 = vmatpush1.bf16.msra.mxu0 %v6672_v41  ;;  %2303 = vmatpush1.bf16.msra.mxu1 %v6673_v35  ;;  %v6683_v41 = vld [vmem:[#allocation65_spill] sm:$0xff]  ;;  %v6684_v35 = vld [vmem:[#allocation66_spill] sm:$0xff] }
 0x4be   :  { %2263 = vmatprep.subr.bf16.mxu0 %v6674_v44  ;;  %2304 = vmatprep.subr.bf16.mxu1 %v6675_v57  ;;  %v6685_v44 = vld [vmem:[#allocation67_spill] sm:$0xff]  ;;  %v6686_v57 = vld [vmem:[#allocation68_spill] sm:$0xff] }
 0x4c1   :  { %2264 = vmatpush1.bf16.msra.mxu0 %v6676_v22  ;;  %2305 = vmatpush1.bf16.msra.mxu1 %v6677_v3  ;;  %v6687_v22 = vld [vmem:[#allocation69_spill] sm:$0xff]  ;;  %v6688_v3 = vld [vmem:[#allocation70_spill] sm:$0xff] }
 0x4c2   :  { %2265 = vmatprep.subr.bf16.mxu0 %v6678_v5  ;;  %2306 = vmatprep.subr.bf16.mxu1 %v6679_v20  ;;  %v6689_v5 = vld [vmem:[#allocation71_spill] sm:$0xff]  ;;  %v6690_v20 = vld [vmem:[#allocation72_spill] sm:$0xff] }
 0x4c5   :  { %2266 = vmatpush1.bf16.msra.mxu0 %v6680_v43  ;;  %2307 = vmatpush1.bf16.msra.mxu1 %v6681_v36  ;;  %v6691_v43 = vld [vmem:[#allocation73_spill] sm:$0xff]  ;;  %v6692_v36 = vld [vmem:[#allocation74_spill] sm:$0xff] }
 0x4c6   :  { %2267 = vmatprep.subr.bf16.mxu0 %v6682_v4  ;;  %2308 = vmatprep.subr.bf16.mxu1 %v6683_v41  ;;  %v6693_v4 = vld [vmem:[#allocation75_spill] sm:$0xff]  ;;  %v6694_v41 = vld [vmem:[#allocation76_spill] sm:$0xff] }
 0x4c9   :  { %2268 = vmatpush1.bf16.msra.mxu0 %v6684_v35  ;;  %2309 = vmatpush1.bf16.msra.mxu1 %v6685_v44  ;;  %v6695_v35 = vld [vmem:[#allocation77_spill] sm:$0xff]  ;;  %v6696_v44 = vld [vmem:[#allocation78_spill] sm:$0xff] }
 0x4ca   :  { %2269 = vmatprep.subr.bf16.mxu0 %v6686_v57  ;;  %2310 = vmatprep.subr.bf16.mxu1 %v6687_v22  ;;  %v6697_v57 = vld [vmem:[#allocation79_spill] sm:$0xff]  ;;  %v6698_v22 = vld [vmem:[#allocation80_spill] sm:$0xff] }
 0x4cd   :  { %2270 = vmatpush1.bf16.msra.mxu0 %v6688_v3  ;;  %2311 = vmatpush1.bf16.msra.mxu1 %v6689_v5  ;;  %v6699_v3 = vld [vmem:[#allocation81_spill] sm:$0xff] }
 0x4ce   :  { %2271 = vmatprep.subr.bf16.mxu0 %v6690_v20  ;;  %2312 = vmatprep.subr.bf16.mxu1 %v6691_v43 }
 0x4d1   :  { %2272 = vmatpush1.bf16.msra.mxu0 %v6692_v36  ;;  %2313 = vmatpush1.bf16.msra.mxu1 %v6693_v4 }
 0x4d2   :  { %2273 = vmatprep.subr.bf16.mxu0 %v6694_v41  ;;  %2314 = vmatprep.subr.bf16.mxu1 %v6695_v35 }
 0x4d5   :  { %2274 = vmatpush1.bf16.msra.mxu0 %v6696_v44  ;;  %2315 = vmatpush1.bf16.msra.mxu1 %v6697_v57 }
 0x4d6   :  { %2325 = vmatprep.subr.bf16.mxu0 %v6698_v22  ;;  %2366 = vmatprep.subr.bf16.mxu1 %v6699_v3 }
 0x52b   :  { %v2065_v5 = vpop.f32.mrb[56].mxu0  ;;  %v2106_v20 = vpop.f32.mrb[56].mxu1 }
 0x52c   :  { %v2066_v43 = vadd.f32 %v2065_v5, %v6700_v50  ;;  %v2107_v36 = vadd.f32 %v2106_v20, %v6701_v54  ;;  %v2067_v9 = vpop.f32.mrb[57].mxu0  ;;  %v2108_v4 = vpop.f32.mrb[57].mxu1  ;;  %v6704_v5 = vld [vmem:[#allocation179_spill] sm:$0xff] }
 0x52d   :  { %v2068_v41 = vadd.f32 %v2067_v9, %v6702_v32  ;;  %v2109_v35 = vadd.f32 %v2108_v4, %v6703_v34  ;;  %v2069_v29 = vpop.f32.mrb[58].mxu0  ;;  %v2110_v44 = vpop.f32.mrb[58].mxu1 }
 0x52e   :  { %v2070_v33 = vpop.f32.mrb[59].mxu0  ;;  %v2111_v57 = vpop.f32.mrb[59].mxu1  ;;  %v2203_v30 = vmul.f32 0.5, %v2107_v36  ;;  %v2195_v26 = vmul.f32 0.5, %v2066_v43  ;;  %v6706_v29 = vld [vmem:[#allocation181_spill] sm:$0xff] }
 0x52f   :  { %v2204_v22 = vmul.f32 0.5, %v2109_v35  ;;  %v2196_v3 = vmul.f32 0.5, %v2068_v41  ;;  %v6707_v33 = vld [vmem:[#allocation183_spill] sm:$0xff] }
 0x530   :  { %3732 = vtanh.f32 %v2203_v30 }
 0x531   :  { %3734 = vtanh.f32 %v2204_v22 }
 0x532   :  { %3736 = vtanh.f32 %v2195_v26 }
 0x533   :  { %3738 = vtanh.f32 %v2196_v3 }
 0x53a   :  { %v3733_v43 = vpop.eup %3732 }
 0x53b   :  { %v3735_v26 = vpop.eup %3734  ;;  %v2207_v41 = vmul.f32 0.5, %v3733_v43 }
 0x53c   :  { %v3737_v3 = vpop.eup %3736 }
 0x53d   :  { %v3739_v4 = vpop.eup %3738  ;;  %v2209_v62 = vadd.f32 0.5, %v2207_v41 }
 0x53e   :  { %v2200_v24 = vmul.f32 0.5, %v3739_v4 }
 0x56b   :  { %v2147_v50 = vpop.f32.mrb[60].mxu0  ;;  %v2188_v54 = vpop.f32.mrb[60].mxu1 }
 0x56c   :  { %v2148_v20 = vadd.f32 %v2147_v50, %v6704_v5  ;;  %v2189_v32 = vadd.f32 %v2188_v54, %v6705_v1  ;;  %v2149_v9 = vpop.f32.mrb[61].mxu0  ;;  %v2190_v34 = vpop.f32.mrb[61].mxu1  ;;  %v2208_v5 = vmul.f32 0.5, %v3735_v26  ;;  %v2199_v54 = vmul.f32 0.5, %v3737_v3 }
 0x56d   :  { %v2150_v44 = vadd.f32 %v2149_v9, %v6706_v29  ;;  %v2191_v57 = vadd.f32 %v2190_v34, %v6707_v33  ;;  %v2151_v36 = vpop.f32.mrb[62].mxu0  ;;  %v2192_v35 = vpop.f32.mrb[62].mxu1  ;;  %v2202_v33 = vadd.f32 0.5, %v2200_v24 }
 0x56e   :  { %3740 = vtanh.f32 %v2148_v20  ;;  %v2152_v30 = vpop.f32.mrb[63].mxu0  ;;  %v2193_v22 = vpop.f32.mrb[63].mxu1  ;;  %v2213_v50 = vmul.f32 0.5, %v2189_v32  ;;  %v2210_v9 = vadd.f32 0.5, %v2208_v5  ;;  %v2201_v34 = vadd.f32 0.5, %v2199_v54 }
 0x56f   :  { %3742 = vtanh.f32 %v2150_v44  ;;  %v2214_v1 = vmul.f32 0.5, %v2191_v57  ;;  %v2221_v36 = vmul.f32 %v2209_v62, %v5147_v0 }
 0x570   :  { %3744 = vtanh.f32 %v2213_v50  ;;  %v2222_v44 = vmul.f32 %v2210_v9, %v5149_v19  ;;  %v6710_v9 = vld [vmem:[#allocation121_spill] sm:$0xff] }
 0x571   :  { %3746 = vtanh.f32 %v2214_v1 }
 0x578   :  { %v3741_v29 = vpop.eup %3740 }
 0x579   :  { %v3743_v20 = vpop.eup %3742  ;;  %v2223_v35 = vmul.f32 %v3741_v29, %v2201_v34  ;;  %v6711_v34 = vld [vmem:[#allocation122_spill] sm:$0xff]  ;;  %v6712_v29 = vld [vmem:[#allocation123_spill] sm:$0xff] }
 0x57a   :  { %v2224_v30 = vmul.f32 %v3743_v20, %v2202_v33  ;;  %v3745_v57 = vpop.eup %3744  ;;  %v6713_v33 = vld [vmem:[#allocation124_spill] sm:$0xff]  ;;  %v6714_v20 = vld [vmem:[#allocation125_spill] sm:$0xff] }
 0x57b   :  { %v5305_v43 = vadd.f32 %v2223_v35, %v2221_v36  ;;  %v3747_v22 = vpop.eup %3746  ;;  %v2217_v26 = vmul.f32 0.5, %v3745_v57  ;;  %v6715_v36 = vld [vmem:[#allocation126_spill] sm:$0xff]  ;;  %v6716_v35 = vld [vmem:[#allocation127_spill] sm:$0xff] }
 0x57c   :  { %v5307_v32 = vadd.f32 %v2224_v30, %v2222_v44  ;;  %v2218_v3 = vmul.f32 0.5, %v3747_v22  ;;  %v6717_v44 = vld [vmem:[#allocation128_spill] sm:$0xff]  ;;  %v6718_v30 = vld [vmem:[#allocation129_spill] sm:$0xff]  ;;  %v6719_v57 = vld [vmem:[#allocation130_spill] sm:$0xff] }
 0x57d   :  { %3748 = vtanh.f32 %v5305_v43  ;;  %v2219_v24 = vadd.f32 0.5, %v2217_v26  ;;  %v6720_v22 = vld [vmem:[#allocation131_spill] sm:$0xff]  ;;  %v6721_v26 = vld [vmem:[#allocation132_spill] sm:$0xff] }
 0x57e   :  { %3750 = vtanh.f32 %v5307_v32  ;;  %v2220_v41 = vadd.f32 0.5, %v2218_v3  ;;  %v6722_v3 = vld [vmem:[#allocation133_spill] sm:$0xff] }
 0x587   :  { %v3749_v4 = vpop.eup %3748 }
 0x588   :  { %v3751_v0 = vpop.eup %3750  ;;  %v2229_v62 = vmul.f32 %v3749_v4, %v2219_v24  ;;  %v6723_v24 = vld [vmem:[#allocation134_spill] sm:$0xff]  ;;  %v6724_v4 = vld [vmem:[#allocation135_spill] sm:$0xff] }
 0x589   :  { %v2230_v50 = vmul.f32 %v3751_v0, %v2220_v41  ;;  %v6725_v41 = vld [vmem:[#allocation136_spill] sm:$0xff]  ;;  %v6726_v0 = vld [vmem:[#allocation137_spill] sm:$0xff] }
 0x58a   :  { %v5312_v19 = vadd.f32 %v2229_v62, %v5157_v14  ;;  %v5317_v54 = vpack.c.bf16 %v2229_v62, %v2229_v62  ;;  %v6708_v14 = vld [vmem:[#allocation119_spill] sm:$0xff]  ;;  %v6727_v62 = vld [vmem:[#allocation138_spill] sm:$0xff] }
 0x58b   :  { %v5315_v5 = vadd.f32 %v2230_v50, %v5159_v21  ;;  %v2242_v1 = vpack.c.bf16 %v2230_v50, %v2230_v50  ;;  %v6709_v21 = vld [vmem:[#allocation120_spill] sm:$0xff]  ;;  %v6728_v50 = vld [vmem:[#allocation139_spill] sm:$0xff] }
 0x58d   :  { %2275 = vmatprep.mubr.bf16.mxu0 %v2242_v1  ;;  %2316 = vmatprep.mubr.bf16.mxu1 %v2242_v1 }
 0x58e   :  { %2276 = vmatmul.mubr.bf16.vlgmr.msra.gmra.mrb[64].mxu0 %v5317_v54  ;;  %2317 = vmatmul.mubr.bf16.vlgmr.msra.gmra.mrb[64].mxu1 %v5317_v54 }
 0x58f   :  { %2326 = vmatpush1.bf16.msra.mxu0 %v6406_v42  ;;  %2367 = vmatpush1.bf16.msra.mxu1 %v6407_v10 }
 0x590   :  { %2357 = vmatprep.mubr.bf16.mxu0 %v2242_v1  ;;  %2398 = vmatprep.mubr.bf16.mxu1 %v2242_v1  ;;  %v6729_v1 = vld [vmem:[#allocation140_spill] sm:$0xff] }
 0x591   :  { %2327 = vmatprep.subr.bf16.mxu0 %v6408_v53  ;;  %2368 = vmatprep.subr.bf16.mxu1 %v6409_v28 }
 0x593   :  { %2328 = vmatpush1.bf16.msra.mxu0 %v6410_v45  ;;  %2369 = vmatpush1.bf16.msra.mxu1 %v6411_v6 }
 0x594   :  { %2329 = vmatprep.subr.bf16.mxu0 %v6412_v27  ;;  %2370 = vmatprep.subr.bf16.mxu1 %v6413_v46 }
 0x597   :  { %2330 = vmatpush1.bf16.msra.mxu0 %v6414_v39  ;;  %2371 = vmatpush1.bf16.msra.mxu1 %v6415_v31 }
 0x598   :  { %2331 = vmatprep.subr.bf16.mxu0 %v6416_v7  ;;  %2372 = vmatprep.subr.bf16.mxu1 %v6417_v17 }
 0x59b   :  { %2332 = vmatpush1.bf16.msra.mxu0 %v6418_v61  ;;  %2373 = vmatpush1.bf16.msra.mxu1 %v6419_v51 }
 0x59c   :  { %2333 = vmatprep.subr.bf16.mxu0 %v6420_v59  ;;  %2374 = vmatprep.subr.bf16.mxu1 %v6421_v60 }
 0x59f   :  { %2334 = vmatpush1.bf16.msra.mxu0 %v6422_v18  ;;  %2375 = vmatpush1.bf16.msra.mxu1 %v6423_v23 }
 0x5a0   :  { %2335 = vmatprep.subr.bf16.mxu0 %v6510_v25  ;;  %2376 = vmatprep.subr.bf16.mxu1 %v6511_v56 }
 0x5a3   :  { %2336 = vmatpush1.bf16.msra.mxu0 %v6512_v55  ;;  %2377 = vmatpush1.bf16.msra.mxu1 %v6513_v49 }
 0x5a4   :  { %2337 = vmatprep.subr.bf16.mxu0 %v6514_v48  ;;  %2378 = vmatprep.subr.bf16.mxu1 %v6515_v47 }
 0x5a7   :  { %2338 = vmatpush1.bf16.msra.mxu0 %v6516_v2  ;;  %2379 = vmatpush1.bf16.msra.mxu1 %v6517_v8 }
 0x5a8   :  { %2339 = vmatprep.subr.bf16.mxu0 %v6518_v15  ;;  %2380 = vmatprep.subr.bf16.mxu1 %v6519_v11 }
 0x5ab   :  { %2340 = vmatpush1.bf16.msra.mxu0 %v6520_v40  ;;  %2381 = vmatpush1.bf16.msra.mxu1 %v6521_v16 }
 0x5ac   :  { %2341 = vmatprep.subr.bf16.mxu0 %v6522_v58  ;;  %2382 = vmatprep.subr.bf16.mxu1 %v6523_v37 }
 0x5af   :  { %2342 = vmatpush1.bf16.msra.mxu0 %v6524_v63  ;;  %2383 = vmatpush1.bf16.msra.mxu1 %v6525_v38 }
 0x5b0   :  { %2343 = vmatprep.subr.bf16.mxu0 %v6526_v12  ;;  %2384 = vmatprep.subr.bf16.mxu1 %v6527_v13 }
 0x5b3   :  { %2344 = vmatpush1.bf16.msra.mxu0 %v6528_v52  ;;  %2385 = vmatpush1.bf16.msra.mxu1 %v6708_v14 }
 0x5b4   :  { %2345 = vmatprep.subr.bf16.mxu0 %v6709_v21  ;;  %2386 = vmatprep.subr.bf16.mxu1 %v6710_v9  ;;  %v6804_v9 = vld [vmem:[#allocation186_spill] sm:$0xff] }
 0x5b7   :  { %2346 = vmatpush1.bf16.msra.mxu0 %v6711_v34  ;;  %2387 = vmatpush1.bf16.msra.mxu1 %v6712_v29 }
 0x5b8   :  { %2347 = vmatprep.subr.bf16.mxu0 %v6713_v33  ;;  %2388 = vmatprep.subr.bf16.mxu1 %v6714_v20 }
 0x5bb   :  { %2348 = vmatpush1.bf16.msra.mxu0 %v6715_v36  ;;  %2389 = vmatpush1.bf16.msra.mxu1 %v6716_v35  ;;  %v6801_v35 = vld [vmem:[#allocation157_spill] sm:$0xff]  ;;  %v6802_v36 = vld [vmem:[#allocation160_spill] sm:$0xff] }
 0x5bc   :  { %2349 = vmatprep.subr.bf16.mxu0 %v6717_v44  ;;  %2390 = vmatprep.subr.bf16.mxu1 %v6718_v30  ;;  %v6800_v30 = vld [vmem:[#allocation158_spill] sm:$0xff] }
 0x5bf   :  { %2350 = vmatpush1.bf16.msra.mxu0 %v6719_v57  ;;  %2391 = vmatpush1.bf16.msra.mxu1 %v6720_v22  ;;  %v6730_v57 = vld [vmem:[#allocation141_spill] sm:$0xff]  ;;  %v6731_v22 = vld [vmem:[#allocation142_spill] sm:$0xff] }
 0x5c0   :  { %2351 = vmatprep.subr.bf16.mxu0 %v6721_v26  ;;  %2392 = vmatprep.subr.bf16.mxu1 %v6722_v3  ;;  %v6732_v26 = vld [vmem:[#allocation143_spill] sm:$0xff]  ;;  %v6733_v3 = vld [vmem:[#allocation16_spill] sm:$0xff] }
 0x5c3   :  { %2352 = vmatpush1.bf16.msra.mxu0 %v6723_v24  ;;  %2393 = vmatpush1.bf16.msra.mxu1 %v6724_v4  ;;  %v6734_v24 = vld [vmem:[#allocation17_spill] sm:$0xff]  ;;  %v6799_v4 = vld [vmem:[#allocation156_spill] sm:$0xff] }
 0x5c4   :  { %2353 = vmatprep.subr.bf16.mxu0 %v6725_v41  ;;  %2394 = vmatprep.subr.bf16.mxu1 %v6726_v0  ;;  %v6735_v0 = vld [vmem:[#allocation18_spill] sm:$0xff]  ;;  %v6744_v41 = vld [vmem:[#allocation27_spill] sm:$0xff] }
 0x5c7   :  { %2354 = vmatpush1.bf16.msra.mxu0 %v6727_v62  ;;  %2395 = vmatpush1.bf16.msra.mxu1 %v6728_v50  ;;  %v6736_v62 = vld [vmem:[#allocation19_spill] sm:$0xff]  ;;  %v6737_v50 = vld [vmem:[#allocation20_spill] sm:$0xff] }
 0x5c8   :  { %2355 = vmatprep.subr.bf16.mxu0 %v6729_v1  ;;  %2396 = vmatprep.subr.bf16.mxu1 %v6730_v57  ;;  %v6738_v1 = vld [vmem:[#allocation21_spill] sm:$0xff]  ;;  %v6739_v57 = vld [vmem:[#allocation22_spill] sm:$0xff] }
 0x5cb   :  { %2356 = vmatpush1.bf16.msra.mxu0 %v6731_v22  ;;  %2397 = vmatpush1.bf16.msra.mxu1 %v6732_v26  ;;  %v6740_v22 = vld [vmem:[#allocation23_spill] sm:$0xff]  ;;  %v6741_v26 = vld [vmem:[#allocation24_spill] sm:$0xff] }
 0x5cc   :  { %2455 = vmatprep.subr.bf16.mxu0 %v6733_v3  ;;  %2496 = vmatprep.subr.bf16.mxu1 %v6734_v24  ;;  %v6742_v3 = vld [vmem:[#allocation25_spill] sm:$0xff]  ;;  %v6743_v24 = vld [vmem:[#allocation26_spill] sm:$0xff] }
 0x5ce   :  { %2358 = vmatmul.mubr.bf16.vlgmr.msra.gmra.mrb[68].mxu0 %v5317_v54  ;;  %2399 = vmatmul.mubr.bf16.vlgmr.msra.gmra.mrb[68].mxu1 %v5317_v54  ;;  %v6745_v54 = vld [vmem:[#allocation28_spill] sm:$0xff] }
 0x5cf   :  { %2456 = vmatpush1.bf16.msra.mxu0 %v6735_v0  ;;  %2497 = vmatpush1.bf16.msra.mxu1 %v6736_v62  ;;  %v6746_v0 = vld [vmem:[#allocation29_spill] sm:$0xff]  ;;  %v6747_v62 = vld [vmem:[#allocation30_spill] sm:$0xff] }
 0x5d0   :  { %2457 = vmatprep.subr.bf16.mxu0 %v6737_v50  ;;  %2498 = vmatprep.subr.bf16.mxu1 %v6738_v1  ;;  %v6748_v50 = vld [vmem:[#allocation31_spill] sm:$0xff]  ;;  %v6749_v1 = vld [vmem:[#allocation32_spill] sm:$0xff] }
 0x5d3   :  { %2458 = vmatpush1.bf16.msra.mxu0 %v6739_v57  ;;  %2499 = vmatpush1.bf16.msra.mxu1 %v6740_v22  ;;  %v6750_v57 = vld [vmem:[#allocation33_spill] sm:$0xff]  ;;  %v6751_v22 = vld [vmem:[#allocation34_spill] sm:$0xff] }
 0x5d4   :  { %2459 = vmatprep.subr.bf16.mxu0 %v6741_v26  ;;  %2500 = vmatprep.subr.bf16.mxu1 %v6742_v3  ;;  %v6752_v26 = vld [vmem:[#allocation35_spill] sm:$0xff]  ;;  %v6753_v3 = vld [vmem:[#allocation36_spill] sm:$0xff] }
 0x5d7   :  { %2460 = vmatpush1.bf16.msra.mxu0 %v6743_v24  ;;  %2501 = vmatpush1.bf16.msra.mxu1 %v6744_v41  ;;  %v6754_v24 = vld [vmem:[#allocation37_spill] sm:$0xff]  ;;  %v6755_v41 = vld [vmem:[#allocation38_spill] sm:$0xff] }
 0x5d8   :  { %2461 = vmatprep.subr.bf16.mxu0 %v6745_v54  ;;  %2502 = vmatprep.subr.bf16.mxu1 %v6746_v0  ;;  %v6756_v54 = vld [vmem:[#allocation39_spill] sm:$0xff]  ;;  %v6757_v0 = vld [vmem:[#allocation40_spill] sm:$0xff] }
 0x5db   :  { %2462 = vmatpush1.bf16.msra.mxu0 %v6747_v62  ;;  %2503 = vmatpush1.bf16.msra.mxu1 %v6748_v50  ;;  %v6758_v62 = vld [vmem:[#allocation41_spill] sm:$0xff]  ;;  %v6759_v50 = vld [vmem:[#allocation42_spill] sm:$0xff] }
 0x5dc   :  { %2463 = vmatprep.subr.bf16.mxu0 %v6749_v1  ;;  %2504 = vmatprep.subr.bf16.mxu1 %v6750_v57  ;;  %v6760_v1 = vld [vmem:[#allocation43_spill] sm:$0xff]  ;;  %v6761_v57 = vld [vmem:[#allocation44_spill] sm:$0xff] }
 0x5df   :  { %2464 = vmatpush1.bf16.msra.mxu0 %v6751_v22  ;;  %2505 = vmatpush1.bf16.msra.mxu1 %v6752_v26  ;;  %v6762_v22 = vld [vmem:[#allocation45_spill] sm:$0xff]  ;;  %v6763_v26 = vld [vmem:[#allocation46_spill] sm:$0xff] }
 0x5e0   :  { %2465 = vmatprep.subr.bf16.mxu0 %v6753_v3  ;;  %2506 = vmatprep.subr.bf16.mxu1 %v6754_v24  ;;  %v6764_v3 = vld [vmem:[#allocation47_spill] sm:$0xff]  ;;  %v6765_v24 = vld [vmem:[#allocation48_spill] sm:$0xff] }
 0x5e3   :  { %2466 = vmatpush1.bf16.msra.mxu0 %v6755_v41  ;;  %2507 = vmatpush1.bf16.msra.mxu1 %v6756_v54  ;;  %v6766_v41 = vld [vmem:[#allocation49_spill] sm:$0xff]  ;;  %v6767_v54 = vld [vmem:[#allocation50_spill] sm:$0xff] }
 0x5e4   :  { %2467 = vmatprep.subr.bf16.mxu0 %v6757_v0  ;;  %2508 = vmatprep.subr.bf16.mxu1 %v6758_v62  ;;  %v6768_v0 = vld [vmem:[#allocation51_spill] sm:$0xff]  ;;  %v6769_v62 = vld [vmem:[#allocation52_spill] sm:$0xff] }
 0x5e7   :  { %2468 = vmatpush1.bf16.msra.mxu0 %v6759_v50  ;;  %2509 = vmatpush1.bf16.msra.mxu1 %v6760_v1  ;;  %v6770_v50 = vld [vmem:[#allocation53_spill] sm:$0xff]  ;;  %v6771_v1 = vld [vmem:[#allocation54_spill] sm:$0xff] }
 0x5e8   :  { %2469 = vmatprep.subr.bf16.mxu0 %v6761_v57  ;;  %2510 = vmatprep.subr.bf16.mxu1 %v6762_v22  ;;  %v6772_v57 = vld [vmem:[#allocation55_spill] sm:$0xff]  ;;  %v6773_v22 = vld [vmem:[#allocation56_spill] sm:$0xff] }
 0x5eb   :  { %2470 = vmatpush1.bf16.msra.mxu0 %v6763_v26  ;;  %2511 = vmatpush1.bf16.msra.mxu1 %v6764_v3  ;;  %v6774_v26 = vld [vmem:[#allocation57_spill] sm:$0xff]  ;;  %v6775_v3 = vld [vmem:[#allocation58_spill] sm:$0xff] }
 0x5ec   :  { %2471 = vmatprep.subr.bf16.mxu0 %v6765_v24  ;;  %2512 = vmatprep.subr.bf16.mxu1 %v6766_v41  ;;  %v6776_v24 = vld [vmem:[#allocation59_spill] sm:$0xff]  ;;  %v6777_v41 = vld [vmem:[#allocation60_spill] sm:$0xff] }
 0x5ef   :  { %2472 = vmatpush1.bf16.msra.mxu0 %v6767_v54  ;;  %2513 = vmatpush1.bf16.msra.mxu1 %v6768_v0  ;;  %v6778_v54 = vld [vmem:[#allocation61_spill] sm:$0xff]  ;;  %v6779_v0 = vld [vmem:[#allocation62_spill] sm:$0xff] }
 0x5f0   :  { %2473 = vmatprep.subr.bf16.mxu0 %v6769_v62  ;;  %2514 = vmatprep.subr.bf16.mxu1 %v6770_v50  ;;  %v6780_v62 = vld [vmem:[#allocation63_spill] sm:$0xff]  ;;  %v6781_v50 = vld [vmem:[#allocation64_spill] sm:$0xff] }
 0x5f3   :  { %2474 = vmatpush1.bf16.msra.mxu0 %v6771_v1  ;;  %2515 = vmatpush1.bf16.msra.mxu1 %v6772_v57  ;;  %v6782_v1 = vld [vmem:[#allocation65_spill] sm:$0xff]  ;;  %v6783_v57 = vld [vmem:[#allocation66_spill] sm:$0xff] }
 0x5f4   :  { %2475 = vmatprep.subr.bf16.mxu0 %v6773_v22  ;;  %2516 = vmatprep.subr.bf16.mxu1 %v6774_v26  ;;  %v6784_v22 = vld [vmem:[#allocation67_spill] sm:$0xff]  ;;  %v6785_v26 = vld [vmem:[#allocation68_spill] sm:$0xff] }
 0x5f7   :  { %2476 = vmatpush1.bf16.msra.mxu0 %v6775_v3  ;;  %2517 = vmatpush1.bf16.msra.mxu1 %v6776_v24  ;;  %v6786_v3 = vld [vmem:[#allocation69_spill] sm:$0xff]  ;;  %v6787_v24 = vld [vmem:[#allocation70_spill] sm:$0xff] }
 0x5f8   :  { %2477 = vmatprep.subr.bf16.mxu0 %v6777_v41  ;;  %2518 = vmatprep.subr.bf16.mxu1 %v6778_v54  ;;  %v6788_v41 = vld [vmem:[#allocation71_spill] sm:$0xff]  ;;  %v6789_v54 = vld [vmem:[#allocation72_spill] sm:$0xff] }
 0x5fb   :  { %2478 = vmatpush1.bf16.msra.mxu0 %v6779_v0  ;;  %2519 = vmatpush1.bf16.msra.mxu1 %v6780_v62  ;;  %v6790_v0 = vld [vmem:[#allocation73_spill] sm:$0xff]  ;;  %v6791_v62 = vld [vmem:[#allocation74_spill] sm:$0xff] }
 0x5fc   :  { %2479 = vmatprep.subr.bf16.mxu0 %v6781_v50  ;;  %2520 = vmatprep.subr.bf16.mxu1 %v6782_v1  ;;  %v6792_v50 = vld [vmem:[#allocation75_spill] sm:$0xff]  ;;  %v6793_v1 = vld [vmem:[#allocation76_spill] sm:$0xff] }
 0x5ff   :  { %2480 = vmatpush1.bf16.msra.mxu0 %v6783_v57  ;;  %2521 = vmatpush1.bf16.msra.mxu1 %v6784_v22  ;;  %v6794_v57 = vld [vmem:[#allocation77_spill] sm:$0xff]  ;;  %v6795_v22 = vld [vmem:[#allocation78_spill] sm:$0xff] }
 0x600   :  { %2481 = vmatprep.subr.bf16.mxu0 %v6785_v26  ;;  %2522 = vmatprep.subr.bf16.mxu1 %v6786_v3  ;;  %v6796_v26 = vld [vmem:[#allocation79_spill] sm:$0xff]  ;;  %v6797_v3 = vld [vmem:[#allocation80_spill] sm:$0xff] }
 0x603   :  { %2482 = vmatpush1.bf16.msra.mxu0 %v6787_v24  ;;  %2523 = vmatpush1.bf16.msra.mxu1 %v6788_v41  ;;  %v6798_v24 = vld [vmem:[#allocation81_spill] sm:$0xff] }
 0x604   :  { %2483 = vmatprep.subr.bf16.mxu0 %v6789_v54  ;;  %2524 = vmatprep.subr.bf16.mxu1 %v6790_v0 }
 0x607   :  { %2484 = vmatpush1.bf16.msra.mxu0 %v6791_v62  ;;  %2525 = vmatpush1.bf16.msra.mxu1 %v6792_v50 }
 0x608   :  { %2485 = vmatprep.subr.bf16.mxu0 %v6793_v1  ;;  %2526 = vmatprep.subr.bf16.mxu1 %v6794_v57 }
 0x60b   :  { %2486 = vmatpush1.bf16.msra.mxu0 %v6795_v22  ;;  %2527 = vmatpush1.bf16.msra.mxu1 %v6796_v26 }
 0x60c   :  { %2537 = vmatprep.subr.bf16.mxu0 %v6797_v3  ;;  %2578 = vmatprep.subr.bf16.mxu1 %v6798_v24 }
 0x661   :  { %v2277_v41 = vpop.f32.mrb[64].mxu0  ;;  %v2318_v54 = vpop.f32.mrb[64].mxu1 }
 0x662   :  { %v2278_v0 = vadd.f32 %v2277_v41, %v6799_v4  ;;  %v2319_v62 = vadd.f32 %v2318_v54, %v6800_v30  ;;  %v2279_v44 = vpop.f32.mrb[65].mxu0  ;;  %v2320_v50 = vpop.f32.mrb[65].mxu1  ;;  %v6803_v41 = vld [vmem:[#allocation184_spill] sm:$0xff] }
 0x663   :  { %v2280_v1 = vadd.f32 %v2279_v44, %v6801_v35  ;;  %v2321_v57 = vadd.f32 %v2320_v50, %v6802_v36  ;;  %v2281_v20 = vpop.f32.mrb[66].mxu0  ;;  %v2322_v22 = vpop.f32.mrb[66].mxu1 }
 0x664   :  { %v2282_v33 = vpop.f32.mrb[67].mxu0  ;;  %v2323_v26 = vpop.f32.mrb[67].mxu1  ;;  %v2415_v29 = vmul.f32 0.5, %v2319_v62  ;;  %v2407_v34 = vmul.f32 0.5, %v2278_v0  ;;  %v6805_v20 = vld [vmem:[#allocation185_spill] sm:$0xff] }
 0x665   :  { %v2416_v3 = vmul.f32 0.5, %v2321_v57  ;;  %v2408_v24 = vmul.f32 0.5, %v2280_v1  ;;  %v6806_v33 = vld [vmem:[#allocation188_spill] sm:$0xff] }
 0x666   :  { %3752 = vtanh.f32 %v2415_v29 }
 0x667   :  { %3754 = vtanh.f32 %v2416_v3 }
 0x668   :  { %3756 = vtanh.f32 %v2407_v34 }
 0x669   :  { %3758 = vtanh.f32 %v2408_v24 }
 0x670   :  { %v3753_v0 = vpop.eup %3752 }
 0x671   :  { %v3755_v34 = vpop.eup %3754  ;;  %v2419_v1 = vmul.f32 0.5, %v3753_v0 }
 0x672   :  { %v3757_v24 = vpop.eup %3756 }
 0x673   :  { %v3759_v50 = vpop.eup %3758  ;;  %v2421_v14 = vadd.f32 0.5, %v2419_v1 }
 0x674   :  { %v2412_v21 = vmul.f32 0.5, %v3759_v50 }
 0x6a1   :  { %v2359_v4 = vpop.f32.mrb[68].mxu0  ;;  %v2400_v30 = vpop.f32.mrb[68].mxu1 }
 0x6a2   :  { %v2360_v54 = vadd.f32 %v2359_v4, %v6803_v41  ;;  %v2401_v35 = vadd.f32 %v2400_v30, %v6804_v9  ;;  %v2361_v44 = vpop.f32.mrb[69].mxu0  ;;  %v2402_v36 = vpop.f32.mrb[69].mxu1  ;;  %v2420_v41 = vmul.f32 0.5, %v3755_v34  ;;  %v2411_v30 = vmul.f32 0.5, %v3757_v24 }
 0x6a3   :  { %v2362_v22 = vadd.f32 %v2361_v44, %v6805_v20  ;;  %v2403_v26 = vadd.f32 %v2402_v36, %v6806_v33  ;;  %v2363_v62 = vpop.f32.mrb[70].mxu0  ;;  %v2404_v57 = vpop.f32.mrb[70].mxu1  ;;  %v2414_v33 = vadd.f32 0.5, %v2412_v21 }
 0x6a4   :  { %3760 = vtanh.f32 %v2360_v54  ;;  %v2364_v29 = vpop.f32.mrb[71].mxu0  ;;  %v2405_v3 = vpop.f32.mrb[71].mxu1  ;;  %v2425_v4 = vmul.f32 0.5, %v2401_v35  ;;  %v2422_v44 = vadd.f32 0.5, %v2420_v41  ;;  %v2413_v36 = vadd.f32 0.5, %v2411_v30 }
 0x6a5   :  { %3762 = vtanh.f32 %v2362_v22  ;;  %v2426_v9 = vmul.f32 0.5, %v2403_v26  ;;  %v2433_v62 = vmul.f32 %v2421_v14, %v5305_v43 }
 0x6a6   :  { %3764 = vtanh.f32 %v2425_v4  ;;  %v2434_v22 = vmul.f32 %v2422_v44, %v5307_v32  ;;  %v6809_v44 = vld [vmem:[#allocation121_spill] sm:$0xff] }
 0x6a7   :  { %3766 = vtanh.f32 %v2426_v9 }
 0x6ae   :  { %v3761_v20 = vpop.eup %3760 }
 0x6af   :  { %v3763_v54 = vpop.eup %3762  ;;  %v2435_v57 = vmul.f32 %v3761_v20, %v2413_v36  ;;  %v6810_v36 = vld [vmem:[#allocation122_spill] sm:$0xff]  ;;  %v6811_v20 = vld [vmem:[#allocation123_spill] sm:$0xff] }
 0x6b0   :  { %v2436_v29 = vmul.f32 %v3763_v54, %v2414_v33  ;;  %v3765_v26 = vpop.eup %3764  ;;  %v6812_v33 = vld [vmem:[#allocation124_spill] sm:$0xff]  ;;  %v6813_v54 = vld [vmem:[#allocation125_spill] sm:$0xff] }
 0x6b1   :  { %v5461_v0 = vadd.f32 %v2435_v57, %v2433_v62  ;;  %v3767_v3 = vpop.eup %3766  ;;  %v2429_v34 = vmul.f32 0.5, %v3765_v26  ;;  %v6814_v62 = vld [vmem:[#allocation126_spill] sm:$0xff]  ;;  %v6815_v57 = vld [vmem:[#allocation127_spill] sm:$0xff] }
 0x6b2   :  { %v5463_v35 = vadd.f32 %v2436_v29, %v2434_v22  ;;  %v2430_v24 = vmul.f32 0.5, %v3767_v3  ;;  %v6816_v22 = vld [vmem:[#allocation128_spill] sm:$0xff]  ;;  %v6817_v29 = vld [vmem:[#allocation129_spill] sm:$0xff]  ;;  %v6818_v26 = vld [vmem:[#allocation130_spill] sm:$0xff] }
 0x6b3   :  { %3768 = vtanh.f32 %v5461_v0  ;;  %v2431_v21 = vadd.f32 0.5, %v2429_v34  ;;  %v6819_v3 = vld [vmem:[#allocation131_spill] sm:$0xff]  ;;  %v6820_v34 = vld [vmem:[#allocation132_spill] sm:$0xff] }
 0x6b4   :  { %3770 = vtanh.f32 %v5463_v35  ;;  %v2432_v1 = vadd.f32 0.5, %v2430_v24  ;;  %v6821_v24 = vld [vmem:[#allocation133_spill] sm:$0xff] }
 0x6bd   :  { %v3769_v50 = vpop.eup %3768 }
 0x6be   :  { %v3771_v43 = vpop.eup %3770  ;;  %v2441_v14 = vmul.f32 %v3769_v50, %v2431_v21  ;;  %v6822_v21 = vld [vmem:[#allocation134_spill] sm:$0xff]  ;;  %v6823_v50 = vld [vmem:[#allocation135_spill] sm:$0xff] }
 0x6bf   :  { %v2442_v4 = vmul.f32 %v3771_v43, %v2432_v1  ;;  %v6824_v1 = vld [vmem:[#allocation136_spill] sm:$0xff]  ;;  %v6825_v43 = vld [vmem:[#allocation137_spill] sm:$0xff] }
 0x6c0   :  { %v5468_v32 = vadd.f32 %v2441_v14, %v5312_v19  ;;  %v5473_v30 = vpack.c.bf16 %v2441_v14, %v2441_v14  ;;  %v6807_v19 = vld [vmem:[#allocation119_spill] sm:$0xff]  ;;  %v6826_v14 = vld [vmem:[#allocation138_spill] sm:$0xff] }
 0x6c1   :  { %v5471_v41 = vadd.f32 %v2442_v4, %v5315_v5  ;;  %v2454_v9 = vpack.c.bf16 %v2442_v4, %v2442_v4  ;;  %v6808_v5 = vld [vmem:[#allocation120_spill] sm:$0xff]  ;;  %v6827_v4 = vld [vmem:[#allocation139_spill] sm:$0xff] }
 0x6c3   :  { %2487 = vmatprep.mubr.bf16.mxu0 %v2454_v9  ;;  %2528 = vmatprep.mubr.bf16.mxu1 %v2454_v9 }
 0x6c4   :  { %2488 = vmatmul.mubr.bf16.vlgmr.msra.gmra.mrb[72].mxu0 %v5473_v30  ;;  %2529 = vmatmul.mubr.bf16.vlgmr.msra.gmra.mrb[72].mxu1 %v5473_v30 }
 0x6c5   :  { %2538 = vmatpush1.bf16.msra.mxu0 %v6406_v42  ;;  %2579 = vmatpush1.bf16.msra.mxu1 %v6407_v10 }
 0x6c6   :  { %2569 = vmatprep.mubr.bf16.mxu0 %v2454_v9  ;;  %2610 = vmatprep.mubr.bf16.mxu1 %v2454_v9  ;;  %v6828_v9 = vld [vmem:[#allocation140_spill] sm:$0xff] }
 0x6c7   :  { %2539 = vmatprep.subr.bf16.mxu0 %v6408_v53  ;;  %2580 = vmatprep.subr.bf16.mxu1 %v6409_v28 }
 0x6c9   :  { %2540 = vmatpush1.bf16.msra.mxu0 %v6410_v45  ;;  %2581 = vmatpush1.bf16.msra.mxu1 %v6411_v6 }
 0x6ca   :  { %2541 = vmatprep.subr.bf16.mxu0 %v6412_v27  ;;  %2582 = vmatprep.subr.bf16.mxu1 %v6413_v46 }
 0x6cd   :  { %2542 = vmatpush1.bf16.msra.mxu0 %v6414_v39  ;;  %2583 = vmatpush1.bf16.msra.mxu1 %v6415_v31 }
 0x6ce   :  { %2543 = vmatprep.subr.bf16.mxu0 %v6416_v7  ;;  %2584 = vmatprep.subr.bf16.mxu1 %v6417_v17 }
 0x6d1   :  { %2544 = vmatpush1.bf16.msra.mxu0 %v6418_v61  ;;  %2585 = vmatpush1.bf16.msra.mxu1 %v6419_v51 }
 0x6d2   :  { %2545 = vmatprep.subr.bf16.mxu0 %v6420_v59  ;;  %2586 = vmatprep.subr.bf16.mxu1 %v6421_v60 }
 0x6d5   :  { %2546 = vmatpush1.bf16.msra.mxu0 %v6422_v18  ;;  %2587 = vmatpush1.bf16.msra.mxu1 %v6423_v23 }
 0x6d6   :  { %2547 = vmatprep.subr.bf16.mxu0 %v6510_v25  ;;  %2588 = vmatprep.subr.bf16.mxu1 %v6511_v56 }
 0x6d9   :  { %2548 = vmatpush1.bf16.msra.mxu0 %v6512_v55  ;;  %2589 = vmatpush1.bf16.msra.mxu1 %v6513_v49 }
 0x6da   :  { %2549 = vmatprep.subr.bf16.mxu0 %v6514_v48  ;;  %2590 = vmatprep.subr.bf16.mxu1 %v6515_v47 }
 0x6dd   :  { %2550 = vmatpush1.bf16.msra.mxu0 %v6516_v2  ;;  %2591 = vmatpush1.bf16.msra.mxu1 %v6517_v8 }
 0x6de   :  { %2551 = vmatprep.subr.bf16.mxu0 %v6518_v15  ;;  %2592 = vmatprep.subr.bf16.mxu1 %v6519_v11 }
 0x6e1   :  { %2552 = vmatpush1.bf16.msra.mxu0 %v6520_v40  ;;  %2593 = vmatpush1.bf16.msra.mxu1 %v6521_v16 }
 0x6e2   :  { %2553 = vmatprep.subr.bf16.mxu0 %v6522_v58  ;;  %2594 = vmatprep.subr.bf16.mxu1 %v6523_v37 }
 0x6e5   :  { %2554 = vmatpush1.bf16.msra.mxu0 %v6524_v63  ;;  %2595 = vmatpush1.bf16.msra.mxu1 %v6525_v38 }
 0x6e6   :  { %2555 = vmatprep.subr.bf16.mxu0 %v6526_v12  ;;  %2596 = vmatprep.subr.bf16.mxu1 %v6527_v13 }
 0x6e9   :  { %2556 = vmatpush1.bf16.msra.mxu0 %v6528_v52  ;;  %2597 = vmatpush1.bf16.msra.mxu1 %v6807_v19 }
 0x6ea   :  { %2557 = vmatprep.subr.bf16.mxu0 %v6808_v5  ;;  %2598 = vmatprep.subr.bf16.mxu1 %v6809_v44  ;;  %v6903_v44 = vld [vmem:[#allocation190_spill] sm:$0xff] }
 0x6ed   :  { %2558 = vmatpush1.bf16.msra.mxu0 %v6810_v36  ;;  %2599 = vmatpush1.bf16.msra.mxu1 %v6811_v20 }
 0x6ee   :  { %2559 = vmatprep.subr.bf16.mxu0 %v6812_v33  ;;  %2600 = vmatprep.subr.bf16.mxu1 %v6813_v54 }
 0x6f1   :  { %2560 = vmatpush1.bf16.msra.mxu0 %v6814_v62  ;;  %2601 = vmatpush1.bf16.msra.mxu1 %v6815_v57  ;;  %v6900_v57 = vld [vmem:[#allocation161_spill] sm:$0xff]  ;;  %v6901_v62 = vld [vmem:[#allocation163_spill] sm:$0xff] }
 0x6f2   :  { %2561 = vmatprep.subr.bf16.mxu0 %v6816_v22  ;;  %2602 = vmatprep.subr.bf16.mxu1 %v6817_v29  ;;  %v6899_v29 = vld [vmem:[#allocation162_spill] sm:$0xff] }
 0x6f5   :  { %2562 = vmatpush1.bf16.msra.mxu0 %v6818_v26  ;;  %2603 = vmatpush1.bf16.msra.mxu1 %v6819_v3  ;;  %v6829_v26 = vld [vmem:[#allocation141_spill] sm:$0xff]  ;;  %v6830_v3 = vld [vmem:[#allocation142_spill] sm:$0xff] }
 0x6f6   :  { %2563 = vmatprep.subr.bf16.mxu0 %v6820_v34  ;;  %2604 = vmatprep.subr.bf16.mxu1 %v6821_v24  ;;  %v6831_v34 = vld [vmem:[#allocation143_spill] sm:$0xff]  ;;  %v6832_v24 = vld [vmem:[#allocation16_spill] sm:$0xff] }
 0x6f9   :  { %2564 = vmatpush1.bf16.msra.mxu0 %v6822_v21  ;;  %2605 = vmatpush1.bf16.msra.mxu1 %v6823_v50  ;;  %v6833_v21 = vld [vmem:[#allocation17_spill] sm:$0xff]  ;;  %v6898_v50 = vld [vmem:[#allocation159_spill] sm:$0xff] }
 0x6fa   :  { %2565 = vmatprep.subr.bf16.mxu0 %v6824_v1  ;;  %2606 = vmatprep.subr.bf16.mxu1 %v6825_v43  ;;  %v6834_v43 = vld [vmem:[#allocation18_spill] sm:$0xff]  ;;  %v6843_v1 = vld [vmem:[#allocation27_spill] sm:$0xff] }
 0x6fd   :  { %2566 = vmatpush1.bf16.msra.mxu0 %v6826_v14  ;;  %2607 = vmatpush1.bf16.msra.mxu1 %v6827_v4  ;;  %v6835_v14 = vld [vmem:[#allocation19_spill] sm:$0xff]  ;;  %v6836_v4 = vld [vmem:[#allocation20_spill] sm:$0xff] }
 0x6fe   :  { %2567 = vmatprep.subr.bf16.mxu0 %v6828_v9  ;;  %2608 = vmatprep.subr.bf16.mxu1 %v6829_v26  ;;  %v6837_v9 = vld [vmem:[#allocation21_spill] sm:$0xff]  ;;  %v6838_v26 = vld [vmem:[#allocation22_spill] sm:$0xff] }
 0x701   :  { %2568 = vmatpush1.bf16.msra.mxu0 %v6830_v3  ;;  %2609 = vmatpush1.bf16.msra.mxu1 %v6831_v34  ;;  %v6839_v3 = vld [vmem:[#allocation23_spill] sm:$0xff]  ;;  %v6840_v34 = vld [vmem:[#allocation24_spill] sm:$0xff] }
 0x702   :  { %2667 = vmatprep.subr.bf16.mxu0 %v6832_v24  ;;  %2708 = vmatprep.subr.bf16.mxu1 %v6833_v21  ;;  %v6841_v24 = vld [vmem:[#allocation25_spill] sm:$0xff]  ;;  %v6842_v21 = vld [vmem:[#allocation26_spill] sm:$0xff] }
 0x704   :  { %2570 = vmatmul.mubr.bf16.vlgmr.msra.gmra.mrb[76].mxu0 %v5473_v30  ;;  %2611 = vmatmul.mubr.bf16.vlgmr.msra.gmra.mrb[76].mxu1 %v5473_v30  ;;  %v6844_v30 = vld [vmem:[#allocation28_spill] sm:$0xff] }
 0x705   :  { %2668 = vmatpush1.bf16.msra.mxu0 %v6834_v43  ;;  %2709 = vmatpush1.bf16.msra.mxu1 %v6835_v14  ;;  %v6845_v43 = vld [vmem:[#allocation29_spill] sm:$0xff]  ;;  %v6846_v14 = vld [vmem:[#allocation30_spill] sm:$0xff] }
 0x706   :  { %2669 = vmatprep.subr.bf16.mxu0 %v6836_v4  ;;  %2710 = vmatprep.subr.bf16.mxu1 %v6837_v9  ;;  %v6847_v4 = vld [vmem:[#allocation31_spill] sm:$0xff]  ;;  %v6848_v9 = vld [vmem:[#allocation32_spill] sm:$0xff] }
 0x709   :  { %2670 = vmatpush1.bf16.msra.mxu0 %v6838_v26  ;;  %2711 = vmatpush1.bf16.msra.mxu1 %v6839_v3  ;;  %v6849_v26 = vld [vmem:[#allocation33_spill] sm:$0xff]  ;;  %v6850_v3 = vld [vmem:[#allocation34_spill] sm:$0xff] }
 0x70a   :  { %2671 = vmatprep.subr.bf16.mxu0 %v6840_v34  ;;  %2712 = vmatprep.subr.bf16.mxu1 %v6841_v24  ;;  %v6851_v34 = vld [vmem:[#allocation35_spill] sm:$0xff]  ;;  %v6852_v24 = vld [vmem:[#allocation36_spill] sm:$0xff] }
 0x70d   :  { %2672 = vmatpush1.bf16.msra.mxu0 %v6842_v21  ;;  %2713 = vmatpush1.bf16.msra.mxu1 %v6843_v1  ;;  %v6853_v21 = vld [vmem:[#allocation37_spill] sm:$0xff]  ;;  %v6854_v1 = vld [vmem:[#allocation38_spill] sm:$0xff] }
 0x70e   :  { %2673 = vmatprep.subr.bf16.mxu0 %v6844_v30  ;;  %2714 = vmatprep.subr.bf16.mxu1 %v6845_v43  ;;  %v6855_v30 = vld [vmem:[#allocation39_spill] sm:$0xff]  ;;  %v6856_v43 = vld [vmem:[#allocation40_spill] sm:$0xff] }
 0x711   :  { %2674 = vmatpush1.bf16.msra.mxu0 %v6846_v14  ;;  %2715 = vmatpush1.bf16.msra.mxu1 %v6847_v4  ;;  %v6857_v14 = vld [vmem:[#allocation41_spill] sm:$0xff]  ;;  %v6858_v4 = vld [vmem:[#allocation42_spill] sm:$0xff] }
 0x712   :  { %2675 = vmatprep.subr.bf16.mxu0 %v6848_v9  ;;  %2716 = vmatprep.subr.bf16.mxu1 %v6849_v26  ;;  %v6859_v9 = vld [vmem:[#allocation43_spill] sm:$0xff]  ;;  %v6860_v26 = vld [vmem:[#allocation44_spill] sm:$0xff] }
 0x715   :  { %2676 = vmatpush1.bf16.msra.mxu0 %v6850_v3  ;;  %2717 = vmatpush1.bf16.msra.mxu1 %v6851_v34  ;;  %v6861_v3 = vld [vmem:[#allocation45_spill] sm:$0xff]  ;;  %v6862_v34 = vld [vmem:[#allocation46_spill] sm:$0xff] }
 0x716   :  { %2677 = vmatprep.subr.bf16.mxu0 %v6852_v24  ;;  %2718 = vmatprep.subr.bf16.mxu1 %v6853_v21  ;;  %v6863_v24 = vld [vmem:[#allocation47_spill] sm:$0xff]  ;;  %v6864_v21 = vld [vmem:[#allocation48_spill] sm:$0xff] }
 0x719   :  { %2678 = vmatpush1.bf16.msra.mxu0 %v6854_v1  ;;  %2719 = vmatpush1.bf16.msra.mxu1 %v6855_v30  ;;  %v6865_v1 = vld [vmem:[#allocation49_spill] sm:$0xff]  ;;  %v6866_v30 = vld [vmem:[#allocation50_spill] sm:$0xff] }
 0x71a   :  { %2679 = vmatprep.subr.bf16.mxu0 %v6856_v43  ;;  %2720 = vmatprep.subr.bf16.mxu1 %v6857_v14  ;;  %v6867_v43 = vld [vmem:[#allocation51_spill] sm:$0xff]  ;;  %v6868_v14 = vld [vmem:[#allocation52_spill] sm:$0xff] }
 0x71d   :  { %2680 = vmatpush1.bf16.msra.mxu0 %v6858_v4  ;;  %2721 = vmatpush1.bf16.msra.mxu1 %v6859_v9  ;;  %v6869_v4 = vld [vmem:[#allocation53_spill] sm:$0xff]  ;;  %v6870_v9 = vld [vmem:[#allocation54_spill] sm:$0xff] }
 0x71e   :  { %2681 = vmatprep.subr.bf16.mxu0 %v6860_v26  ;;  %2722 = vmatprep.subr.bf16.mxu1 %v6861_v3  ;;  %v6871_v26 = vld [vmem:[#allocation55_spill] sm:$0xff]  ;;  %v6872_v3 = vld [vmem:[#allocation56_spill] sm:$0xff] }
 0x721   :  { %2682 = vmatpush1.bf16.msra.mxu0 %v6862_v34  ;;  %2723 = vmatpush1.bf16.msra.mxu1 %v6863_v24  ;;  %v6873_v34 = vld [vmem:[#allocation57_spill] sm:$0xff]  ;;  %v6874_v24 = vld [vmem:[#allocation58_spill] sm:$0xff] }
 0x722   :  { %2683 = vmatprep.subr.bf16.mxu0 %v6864_v21  ;;  %2724 = vmatprep.subr.bf16.mxu1 %v6865_v1  ;;  %v6875_v21 = vld [vmem:[#allocation59_spill] sm:$0xff]  ;;  %v6876_v1 = vld [vmem:[#allocation60_spill] sm:$0xff] }
 0x725   :  { %2684 = vmatpush1.bf16.msra.mxu0 %v6866_v30  ;;  %2725 = vmatpush1.bf16.msra.mxu1 %v6867_v43  ;;  %v6877_v30 = vld [vmem:[#allocation61_spill] sm:$0xff]  ;;  %v6878_v43 = vld [vmem:[#allocation62_spill] sm:$0xff] }
 0x726   :  { %2685 = vmatprep.subr.bf16.mxu0 %v6868_v14  ;;  %2726 = vmatprep.subr.bf16.mxu1 %v6869_v4  ;;  %v6879_v14 = vld [vmem:[#allocation63_spill] sm:$0xff]  ;;  %v6880_v4 = vld [vmem:[#allocation64_spill] sm:$0xff] }
 0x729   :  { %2686 = vmatpush1.bf16.msra.mxu0 %v6870_v9  ;;  %2727 = vmatpush1.bf16.msra.mxu1 %v6871_v26  ;;  %v6881_v9 = vld [vmem:[#allocation65_spill] sm:$0xff]  ;;  %v6882_v26 = vld [vmem:[#allocation66_spill] sm:$0xff] }
 0x72a   :  { %2687 = vmatprep.subr.bf16.mxu0 %v6872_v3  ;;  %2728 = vmatprep.subr.bf16.mxu1 %v6873_v34  ;;  %v6883_v3 = vld [vmem:[#allocation67_spill] sm:$0xff]  ;;  %v6884_v34 = vld [vmem:[#allocation68_spill] sm:$0xff] }
 0x72d   :  { %2688 = vmatpush1.bf16.msra.mxu0 %v6874_v24  ;;  %2729 = vmatpush1.bf16.msra.mxu1 %v6875_v21  ;;  %v6885_v24 = vld [vmem:[#allocation69_spill] sm:$0xff]  ;;  %v6886_v21 = vld [vmem:[#allocation70_spill] sm:$0xff] }
 0x72e   :  { %2689 = vmatprep.subr.bf16.mxu0 %v6876_v1  ;;  %2730 = vmatprep.subr.bf16.mxu1 %v6877_v30  ;;  %v6887_v1 = vld [vmem:[#allocation71_spill] sm:$0xff]  ;;  %v6888_v30 = vld [vmem:[#allocation72_spill] sm:$0xff] }
 0x731   :  { %2690 = vmatpush1.bf16.msra.mxu0 %v6878_v43  ;;  %2731 = vmatpush1.bf16.msra.mxu1 %v6879_v14  ;;  %v6889_v43 = vld [vmem:[#allocation73_spill] sm:$0xff]  ;;  %v6890_v14 = vld [vmem:[#allocation74_spill] sm:$0xff] }
 0x732   :  { %2691 = vmatprep.subr.bf16.mxu0 %v6880_v4  ;;  %2732 = vmatprep.subr.bf16.mxu1 %v6881_v9  ;;  %v6891_v4 = vld [vmem:[#allocation75_spill] sm:$0xff]  ;;  %v6892_v9 = vld [vmem:[#allocation76_spill] sm:$0xff] }
 0x735   :  { %2692 = vmatpush1.bf16.msra.mxu0 %v6882_v26  ;;  %2733 = vmatpush1.bf16.msra.mxu1 %v6883_v3  ;;  %v6893_v26 = vld [vmem:[#allocation77_spill] sm:$0xff]  ;;  %v6894_v3 = vld [vmem:[#allocation78_spill] sm:$0xff] }
 0x736   :  { %2693 = vmatprep.subr.bf16.mxu0 %v6884_v34  ;;  %2734 = vmatprep.subr.bf16.mxu1 %v6885_v24  ;;  %v6895_v34 = vld [vmem:[#allocation79_spill] sm:$0xff]  ;;  %v6896_v24 = vld [vmem:[#allocation80_spill] sm:$0xff] }
 0x739   :  { %2694 = vmatpush1.bf16.msra.mxu0 %v6886_v21  ;;  %2735 = vmatpush1.bf16.msra.mxu1 %v6887_v1  ;;  %v6897_v21 = vld [vmem:[#allocation81_spill] sm:$0xff] }
 0x73a   :  { %2695 = vmatprep.subr.bf16.mxu0 %v6888_v30  ;;  %2736 = vmatprep.subr.bf16.mxu1 %v6889_v43 }
 0x73d   :  { %2696 = vmatpush1.bf16.msra.mxu0 %v6890_v14  ;;  %2737 = vmatpush1.bf16.msra.mxu1 %v6891_v4 }
 0x73e   :  { %2697 = vmatprep.subr.bf16.mxu0 %v6892_v9  ;;  %2738 = vmatprep.subr.bf16.mxu1 %v6893_v26 }
 0x741   :  { %2698 = vmatpush1.bf16.msra.mxu0 %v6894_v3  ;;  %2739 = vmatpush1.bf16.msra.mxu1 %v6895_v34 }
 0x742   :  { %2749 = vmatprep.subr.bf16.mxu0 %v6896_v24  ;;  %2790 = vmatprep.subr.bf16.mxu1 %v6897_v21 }
 0x797   :  { %v2489_v1 = vpop.f32.mrb[72].mxu0  ;;  %v2530_v30 = vpop.f32.mrb[72].mxu1 }
 0x798   :  { %v2490_v43 = vadd.f32 %v2489_v1, %v6898_v50  ;;  %v2531_v14 = vadd.f32 %v2530_v30, %v6899_v29  ;;  %v2491_v22 = vpop.f32.mrb[73].mxu0  ;;  %v2532_v4 = vpop.f32.mrb[73].mxu1  ;;  %v6902_v1 = vld [vmem:[#allocation187_spill] sm:$0xff] }
 0x799   :  { %v2492_v9 = vadd.f32 %v2491_v22, %v6900_v57  ;;  %v2533_v26 = vadd.f32 %v2532_v4, %v6901_v62  ;;  %v2493_v54 = vpop.f32.mrb[74].mxu0  ;;  %v2534_v3 = vpop.f32.mrb[74].mxu1 }
 0x79a   :  { %v2494_v33 = vpop.f32.mrb[75].mxu0  ;;  %v2535_v34 = vpop.f32.mrb[75].mxu1  ;;  %v2627_v20 = vmul.f32 0.5, %v2531_v14  ;;  %v2619_v36 = vmul.f32 0.5, %v2490_v43  ;;  %v6904_v54 = vld [vmem:[#allocation189_spill] sm:$0xff] }
 0x79b   :  { %v2628_v24 = vmul.f32 0.5, %v2533_v26  ;;  %v2620_v21 = vmul.f32 0.5, %v2492_v9  ;;  %v6905_v33 = vld [vmem:[#allocation191_spill] sm:$0xff] }
 0x79c   :  { %3772 = vtanh.f32 %v2627_v20 }
 0x79d   :  { %3774 = vtanh.f32 %v2628_v24 }
 0x79e   :  { %3776 = vtanh.f32 %v2619_v36 }
 0x79f   :  { %3778 = vtanh.f32 %v2620_v21 }
 0x7a6   :  { %v3773_v43 = vpop.eup %3772 }
 0x7a7   :  { %v3775_v36 = vpop.eup %3774  ;;  %v2631_v9 = vmul.f32 0.5, %v3773_v43 }
 0x7a8   :  { %v3777_v21 = vpop.eup %3776 }
 0x7a9   :  { %v3779_v4 = vpop.eup %3778  ;;  %v2633_v19 = vadd.f32 0.5, %v2631_v9 }
 0x7aa   :  { %v2624_v5 = vmul.f32 0.5, %v3779_v4 }
 0x7d7   :  { %v2571_v50 = vpop.f32.mrb[76].mxu0  ;;  %v2612_v29 = vpop.f32.mrb[76].mxu1 }
 0x7d8   :  { %v2572_v30 = vadd.f32 %v2571_v50, %v6902_v1  ;;  %v2613_v57 = vadd.f32 %v2612_v29, %v6903_v44  ;;  %v2573_v22 = vpop.f32.mrb[77].mxu0  ;;  %v2614_v62 = vpop.f32.mrb[77].mxu1  ;;  %v2632_v1 = vmul.f32 0.5, %v3775_v36  ;;  %v2623_v29 = vmul.f32 0.5, %v3777_v21 }
 0x7d9   :  { %v2574_v3 = vadd.f32 %v2573_v22, %v6904_v54  ;;  %v2615_v34 = vadd.f32 %v2614_v62, %v6905_v33  ;;  %v2575_v14 = vpop.f32.mrb[78].mxu0  ;;  %v2616_v26 = vpop.f32.mrb[78].mxu1  ;;  %v2626_v33 = vadd.f32 0.5, %v2624_v5 }
 0x7da   :  { %3780 = vtanh.f32 %v2572_v30  ;;  %v2576_v20 = vpop.f32.mrb[79].mxu0  ;;  %v2617_v24 = vpop.f32.mrb[79].mxu1  ;;  %v2637_v50 = vmul.f32 0.5, %v2613_v57  ;;  %v2634_v22 = vadd.f32 0.5, %v2632_v1  ;;  %v2625_v62 = vadd.f32 0.5, %v2623_v29 }
 0x7db   :  { %3782 = vtanh.f32 %v2574_v3  ;;  %v2638_v44 = vmul.f32 0.5, %v2615_v34  ;;  %v2645_v14 = vmul.f32 %v2633_v19, %v5461_v0 }
 0x7dc   :  { %3784 = vtanh.f32 %v2637_v50  ;;  %v2646_v3 = vmul.f32 %v2634_v22, %v5463_v35  ;;  %v6908_v22 = vld [vmem:[#allocation121_spill] sm:$0xff] }
 0x7dd   :  { %3786 = vtanh.f32 %v2638_v44 }
 0x7e4   :  { %v3781_v54 = vpop.eup %3780 }
 0x7e5   :  { %v3783_v30 = vpop.eup %3782  ;;  %v2647_v26 = vmul.f32 %v3781_v54, %v2625_v62  ;;  %v6909_v62 = vld [vmem:[#allocation122_spill] sm:$0xff]  ;;  %v6910_v54 = vld [vmem:[#allocation123_spill] sm:$0xff] }
 0x7e6   :  { %v2648_v20 = vmul.f32 %v3783_v30, %v2626_v33  ;;  %v3785_v34 = vpop.eup %3784  ;;  %v6911_v33 = vld [vmem:[#allocation124_spill] sm:$0xff]  ;;  %v6912_v30 = vld [vmem:[#allocation125_spill] sm:$0xff] }
 0x7e7   :  { %v5617_v43 = vadd.f32 %v2647_v26, %v2645_v14  ;;  %v3787_v24 = vpop.eup %3786  ;;  %v2641_v36 = vmul.f32 0.5, %v3785_v34  ;;  %v6913_v14 = vld [vmem:[#allocation126_spill] sm:$0xff]  ;;  %v6914_v26 = vld [vmem:[#allocation127_spill] sm:$0xff] }
 0x7e8   :  { %v5619_v57 = vadd.f32 %v2648_v20, %v2646_v3  ;;  %v2642_v21 = vmul.f32 0.5, %v3787_v24  ;;  %v6915_v3 = vld [vmem:[#allocation128_spill] sm:$0xff]  ;;  %v6916_v20 = vld [vmem:[#allocation129_spill] sm:$0xff]  ;;  %v6917_v34 = vld [vmem:[#allocation130_spill] sm:$0xff] }
 0x7e9   :  { %3788 = vtanh.f32 %v5617_v43  ;;  %v2643_v5 = vadd.f32 0.5, %v2641_v36  ;;  %v6918_v24 = vld [vmem:[#allocation131_spill] sm:$0xff]  ;;  %v6919_v36 = vld [vmem:[#allocation132_spill] sm:$0xff] }
 0x7ea   :  { %3790 = vtanh.f32 %v5619_v57  ;;  %v2644_v9 = vadd.f32 0.5, %v2642_v21  ;;  %v6920_v21 = vld [vmem:[#allocation133_spill] sm:$0xff] }
 0x7f3   :  { %v3789_v4 = vpop.eup %3788 }
 0x7f4   :  { %v3791_v0 = vpop.eup %3790  ;;  %v2653_v19 = vmul.f32 %v3789_v4, %v2643_v5  ;;  %v6921_v5 = vld [vmem:[#allocation134_spill] sm:$0xff]  ;;  %v6922_v4 = vld [vmem:[#allocation135_spill] sm:$0xff] }
 0x7f5   :  { %v2654_v50 = vmul.f32 %v3791_v0, %v2644_v9  ;;  %v6923_v9 = vld [vmem:[#allocation136_spill] sm:$0xff]  ;;  %v6924_v0 = vld [vmem:[#allocation137_spill] sm:$0xff] }
 0x7f6   :  { %v5624_v35 = vadd.f32 %v2653_v19, %v5468_v32  ;;  %v5629_v29 = vpack.c.bf16 %v2653_v19, %v2653_v19  ;;  %v6906_v32 = vld [vmem:[#allocation119_spill] sm:$0xff]  ;;  %v6925_v19 = vld [vmem:[#allocation138_spill] sm:$0xff] }
 0x7f7   :  { %v5627_v1 = vadd.f32 %v2654_v50, %v5471_v41  ;;  %v2666_v44 = vpack.c.bf16 %v2654_v50, %v2654_v50  ;;  %v6907_v41 = vld [vmem:[#allocation120_spill] sm:$0xff]  ;;  %v6926_v50 = vld [vmem:[#allocation139_spill] sm:$0xff] }
 0x7f9   :  { %2699 = vmatprep.mubr.bf16.mxu0 %v2666_v44  ;;  %2740 = vmatprep.mubr.bf16.mxu1 %v2666_v44 }
 0x7fa   :  { %2700 = vmatmul.mubr.bf16.vlgmr.msra.gmra.mrb[80].mxu0 %v5629_v29  ;;  %2741 = vmatmul.mubr.bf16.vlgmr.msra.gmra.mrb[80].mxu1 %v5629_v29 }
 0x7fb   :  { %2750 = vmatpush1.bf16.msra.mxu0 %v6406_v42  ;;  %2791 = vmatpush1.bf16.msra.mxu1 %v6407_v10 }
 0x7fc   :  { %2781 = vmatprep.mubr.bf16.mxu0 %v2666_v44  ;;  %2822 = vmatprep.mubr.bf16.mxu1 %v2666_v44  ;;  %v6927_v44 = vld [vmem:[#allocation140_spill] sm:$0xff] }
 0x7fd   :  { %2751 = vmatprep.subr.bf16.mxu0 %v6408_v53  ;;  %2792 = vmatprep.subr.bf16.mxu1 %v6409_v28 }
 0x7ff   :  { %2752 = vmatpush1.bf16.msra.mxu0 %v6410_v45  ;;  %2793 = vmatpush1.bf16.msra.mxu1 %v6411_v6 }
 0x800   :  { %2753 = vmatprep.subr.bf16.mxu0 %v6412_v27  ;;  %2794 = vmatprep.subr.bf16.mxu1 %v6413_v46 }
 0x803   :  { %2754 = vmatpush1.bf16.msra.mxu0 %v6414_v39  ;;  %2795 = vmatpush1.bf16.msra.mxu1 %v6415_v31 }
 0x804   :  { %2755 = vmatprep.subr.bf16.mxu0 %v6416_v7  ;;  %2796 = vmatprep.subr.bf16.mxu1 %v6417_v17 }
 0x807   :  { %2756 = vmatpush1.bf16.msra.mxu0 %v6418_v61  ;;  %2797 = vmatpush1.bf16.msra.mxu1 %v6419_v51 }
 0x808   :  { %2757 = vmatprep.subr.bf16.mxu0 %v6420_v59  ;;  %2798 = vmatprep.subr.bf16.mxu1 %v6421_v60 }
 0x80b   :  { %2758 = vmatpush1.bf16.msra.mxu0 %v6422_v18  ;;  %2799 = vmatpush1.bf16.msra.mxu1 %v6423_v23 }
 0x80c   :  { %2759 = vmatprep.subr.bf16.mxu0 %v6510_v25  ;;  %2800 = vmatprep.subr.bf16.mxu1 %v6511_v56 }
 0x80f   :  { %2760 = vmatpush1.bf16.msra.mxu0 %v6512_v55  ;;  %2801 = vmatpush1.bf16.msra.mxu1 %v6513_v49 }
 0x810   :  { %2761 = vmatprep.subr.bf16.mxu0 %v6514_v48  ;;  %2802 = vmatprep.subr.bf16.mxu1 %v6515_v47 }
 0x813   :  { %2762 = vmatpush1.bf16.msra.mxu0 %v6516_v2  ;;  %2803 = vmatpush1.bf16.msra.mxu1 %v6517_v8 }
 0x814   :  { %2763 = vmatprep.subr.bf16.mxu0 %v6518_v15  ;;  %2804 = vmatprep.subr.bf16.mxu1 %v6519_v11 }
 0x817   :  { %2764 = vmatpush1.bf16.msra.mxu0 %v6520_v40  ;;  %2805 = vmatpush1.bf16.msra.mxu1 %v6521_v16 }
 0x818   :  { %2765 = vmatprep.subr.bf16.mxu0 %v6522_v58  ;;  %2806 = vmatprep.subr.bf16.mxu1 %v6523_v37 }
 0x81b   :  { %2766 = vmatpush1.bf16.msra.mxu0 %v6524_v63  ;;  %2807 = vmatpush1.bf16.msra.mxu1 %v6525_v38 }
 0x81c   :  { %2767 = vmatprep.subr.bf16.mxu0 %v6526_v12  ;;  %2808 = vmatprep.subr.bf16.mxu1 %v6527_v13 }
 0x81f   :  { %2768 = vmatpush1.bf16.msra.mxu0 %v6528_v52  ;;  %2809 = vmatpush1.bf16.msra.mxu1 %v6906_v32 }
 0x820   :  { %2769 = vmatprep.subr.bf16.mxu0 %v6907_v41  ;;  %2810 = vmatprep.subr.bf16.mxu1 %v6908_v22  ;;  %v7002_v22 = vld [vmem:[#allocation194_spill] sm:$0xff] }
 0x823   :  { %2770 = vmatpush1.bf16.msra.mxu0 %v6909_v62  ;;  %2811 = vmatpush1.bf16.msra.mxu1 %v6910_v54 }
 0x824   :  { %2771 = vmatprep.subr.bf16.mxu0 %v6911_v33  ;;  %2812 = vmatprep.subr.bf16.mxu1 %v6912_v30 }
 0x827   :  { %2772 = vmatpush1.bf16.msra.mxu0 %v6913_v14  ;;  %2813 = vmatpush1.bf16.msra.mxu1 %v6914_v26  ;;  %v6999_v26 = vld [vmem:[#allocation165_spill] sm:$0xff]  ;;  %v7000_v14 = vld [vmem:[#allocation168_spill] sm:$0xff] }
 0x828   :  { %2773 = vmatprep.subr.bf16.mxu0 %v6915_v3  ;;  %2814 = vmatprep.subr.bf16.mxu1 %v6916_v20  ;;  %v6998_v20 = vld [vmem:[#allocation166_spill] sm:$0xff] }
 0x82b   :  { %2774 = vmatpush1.bf16.msra.mxu0 %v6917_v34  ;;  %2815 = vmatpush1.bf16.msra.mxu1 %v6918_v24  ;;  %v6928_v34 = vld [vmem:[#allocation141_spill] sm:$0xff]  ;;  %v6929_v24 = vld [vmem:[#allocation142_spill] sm:$0xff] }
 0x82c   :  { %2775 = vmatprep.subr.bf16.mxu0 %v6919_v36  ;;  %2816 = vmatprep.subr.bf16.mxu1 %v6920_v21  ;;  %v6930_v36 = vld [vmem:[#allocation143_spill] sm:$0xff]  ;;  %v6931_v21 = vld [vmem:[#allocation16_spill] sm:$0xff] }
 0x82f   :  { %2776 = vmatpush1.bf16.msra.mxu0 %v6921_v5  ;;  %2817 = vmatpush1.bf16.msra.mxu1 %v6922_v4  ;;  %v6932_v5 = vld [vmem:[#allocation17_spill] sm:$0xff]  ;;  %v6997_v4 = vld [vmem:[#allocation164_spill] sm:$0xff] }
 0x830   :  { %2777 = vmatprep.subr.bf16.mxu0 %v6923_v9  ;;  %2818 = vmatprep.subr.bf16.mxu1 %v6924_v0  ;;  %v6933_v0 = vld [vmem:[#allocation18_spill] sm:$0xff]  ;;  %v6942_v9 = vld [vmem:[#allocation27_spill] sm:$0xff] }
 0x833   :  { %2778 = vmatpush1.bf16.msra.mxu0 %v6925_v19  ;;  %2819 = vmatpush1.bf16.msra.mxu1 %v6926_v50  ;;  %v6934_v19 = vld [vmem:[#allocation19_spill] sm:$0xff]  ;;  %v6935_v50 = vld [vmem:[#allocation20_spill] sm:$0xff] }
 0x834   :  { %2779 = vmatprep.subr.bf16.mxu0 %v6927_v44  ;;  %2820 = vmatprep.subr.bf16.mxu1 %v6928_v34  ;;  %v6936_v44 = vld [vmem:[#allocation21_spill] sm:$0xff]  ;;  %v6937_v34 = vld [vmem:[#allocation22_spill] sm:$0xff] }
 0x837   :  { %2780 = vmatpush1.bf16.msra.mxu0 %v6929_v24  ;;  %2821 = vmatpush1.bf16.msra.mxu1 %v6930_v36  ;;  %v6938_v24 = vld [vmem:[#allocation23_spill] sm:$0xff]  ;;  %v6939_v36 = vld [vmem:[#allocation24_spill] sm:$0xff] }
 0x838   :  { %2879 = vmatprep.subr.bf16.mxu0 %v6931_v21  ;;  %2920 = vmatprep.subr.bf16.mxu1 %v6932_v5  ;;  %v6940_v21 = vld [vmem:[#allocation25_spill] sm:$0xff]  ;;  %v6941_v5 = vld [vmem:[#allocation26_spill] sm:$0xff] }
 0x83a   :  { %2782 = vmatmul.mubr.bf16.vlgmr.msra.gmra.mrb[84].mxu0 %v5629_v29  ;;  %2823 = vmatmul.mubr.bf16.vlgmr.msra.gmra.mrb[84].mxu1 %v5629_v29  ;;  %v6943_v29 = vld [vmem:[#allocation28_spill] sm:$0xff] }
 0x83b   :  { %2880 = vmatpush1.bf16.msra.mxu0 %v6933_v0  ;;  %2921 = vmatpush1.bf16.msra.mxu1 %v6934_v19  ;;  %v6944_v0 = vld [vmem:[#allocation29_spill] sm:$0xff]  ;;  %v6945_v19 = vld [vmem:[#allocation30_spill] sm:$0xff] }
 0x83c   :  { %2881 = vmatprep.subr.bf16.mxu0 %v6935_v50  ;;  %2922 = vmatprep.subr.bf16.mxu1 %v6936_v44  ;;  %v6946_v50 = vld [vmem:[#allocation31_spill] sm:$0xff]  ;;  %v6947_v44 = vld [vmem:[#allocation32_spill] sm:$0xff] }
 0x83f   :  { %2882 = vmatpush1.bf16.msra.mxu0 %v6937_v34  ;;  %2923 = vmatpush1.bf16.msra.mxu1 %v6938_v24  ;;  %v6948_v34 = vld [vmem:[#allocation33_spill] sm:$0xff]  ;;  %v6949_v24 = vld [vmem:[#allocation34_spill] sm:$0xff] }
 0x840   :  { %2883 = vmatprep.subr.bf16.mxu0 %v6939_v36  ;;  %2924 = vmatprep.subr.bf16.mxu1 %v6940_v21  ;;  %v6950_v36 = vld [vmem:[#allocation35_spill] sm:$0xff]  ;;  %v6951_v21 = vld [vmem:[#allocation36_spill] sm:$0xff] }
 0x843   :  { %2884 = vmatpush1.bf16.msra.mxu0 %v6941_v5  ;;  %2925 = vmatpush1.bf16.msra.mxu1 %v6942_v9  ;;  %v6952_v5 = vld [vmem:[#allocation37_spill] sm:$0xff]  ;;  %v6953_v9 = vld [vmem:[#allocation38_spill] sm:$0xff] }
 0x844   :  { %2885 = vmatprep.subr.bf16.mxu0 %v6943_v29  ;;  %2926 = vmatprep.subr.bf16.mxu1 %v6944_v0  ;;  %v6954_v29 = vld [vmem:[#allocation39_spill] sm:$0xff]  ;;  %v6955_v0 = vld [vmem:[#allocation40_spill] sm:$0xff] }
 0x847   :  { %2886 = vmatpush1.bf16.msra.mxu0 %v6945_v19  ;;  %2927 = vmatpush1.bf16.msra.mxu1 %v6946_v50  ;;  %v6956_v19 = vld [vmem:[#allocation41_spill] sm:$0xff]  ;;  %v6957_v50 = vld [vmem:[#allocation42_spill] sm:$0xff] }
 0x848   :  { %2887 = vmatprep.subr.bf16.mxu0 %v6947_v44  ;;  %2928 = vmatprep.subr.bf16.mxu1 %v6948_v34  ;;  %v6958_v44 = vld [vmem:[#allocation43_spill] sm:$0xff]  ;;  %v6959_v34 = vld [vmem:[#allocation44_spill] sm:$0xff] }
 0x84b   :  { %2888 = vmatpush1.bf16.msra.mxu0 %v6949_v24  ;;  %2929 = vmatpush1.bf16.msra.mxu1 %v6950_v36  ;;  %v6960_v24 = vld [vmem:[#allocation45_spill] sm:$0xff]  ;;  %v6961_v36 = vld [vmem:[#allocation46_spill] sm:$0xff] }
 0x84c   :  { %2889 = vmatprep.subr.bf16.mxu0 %v6951_v21  ;;  %2930 = vmatprep.subr.bf16.mxu1 %v6952_v5  ;;  %v6962_v21 = vld [vmem:[#allocation47_spill] sm:$0xff]  ;;  %v6963_v5 = vld [vmem:[#allocation48_spill] sm:$0xff] }
 0x84f   :  { %2890 = vmatpush1.bf16.msra.mxu0 %v6953_v9  ;;  %2931 = vmatpush1.bf16.msra.mxu1 %v6954_v29  ;;  %v6964_v9 = vld [vmem:[#allocation49_spill] sm:$0xff]  ;;  %v6965_v29 = vld [vmem:[#allocation50_spill] sm:$0xff] }
 0x850   :  { %2891 = vmatprep.subr.bf16.mxu0 %v6955_v0  ;;  %2932 = vmatprep.subr.bf16.mxu1 %v6956_v19  ;;  %v6966_v0 = vld [vmem:[#allocation51_spill] sm:$0xff]  ;;  %v6967_v19 = vld [vmem:[#allocation52_spill] sm:$0xff] }
 0x853   :  { %2892 = vmatpush1.bf16.msra.mxu0 %v6957_v50  ;;  %2933 = vmatpush1.bf16.msra.mxu1 %v6958_v44  ;;  %v6968_v50 = vld [vmem:[#allocation53_spill] sm:$0xff]  ;;  %v6969_v44 = vld [vmem:[#allocation54_spill] sm:$0xff] }
 0x854   :  { %2893 = vmatprep.subr.bf16.mxu0 %v6959_v34  ;;  %2934 = vmatprep.subr.bf16.mxu1 %v6960_v24  ;;  %v6970_v34 = vld [vmem:[#allocation55_spill] sm:$0xff]  ;;  %v6971_v24 = vld [vmem:[#allocation56_spill] sm:$0xff] }
 0x857   :  { %2894 = vmatpush1.bf16.msra.mxu0 %v6961_v36  ;;  %2935 = vmatpush1.bf16.msra.mxu1 %v6962_v21  ;;  %v6972_v36 = vld [vmem:[#allocation57_spill] sm:$0xff]  ;;  %v6973_v21 = vld [vmem:[#allocation58_spill] sm:$0xff] }
 0x858   :  { %2895 = vmatprep.subr.bf16.mxu0 %v6963_v5  ;;  %2936 = vmatprep.subr.bf16.mxu1 %v6964_v9  ;;  %v6974_v5 = vld [vmem:[#allocation59_spill] sm:$0xff]  ;;  %v6975_v9 = vld [vmem:[#allocation60_spill] sm:$0xff] }
 0x85b   :  { %2896 = vmatpush1.bf16.msra.mxu0 %v6965_v29  ;;  %2937 = vmatpush1.bf16.msra.mxu1 %v6966_v0  ;;  %v6976_v29 = vld [vmem:[#allocation61_spill] sm:$0xff]  ;;  %v6977_v0 = vld [vmem:[#allocation62_spill] sm:$0xff] }
 0x85c   :  { %2897 = vmatprep.subr.bf16.mxu0 %v6967_v19  ;;  %2938 = vmatprep.subr.bf16.mxu1 %v6968_v50  ;;  %v6978_v19 = vld [vmem:[#allocation63_spill] sm:$0xff]  ;;  %v6979_v50 = vld [vmem:[#allocation64_spill] sm:$0xff] }
 0x85f   :  { %2898 = vmatpush1.bf16.msra.mxu0 %v6969_v44  ;;  %2939 = vmatpush1.bf16.msra.mxu1 %v6970_v34  ;;  %v6980_v44 = vld [vmem:[#allocation65_spill] sm:$0xff]  ;;  %v6981_v34 = vld [vmem:[#allocation66_spill] sm:$0xff] }
 0x860   :  { %2899 = vmatprep.subr.bf16.mxu0 %v6971_v24  ;;  %2940 = vmatprep.subr.bf16.mxu1 %v6972_v36  ;;  %v6982_v24 = vld [vmem:[#allocation67_spill] sm:$0xff]  ;;  %v6983_v36 = vld [vmem:[#allocation68_spill] sm:$0xff] }
 0x863   :  { %2900 = vmatpush1.bf16.msra.mxu0 %v6973_v21  ;;  %2941 = vmatpush1.bf16.msra.mxu1 %v6974_v5  ;;  %v6984_v21 = vld [vmem:[#allocation69_spill] sm:$0xff]  ;;  %v6985_v5 = vld [vmem:[#allocation70_spill] sm:$0xff] }
 0x864   :  { %2901 = vmatprep.subr.bf16.mxu0 %v6975_v9  ;;  %2942 = vmatprep.subr.bf16.mxu1 %v6976_v29  ;;  %v6986_v9 = vld [vmem:[#allocation71_spill] sm:$0xff]  ;;  %v6987_v29 = vld [vmem:[#allocation72_spill] sm:$0xff] }
 0x867   :  { %2902 = vmatpush1.bf16.msra.mxu0 %v6977_v0  ;;  %2943 = vmatpush1.bf16.msra.mxu1 %v6978_v19  ;;  %v6988_v0 = vld [vmem:[#allocation73_spill] sm:$0xff]  ;;  %v6989_v19 = vld [vmem:[#allocation74_spill] sm:$0xff] }
 0x868   :  { %2903 = vmatprep.subr.bf16.mxu0 %v6979_v50  ;;  %2944 = vmatprep.subr.bf16.mxu1 %v6980_v44  ;;  %v6990_v50 = vld [vmem:[#allocation75_spill] sm:$0xff]  ;;  %v6991_v44 = vld [vmem:[#allocation76_spill] sm:$0xff] }
 0x86b   :  { %2904 = vmatpush1.bf16.msra.mxu0 %v6981_v34  ;;  %2945 = vmatpush1.bf16.msra.mxu1 %v6982_v24  ;;  %v6992_v34 = vld [vmem:[#allocation77_spill] sm:$0xff]  ;;  %v6993_v24 = vld [vmem:[#allocation78_spill] sm:$0xff] }
 0x86c   :  { %2905 = vmatprep.subr.bf16.mxu0 %v6983_v36  ;;  %2946 = vmatprep.subr.bf16.mxu1 %v6984_v21  ;;  %v6994_v36 = vld [vmem:[#allocation79_spill] sm:$0xff]  ;;  %v6995_v21 = vld [vmem:[#allocation80_spill] sm:$0xff] }
 0x86f   :  { %2906 = vmatpush1.bf16.msra.mxu0 %v6985_v5  ;;  %2947 = vmatpush1.bf16.msra.mxu1 %v6986_v9  ;;  %v6996_v5 = vld [vmem:[#allocation81_spill] sm:$0xff] }
 0x870   :  { %2907 = vmatprep.subr.bf16.mxu0 %v6987_v29  ;;  %2948 = vmatprep.subr.bf16.mxu1 %v6988_v0 }
 0x873   :  { %2908 = vmatpush1.bf16.msra.mxu0 %v6989_v19  ;;  %2949 = vmatpush1.bf16.msra.mxu1 %v6990_v50 }
 0x874   :  { %2909 = vmatprep.subr.bf16.mxu0 %v6991_v44  ;;  %2950 = vmatprep.subr.bf16.mxu1 %v6992_v34 }
 0x877   :  { %2910 = vmatpush1.bf16.msra.mxu0 %v6993_v24  ;;  %2951 = vmatpush1.bf16.msra.mxu1 %v6994_v36 }
 0x878   :  { %2961 = vmatprep.subr.bf16.mxu0 %v6995_v21  ;;  %3002 = vmatprep.subr.bf16.mxu1 %v6996_v5 }
 0x8cd   :  { %v2701_v9 = vpop.f32.mrb[80].mxu0  ;;  %v2742_v29 = vpop.f32.mrb[80].mxu1 }
 0x8ce   :  { %v2702_v0 = vadd.f32 %v2701_v9, %v6997_v4  ;;  %v2743_v19 = vadd.f32 %v2742_v29, %v6998_v20  ;;  %v2703_v3 = vpop.f32.mrb[81].mxu0  ;;  %v2744_v50 = vpop.f32.mrb[81].mxu1  ;;  %v7001_v9 = vld [vmem:[#allocation192_spill] sm:$0xff] }
 0x8cf   :  { %v2704_v44 = vadd.f32 %v2703_v3, %v6999_v26  ;;  %v2745_v34 = vadd.f32 %v2744_v50, %v7000_v14  ;;  %v2705_v30 = vpop.f32.mrb[82].mxu0  ;;  %v2746_v24 = vpop.f32.mrb[82].mxu1 }
 0x8d0   :  { %v2706_v33 = vpop.f32.mrb[83].mxu0  ;;  %v2747_v36 = vpop.f32.mrb[83].mxu1  ;;  %v2839_v54 = vmul.f32 0.5, %v2743_v19  ;;  %v2831_v62 = vmul.f32 0.5, %v2702_v0  ;;  %v7003_v30 = vld [vmem:[#allocation193_spill] sm:$0xff] }
 0x8d1   :  { %v2840_v21 = vmul.f32 0.5, %v2745_v34  ;;  %v2832_v5 = vmul.f32 0.5, %v2704_v44  ;;  %v7004_v33 = vld [vmem:[#allocation196_spill] sm:$0xff] }
 0x8d2   :  { %3792 = vtanh.f32 %v2839_v54 }
 0x8d3   :  { %3794 = vtanh.f32 %v2840_v21 }
 0x8d4   :  { %3796 = vtanh.f32 %v2831_v62 }
 0x8d5   :  { %3798 = vtanh.f32 %v2832_v5 }
 0x8dc   :  { %v3793_v0 = vpop.eup %3792 }
 0x8dd   :  { %v3795_v62 = vpop.eup %3794  ;;  %v2843_v5 = vmul.f32 0.5, %v3793_v0 }
 0x8de   :  { %v3797_v36 = vpop.eup %3796 }
 0x8df   :  { %v3799_v21 = vpop.eup %3798  ;;  %v2845_v32 = vadd.f32 0.5, %v2843_v5 }
 0x8e0   :  { %v2836_v41 = vmul.f32 0.5, %v3799_v21 }
 0x90d   :  { %v2783_v4 = vpop.f32.mrb[84].mxu0  ;;  %v2824_v20 = vpop.f32.mrb[84].mxu1 }
 0x90e   :  { %v2784_v29 = vadd.f32 %v2783_v4, %v7001_v9  ;;  %v2825_v26 = vadd.f32 %v2824_v20, %v7002_v22  ;;  %v2785_v3 = vpop.f32.mrb[85].mxu0  ;;  %v2826_v14 = vpop.f32.mrb[85].mxu1  ;;  %v2844_v9 = vmul.f32 0.5, %v3795_v62  ;;  %v2835_v20 = vmul.f32 0.5, %v3797_v36 }
 0x90f   :  { %v2786_v50 = vadd.f32 %v2785_v3, %v7003_v30  ;;  %v2827_v24 = vadd.f32 %v2826_v14, %v7004_v33  ;;  %v2787_v19 = vpop.f32.mrb[86].mxu0  ;;  %v2828_v34 = vpop.f32.mrb[86].mxu1  ;;  %v2838_v33 = vadd.f32 0.5, %v2836_v41 }
 0x910   :  { %3800 = vtanh.f32 %v2784_v29  ;;  %v2788_v54 = vpop.f32.mrb[87].mxu0  ;;  %v2829_v44 = vpop.f32.mrb[87].mxu1  ;;  %v2849_v4 = vmul.f32 0.5, %v2825_v26  ;;  %v2846_v3 = vadd.f32 0.5, %v2844_v9  ;;  %v2837_v14 = vadd.f32 0.5, %v2835_v20 }
 0x911   :  { %3802 = vtanh.f32 %v2786_v50  ;;  %v2850_v22 = vmul.f32 0.5, %v2827_v24  ;;  %v2857_v19 = vmul.f32 %v2845_v32, %v5617_v43 }
 0x912   :  { %3804 = vtanh.f32 %v2849_v4  ;;  %v2858_v50 = vmul.f32 %v2846_v3, %v5619_v57  ;;  %v3662_v3 = vld [vmem:[#allocation9 + $0x78] sm:$0xff]  }
 0x913   :  { %3806 = vtanh.f32 %v2850_v22 }
 0x91a   :  { %v3801_v30 = vpop.eup %3800 }
 0x91b   :  { %v3803_v29 = vpop.eup %3802  ;;  %v2859_v34 = vmul.f32 %v3801_v30, %v2837_v14  ;;  %v3663_v14 = vld [vmem:[#allocation9 + $0x38] sm:$0xff]  }
 0x91c   :  { %v2860_v54 = vmul.f32 %v3803_v29, %v2838_v33  ;;  %v3805_v24 = vpop.eup %3804  ;;  %v3664_v30 = vld [vmem:[%s5922_s6] sm:$0xff]   ;;  %v3959_v33 = vmov 0.0   ;;  %v3665_v29 = vld [vmem:[%s5922_s6 + $0x8] sm:$0xff]  }
 0x91d   :  { %v5773_v0 = vadd.f32 %v2859_v34, %v2857_v19  ;;  %v3807_v44 = vpop.eup %3806  ;;  %v2853_v62 = vmul.f32 0.5, %v3805_v24  ;;  %v3666_v19 = vld [vmem:[%s5922_s6 + $0x10] sm:$0xff]   ;;  %v3667_v34 = vld [vmem:[%s5922_s6 + $0x18] sm:$0xff]  }
 0x91e   :  { %v5775_v26 = vadd.f32 %v2860_v54, %v2858_v50  ;;  %v2854_v36 = vmul.f32 0.5, %v3807_v44  ;;  %v3668_v50 = vld [vmem:[%s5922_s6 + $0x20] sm:$0xff]   ;;  %v3669_v54 = vld [vmem:[%s5922_s6 + $0x28] sm:$0xff]  }
 0x91f   :  { %3808 = vtanh.f32 %v5773_v0  ;;  %v2855_v41 = vadd.f32 0.5, %v2853_v62  ;;  %v7030_v62 = vld [vmem:[#allocation167_spill] sm:$0xff] }
 0x920   :  { %3810 = vtanh.f32 %v5775_v26  ;;  %v2856_v5 = vadd.f32 0.5, %v2854_v36 }
 0x929   :  { %v3809_v21 = vpop.eup %3808 }
 0x92a   :  { %v3811_v43 = vpop.eup %3810  ;;  %v2865_v32 = vmul.f32 %v3809_v21, %v2855_v41  ;;  %v7031_v41 = vld [vmem:[#allocation170_spill] sm:$0xff] }
 0x92b   :  { %v2866_v4 = vmul.f32 %v3811_v43, %v2856_v5 }
 0x92c   :  { %v5780_v57 = vadd.f32 %v2865_v32, %v5624_v35  ;;  %v5785_v20 = vpack.c.bf16 %v2865_v32, %v2865_v32  ;;  %v3660_v35 = vld [vmem:[#allocation9 + $0x70] sm:$0xff]  }
 0x92d   :  { %v2878_v9 = vpack.c.bf16 %v2866_v4, %v2866_v4  ;;  %v5783_v22 = vadd.f32 %v2866_v4, %v5627_v1  ;;  %v3661_v1 = vld [vmem:[#allocation9 + $0x30] sm:$0xff]  }
 0x92e   :  { %v7032_v32 = vld [vmem:[#allocation169_spill] sm:$0xff] }
 0x92f   :  { %2911 = vmatprep.mubr.bf16.mxu0 %v2878_v9  ;;  %2952 = vmatprep.mubr.bf16.mxu1 %v2878_v9 }
 0x930   :  { %2912 = vmatmul.mubr.bf16.vlgmr.msra.gmra.mrb[88].mxu0 %v5785_v20  ;;  %2953 = vmatmul.mubr.bf16.vlgmr.msra.gmra.mrb[88].mxu1 %v5785_v20 }
 0x931   :  { %2962 = vmatpush1.bf16.msra.mxu0 %v6406_v42  ;;  %3003 = vmatpush1.bf16.msra.mxu1 %v6407_v10  ;;  %v7005_v42 = vld [vmem:[#allocation119_spill] sm:$0xff]  ;;  %v7006_v10 = vld [vmem:[#allocation120_spill] sm:$0xff] }
 0x932   :  { %2993 = vmatprep.mubr.bf16.mxu0 %v2878_v9  ;;  %3034 = vmatprep.mubr.bf16.mxu1 %v2878_v9  ;;  %v7033_v9 = vld [vmem:[#allocation171_spill] sm:$0xff] }
 0x933   :  { %2963 = vmatprep.subr.bf16.mxu0 %v6408_v53  ;;  %3004 = vmatprep.subr.bf16.mxu1 %v6409_v28  ;;  %v7007_v53 = vld [vmem:[#allocation121_spill] sm:$0xff]  ;;  %v7008_v28 = vld [vmem:[#allocation122_spill] sm:$0xff] }
 0x935   :  { %2964 = vmatpush1.bf16.msra.mxu0 %v6410_v45  ;;  %3005 = vmatpush1.bf16.msra.mxu1 %v6411_v6  ;;  %v7009_v45 = vld [vmem:[#allocation123_spill] sm:$0xff]  ;;  %v7010_v6 = vld [vmem:[#allocation124_spill] sm:$0xff] }
 0x936   :  { %2965 = vmatprep.subr.bf16.mxu0 %v6412_v27  ;;  %3006 = vmatprep.subr.bf16.mxu1 %v6413_v46  ;;  %v7011_v27 = vld [vmem:[#allocation125_spill] sm:$0xff]  ;;  %v7012_v46 = vld [vmem:[#allocation126_spill] sm:$0xff] }
 0x939   :  { %2966 = vmatpush1.bf16.msra.mxu0 %v6414_v39  ;;  %3007 = vmatpush1.bf16.msra.mxu1 %v6415_v31  ;;  %v7013_v39 = vld [vmem:[#allocation127_spill] sm:$0xff]  ;;  %v7014_v31 = vld [vmem:[#allocation128_spill] sm:$0xff] }
 0x93a   :  { %2967 = vmatprep.subr.bf16.mxu0 %v6416_v7  ;;  %3008 = vmatprep.subr.bf16.mxu1 %v6417_v17  ;;  %v7015_v7 = vld [vmem:[#allocation129_spill] sm:$0xff]  ;;  %v7016_v17 = vld [vmem:[#allocation130_spill] sm:$0xff] }
 0x93d   :  { %2968 = vmatpush1.bf16.msra.mxu0 %v6418_v61  ;;  %3009 = vmatpush1.bf16.msra.mxu1 %v6419_v51  ;;  %v7017_v61 = vld [vmem:[#allocation131_spill] sm:$0xff]  ;;  %v7018_v51 = vld [vmem:[#allocation132_spill] sm:$0xff] }
 0x93e   :  { %2969 = vmatprep.subr.bf16.mxu0 %v6420_v59  ;;  %3010 = vmatprep.subr.bf16.mxu1 %v6421_v60  ;;  %v7019_v59 = vld [vmem:[#allocation133_spill] sm:$0xff]  ;;  %v7020_v60 = vld [vmem:[#allocation134_spill] sm:$0xff] }
 0x941   :  { %2970 = vmatpush1.bf16.msra.mxu0 %v6422_v18  ;;  %3011 = vmatpush1.bf16.msra.mxu1 %v6423_v23  ;;  %v7021_v18 = vld [vmem:[#allocation135_spill] sm:$0xff]  ;;  %v7022_v23 = vld [vmem:[#allocation136_spill] sm:$0xff] }
 0x942   :  { %2971 = vmatprep.subr.bf16.mxu0 %v6510_v25  ;;  %3012 = vmatprep.subr.bf16.mxu1 %v6511_v56  ;;  %v7023_v25 = vld [vmem:[#allocation137_spill] sm:$0xff]  ;;  %v7024_v56 = vld [vmem:[#allocation138_spill] sm:$0xff] }
 0x945   :  { %2972 = vmatpush1.bf16.msra.mxu0 %v6512_v55  ;;  %3013 = vmatpush1.bf16.msra.mxu1 %v6513_v49  ;;  %v7025_v55 = vld [vmem:[#allocation139_spill] sm:$0xff]  ;;  %v7026_v49 = vld [vmem:[#allocation140_spill] sm:$0xff] }
 0x946   :  { %2973 = vmatprep.subr.bf16.mxu0 %v6514_v48  ;;  %3014 = vmatprep.subr.bf16.mxu1 %v6515_v47  ;;  %v7027_v48 = vld [vmem:[#allocation141_spill] sm:$0xff]  ;;  %v7028_v47 = vld [vmem:[#allocation142_spill] sm:$0xff] }
 0x949   :  { %2974 = vmatpush1.bf16.msra.mxu0 %v6516_v2  ;;  %3015 = vmatpush1.bf16.msra.mxu1 %v6517_v8  ;;  %v7029_v2 = vld [vmem:[#allocation143_spill] sm:$0xff] }
 0x94a   :  { %2975 = vmatprep.subr.bf16.mxu0 %v6518_v15  ;;  %3016 = vmatprep.subr.bf16.mxu1 %v6519_v11  ;;  %v3648_v8 = vld [vmem:[#allocation9 + $0x40] sm:$0xff]   ;;  %v3650_v11 = vld [vmem:[#allocation9 + $0x48] sm:$0xff]  }
 0x94b   :  { %v3649_v15 = vld [vmem:[#allocation9] sm:$0xff]  }
 0x94d   :  { %2976 = vmatpush1.bf16.msra.mxu0 %v6520_v40  ;;  %3017 = vmatpush1.bf16.msra.mxu1 %v6521_v16  ;;  %v3651_v40 = vld [vmem:[#allocation9 + $0x8] sm:$0xff]   ;;  %v3652_v16 = vld [vmem:[#allocation9 + $0x50] sm:$0xff]  }
 0x94e   :  { %2977 = vmatprep.subr.bf16.mxu0 %v6522_v58  ;;  %3018 = vmatprep.subr.bf16.mxu1 %v6523_v37  ;;  %v3653_v58 = vld [vmem:[#allocation9 + $0x10] sm:$0xff]   ;;  %v3654_v37 = vld [vmem:[#allocation9 + $0x58] sm:$0xff]  }
 0x951   :  { %2978 = vmatpush1.bf16.msra.mxu0 %v6524_v63  ;;  %3019 = vmatpush1.bf16.msra.mxu1 %v6525_v38  ;;  %v3655_v63 = vld [vmem:[#allocation9 + $0x18] sm:$0xff]   ;;  %v3656_v38 = vld [vmem:[#allocation9 + $0x60] sm:$0xff]  }
 0x952   :  { %2979 = vmatprep.subr.bf16.mxu0 %v6526_v12  ;;  %3020 = vmatprep.subr.bf16.mxu1 %v6527_v13  ;;  %v3657_v12 = vld [vmem:[#allocation9 + $0x20] sm:$0xff]   ;;  %v3658_v13 = vld [vmem:[#allocation9 + $0x68] sm:$0xff]  }
 0x955   :  { %2980 = vmatpush1.bf16.msra.mxu0 %v6528_v52  ;;  %3021 = vmatpush1.bf16.msra.mxu1 %v7005_v42  ;;  %v3659_v52 = vld [vmem:[#allocation9 + $0x28] sm:$0xff]  }
 0x956   :  { %2981 = vmatprep.subr.bf16.mxu0 %v7006_v10  ;;  %3022 = vmatprep.subr.bf16.mxu1 %v7007_v53 }
 0x959   :  { %2982 = vmatpush1.bf16.msra.mxu0 %v7008_v28  ;;  %3023 = vmatpush1.bf16.msra.mxu1 %v7009_v45 }
 0x95a   :  { %2983 = vmatprep.subr.bf16.mxu0 %v7010_v6  ;;  %3024 = vmatprep.subr.bf16.mxu1 %v7011_v27 }
 0x95d   :  { %2984 = vmatpush1.bf16.msra.mxu0 %v7012_v46  ;;  %3025 = vmatpush1.bf16.msra.mxu1 %v7013_v39 }
 0x95e   :  { %2985 = vmatprep.subr.bf16.mxu0 %v7014_v31  ;;  %3026 = vmatprep.subr.bf16.mxu1 %v7015_v7  ;;  %v7034_v7 = vld [vmem:[#allocation195_spill] sm:$0xff] }
 0x961   :  { %2986 = vmatpush1.bf16.msra.mxu0 %v7016_v17  ;;  %3027 = vmatpush1.bf16.msra.mxu1 %v7017_v61  ;;  %v7035_v61 = vld [vmem:[#allocation198_spill] sm:$0xff] }
 0x962   :  { %2987 = vmatprep.subr.bf16.mxu0 %v7018_v51  ;;  %3028 = vmatprep.subr.bf16.mxu1 %v7019_v59 }
 0x965   :  { %2988 = vmatpush1.bf16.msra.mxu0 %v7020_v60  ;;  %3029 = vmatpush1.bf16.msra.mxu1 %v7021_v18  ;;  %v7036_v18 = vld [vmem:[#allocation197_spill] sm:$0xff] }
 0x966   :  { %2989 = vmatprep.subr.bf16.mxu0 %v7022_v23  ;;  %3030 = vmatprep.subr.bf16.mxu1 %v7023_v25  ;;  %v7037_v25 = vld [vmem:[#allocation199_spill] sm:$0xff] }
 0x969   :  { %2990 = vmatpush1.bf16.msra.mxu0 %v7024_v56  ;;  %3031 = vmatpush1.bf16.msra.mxu1 %v7025_v55 }
 0x96a   :  { %2991 = vmatprep.subr.bf16.mxu0 %v7026_v49  ;;  %3032 = vmatprep.subr.bf16.mxu1 %v7027_v48 }
 0x96d   :  { %2992 = vmatpush1.bf16.msra.mxu0 %v7028_v47  ;;  %3033 = vmatpush1.bf16.msra.mxu1 %v7029_v2 }
 0x96e   :  { %3581 = vmatprep.subr.bf16.mxu0 %v3648_v8  ;;  %3612 = vmatprep.subr.bf16.mxu1 %v3959_v33 }
 0x970   :  { %2994 = vmatmul.mubr.bf16.vlgmr.msra.gmra.mrb[92].mxu0 %v5785_v20  ;;  %3035 = vmatmul.mubr.bf16.vlgmr.msra.gmra.mrb[92].mxu1 %v5785_v20 }
 0x971   :  { %3582 = vmatpush3.bf16.msra.mxu0 %v3649_v15  ;;  %3613 = vmatpush3.bf16.msra.mxu1 %v3664_v30 }
 0x972   :  { %3583 = vmatprep.subr.bf16.mxu0 %v3650_v11  ;;  %3614 = vmatprep.subr.bf16.mxu1 %v3959_v33 }
 0x973   :  { %3628 = vmatprep.mubr.msk.bf16.mxu1 %vm3960_vm1, %v3959_v33 }
 0x975   :  { %3584 = vmatpush3.bf16.msra.mxu0 %v3651_v40  ;;  %3615 = vmatpush3.bf16.msra.mxu1 %v3665_v29 }
 0x976   :  { %3585 = vmatprep.subr.bf16.mxu0 %v3652_v16  ;;  %3616 = vmatprep.subr.bf16.mxu1 %v3959_v33 }
 0x979   :  { %3586 = vmatpush3.bf16.msra.mxu0 %v3653_v58  ;;  %3617 = vmatpush3.bf16.msra.mxu1 %v3666_v19 }
 0x97a   :  { %3587 = vmatprep.subr.bf16.mxu0 %v3654_v37  ;;  %3618 = vmatprep.subr.bf16.mxu1 %v3959_v33 }
 0x97d   :  { %3588 = vmatpush3.bf16.msra.mxu0 %v3655_v63  ;;  %3619 = vmatpush3.bf16.msra.mxu1 %v3667_v34 }
 0x97e   :  { %3589 = vmatprep.subr.bf16.mxu0 %v3656_v38  ;;  %3620 = vmatprep.subr.bf16.mxu1 %v3959_v33 }
 0x981   :  { %3590 = vmatpush3.bf16.msra.mxu0 %v3657_v12  ;;  %3621 = vmatpush3.bf16.msra.mxu1 %v3668_v50 }
 0x982   :  { %3591 = vmatprep.subr.bf16.mxu0 %v3658_v13  ;;  %3622 = vmatprep.subr.bf16.mxu1 %v3959_v33 }
 0x985   :  { %3592 = vmatpush3.bf16.msra.mxu0 %v3659_v52  ;;  %3623 = vmatpush3.bf16.msra.mxu1 %v3669_v54 }
 0x986   :  { %3593 = vmatprep.subr.bf16.mxu0 %v3660_v35  ;;  %3624 = vmatprep.subr.bf16.mxu1 %v3959_v33 }
 0x989   :  { %3594 = vmatpush3.bf16.msra.mxu0 %v3661_v1 }
 0x98a   :  { %3595 = vmatprep.subr.bf16.mxu0 %v3662_v3 }
 0x98d   :  { %3596 = vmatpush3.bf16.msra.mxu0 %v3663_v14 }
 0xa03   :  { %v2913_v24 = vpop.f32.mrb[88].mxu0  ;;  %v2954_v44 = vpop.f32.mrb[88].mxu1 }
 0xa04   :  { %v2914_v36 = vadd.f32 %v2913_v24, %v7030_v62  ;;  %v2955_v21 = vadd.f32 %v2954_v44, %v7031_v41  ;;  %v2915_v5 = vpop.f32.mrb[89].mxu0  ;;  %v2956_v43 = vpop.f32.mrb[89].mxu1 }
 0xa05   :  { %v2916_v4 = vadd.f32 %v2915_v5, %v7032_v32  ;;  %v2957_v20 = vadd.f32 %v2956_v43, %v7033_v9  ;;  %v2917_v42 = vpop.f32.mrb[90].mxu0  ;;  %v2958_v10 = vpop.f32.mrb[90].mxu1 }
 0xa06   :  { %v2918_v53 = vpop.f32.mrb[91].mxu0  ;;  %v2959_v28 = vpop.f32.mrb[91].mxu1  ;;  %v3051_v45 = vmul.f32 0.5, %v2955_v21  ;;  %v3043_v27 = vmul.f32 0.5, %v2914_v36  ;;  %v3670_v10 = vld [vmem:[%s5922_s6 + $0x30] sm:$0xff]  }
 0xa07   :  { %v3052_v6 = vmul.f32 0.5, %v2957_v20  ;;  %v3044_v46 = vmul.f32 0.5, %v2916_v4  ;;  %3625 = vmatpush3.bf16.msra.mxu1 %v3670_v10  ;;  %v3671_v53 = vld [vmem:[%s5922_s6 + $0x38] sm:$0xff]   ;;  %s3961_s6 = smov [#allocation11]  }
 0xa08   :  { %3812 = vtanh.f32 %v3051_v45  ;;  %3626 = vmatprep.subr.bf16.mxu1 %v3959_v33  ;;  %s3380_s10 = sshll.u32 %s3961_s6, 4  ;;  %s3381_s10 = int_to_ptr.vmem [resolvable:$true] %s3380_s10 }
 0xa09   :  { %3814 = vtanh.f32 %v3052_v6  ;;  %p3925_p5 = scmp.lt.s32.totalorder %s3381_s10, %s3381_s10 }
 0xa0a   :  { %3816 = vtanh.f32 %v3043_v27 }
 0xa0b   :  { %3818 = vtanh.f32 %v3044_v46  ;;  %3627 = vmatpush3.bf16.msra.mxu1 %v3671_v53 }
 0xa12   :  { %v3813_v48 = vpop.eup %3812 }
 0xa13   :  { %v3815_v8 = vpop.eup %3814  ;;  %v3055_v40 = vmul.f32 0.5, %v3813_v48 }
 0xa14   :  { %v3817_v15 = vpop.eup %3816  ;;  %v3056_v58 = vmul.f32 0.5, %v3815_v8 }
 0xa15   :  { %v3819_v11 = vpop.eup %3818  ;;  %v3047_v63 = vmul.f32 0.5, %v3817_v15  ;;  %v3057_v12 = vadd.f32 0.5, %v3055_v40 }
 0xa16   :  { %v3048_v38 = vmul.f32 0.5, %v3819_v11  ;;  %v3058_v13 = vadd.f32 0.5, %v3056_v58 }
 0xa17   :  { %v3049_v52 = vadd.f32 0.5, %v3047_v63  ;;  %v3069_v14 = vmul.f32 %v3057_v12, %v5773_v0 }
 0xa18   :  { %v3050_v1 = vadd.f32 0.5, %v3048_v38  ;;  %v3070_v29 = vmul.f32 %v3058_v13, %v5775_v26 }
 0xa43   :  { %v2995_v39 = vpop.f32.mrb[92].mxu0  ;;  %v3036_v31 = vpop.f32.mrb[92].mxu1 }
 0xa44   :  { %v2996_v17 = vadd.f32 %v2995_v39, %v7034_v7  ;;  %v3037_v51 = vadd.f32 %v3036_v31, %v7035_v61  ;;  %v2997_v59 = vpop.f32.mrb[93].mxu0  ;;  %v3038_v60 = vpop.f32.mrb[93].mxu1  ;;  %v3572_v7 = vld [vmem:[%s5923_s7] ss:$0 sm:$0xff] }
 0xa45   :  { %v2998_v23 = vadd.f32 %v2997_v59, %v7036_v18  ;;  %v3039_v56 = vadd.f32 %v3038_v60, %v7037_v25  ;;  %v2999_v55 = vpop.f32.mrb[94].mxu0  ;;  %v3040_v49 = vpop.f32.mrb[94].mxu1 }
 0xa46   :  { %3820 = vtanh.f32 %v2996_v17  ;;  %v3000_v47 = vpop.f32.mrb[95].mxu0  ;;  %v3041_v2 = vpop.f32.mrb[95].mxu1  ;;  %v3061_v16 = vmul.f32 0.5, %v3037_v51 }
 0xa47   :  { %3822 = vtanh.f32 %v2998_v23  ;;  %v3062_v37 = vmul.f32 0.5, %v3039_v56 }
 0xa48   :  { %3824 = vtanh.f32 %v3061_v16 }
 0xa49   :  { %3826 = vtanh.f32 %v3062_v37 }
 0xa50   :  { %v3821_v35 = vpop.eup %3820 }
 0xa51   :  { %v3823_v3 = vpop.eup %3822  ;;  %v3071_v30 = vmul.f32 %v3821_v35, %v3049_v52 }
 0xa52   :  { %v3072_v19 = vmul.f32 %v3823_v3, %v3050_v1  ;;  %v3825_v54 = vpop.eup %3824 }
 0xa53   :  { %v3073_v34 = vadd.f32 %v3071_v30, %v3069_v14  ;;  %v3827_v24 = vpop.eup %3826  ;;  %v3065_v44 = vmul.f32 0.5, %v3825_v54 }
 0xa54   :  { %v3074_v50 = vadd.f32 %v3072_v19, %v3070_v29  ;;  %v3066_v62 = vmul.f32 0.5, %v3827_v24 }
 0xa55   :  { %3828 = vtanh.f32 %v3073_v34  ;;  %v3067_v36 = vadd.f32 0.5, %v3065_v44 }
 0xa56   :  { %3830 = vtanh.f32 %v3074_v50  ;;  %v3068_v21 = vadd.f32 0.5, %v3066_v62 }
 0xa5f   :  { %v3829_v41 = vpop.eup %3828 }
 0xa60   :  { %v3831_v5 = vpop.eup %3830  ;;  %v3077_v43 = vmul.f32 %v3829_v41, %v3067_v36 }
 0xa61   :  { %v3078_v32 = vmul.f32 %v3831_v5, %v3068_v21 }
 0xa62   :  { %v3079_v0 = vadd.f32 %v3077_v43, %v5780_v57 }
 0xa63   :  { %v3080_v4 = vadd.f32 %v3078_v32, %v5783_v22  ;;  %v3555_v22 = vld [vmem:[%s5921_s5] ss:$0 sm:$0xff]  ;;  %s3920_s5 = scalar_lea.vmem %s3381_s10, 128 }
 0xa64   :  { %v3081_v26 = vmul.f32 0.125, %v3079_v0  ;;  %p3921_p4 = scmp.ne.s32.totalorder %s3381_s10, %s3920_s5  ;;  %p3926_p6 = scmp.lt.s32.totalorder %s3920_s5, %s3920_s5 }
 0xa65   :  { %v3082_v9 = vmul.f32 0.125, %v3080_v4 }
 0xa66   :  { %v3083_v42 = vpack.c.bf16 %v3081_v26, %v3081_v26  ;;  %p3927_p7 = por %p3926_p6, %p3925_p5 }
 0xa67   :  { %v3084_v20 = vpack.c.bf16 %v3082_v9, %v3082_v9 }
 0xa68   :  { %p3928_p8 = pnand %p3927_p7, %p3921_p4 }
 0xa69   :  { %3252 = vmatprep.mubr.bf16.mxu0 %v3084_v20 }
 0xa6a   :  { %3253 = vmatmul.mubr.bf16.vlgmr.msra.gmra.mrb[96].mxu0 %v3083_v42 }
 0xb3d   :  { %v3597_v57 = vpop.f32.mrb[96].mxu0 }
 0xb3e   :  { %v3598_v28 = vpop.f32.mrb[97].mxu0 }
 0xb3f   :  { %v3599_v45 = vadd.f32 %v3598_v28, %v3597_v57  ;;  %v3600_v6 = vpop.f32.mrb[98].mxu0 }
 0xb40   :  { %v3601_v27 = vpop.f32.mrb[99].mxu0 }
 0xb41   :  { %v3255_v46 = vadd.f32 %v3599_v45, %v3555_v22 }
 0xb43   :  { %v3260_v39 = vmax.f32 %v3255_v46, 0.0 }
 0xb45   :  { %v3261_v31 = vpack.c.bf16 %v3260_v39, %v3260_v39 }
 0xb47   :  { %3629 = vmatmul.mubr.bf16.vlgmr.msra.gmra.mrb[96].mxu1 %v3261_v31 }
 0xc1a   :  { %v3367_v33 = vpop.f32.mrb[96].mxu1 }
 0xc1b   :  { %v3368_v17 = vadd.f32 %v3572_v7, %v3367_v33  ;;  %v3630_v61 = vpop.f32.mrb[97].mxu1 }
 0xc1c   :  { %v3370_v51 = vpop.f32.mrb[98].mxu1 }
 0xc1d   :  { %3373 = vst [vmem:[#allocation11] sm:$0xff] %v3368_v17  ;;  %v3631_v59 = vpop.f32.mrb[99].mxu1 }
 0xc1e   :  { %3931 = shalt.err (!%p3928_p8)
}
 0xc1f   :  { %s3932_s7 = scalar_lea.hbm %s5924_s8, 128 }
 0xc20   :  { %p3933_p9 = scmp.ne.s32.totalorder %s5924_s8, %s3932_s7  ;;  %p3936_p10 = scmp.lt.u32.totalorder %s3932_s7, %s5924_s8 }
 0xc22   :  { %p3938_p11 = pnand %p3936_p10, %p3933_p9 }
 0xc24   :  { %3941 = shalt.err (!%p3938_p11)
}
 0xc25   :  { %3383 = dma.vmem_to_hbm [thread:$0]  %s3381_s10, 128, %s5924_s8, [#allocation5]  }
 0xc26   :  { %3948 = dma.done.wait [#allocation5], 128  }
 0xc27   :  { %3949 = vsyncadd [#allocation5], 4294967168 }
 0xc28   :  { %3387 = vsyncpa [#allocation4], 1 }
 0xc29   :  { %3388 = vsyncpa [#allocation7], 1 }
 0xc2a   :  { %3389 = vsyncpa [#allocation10], 1 }
 0xc2b   :  { %3390 = vsyncpa [#allocation5], 1 }

</bundles_post_ra>
